<compile_context>
chip_gen: v7x
topology: tpu7x:2x2x1
jax: 0.10.0
libtpu: 0.0.40
codegen_flags: <defaults>
</compile_context>

<pallas_src>
import jax
import jax.numpy as jnp
from jax.experimental import pallas as pl
from jax.experimental.pallas import tpu as pltpu


MXU_DTYPE = jnp.bfloat16     # MXU inputs; accumulation stays float32.
M_GRID = 2025                # FoldNet plane grid (45 x 45)
M_PAD = 2048                 # padded to a multiple of (8, 128) tiling


def _mdot(a, b):
    """MXU matmul with bf16 inputs and f32 accumulation."""
    return jnp.dot(a.astype(MXU_DTYPE), b.astype(MXU_DTYPE),
                   preferred_element_type=jnp.float32)


def _row_tile(n, max_tile=512):
    """Largest tile <= max_tile dividing n and a multiple of 8 (else full n)."""
    if n <= max_tile:
        return n
    for t in range(max_tile, 7, -1):
        if n % t == 0 and t % 8 == 0:
            return t
    return n


# ----------------------------------------------------------------------------
# Pallas kernels
# ----------------------------------------------------------------------------
def pairwise_neg_sqdist(pts, *, row_tile=512):
    """pts: (B, N, 3) -> (B, N, N) with d[b,i,j] = -||p_i - p_j||^2 (as in knn())."""
    B, N, C = pts.shape
    tn = _row_tile(N, row_tile)

    def kernel(pr_ref, pa_ref, d_ref):
        pr = pr_ref[0]                                   # (tn, C) row block
        pa = pa_ref[0]                                   # (N, C) all points
        g = jax.lax.dot_general(pr, pa, (((1,), (1,)), ((), ())),
                                preferred_element_type=jnp.float32)  # (tn, N)
        rr = jnp.sum(pr * pr, axis=-1, keepdims=True)    # (tn, 1)
        cc = jnp.sum(pa * pa, axis=-1, keepdims=True)    # (N, 1)
        d_ref[0] = 2.0 * g - rr - cc.T

    return pl.pallas_call(
        kernel,
        out_shape=jax.ShapeDtypeStruct((B, N, N), jnp.float32),
        grid=(B, N // tn),
        in_specs=[pl.BlockSpec((1, tn, C), lambda b, i: (b, i, 0)),
                  pl.BlockSpec((1, N, C), lambda b, i: (b, 0, 0))],
        out_specs=pl.BlockSpec((1, tn, N), lambda b, i: (b, i, 0)),
        compiler_params=pltpu.CompilerParams(
            dimension_semantics=("parallel", "parallel")),
    )(pts, pts)


def pointwise_mlp(x, weights, biases, relus, *, row_tile=512):
    """Fused stack of 1x1 convs / linears over row tiles of points.

    x: (B, N, Cin); weights[i]: (Cin_i, Cout_i); biases[i]: (Cout_i,)
    relus[i]: apply ReLU after layer i.  Returns (B, N, Cout_last) f32.
    """
    B, N, Cin = x.shape
    L = len(weights)
    relus = tuple(bool(r) for r in relus)
    tn = _row_tile(N, row_tile)
    Cout = weights[-1].shape[1]

    def kernel(*refs):
        x_ref = refs[0]
        out_ref = refs[-1]
        h = x_ref[0]                                     # (tn, Cin)
        for i in range(L):
            w = refs[1 + 2 * i][...]
            b = refs[2 + 2 * i][...]
            h = _mdot(h, w) + b
            if relus[i]:
                h = jnp.maximum(h, 0.0)
        out_ref[0] = h

    in_specs = [pl.BlockSpec((1, tn, Cin), lambda b, i: (b, i, 0))]
    args = [x]
    for w, bi in zip(weights, biases):
        in_specs.append(pl.BlockSpec(w.shape, lambda b, i: (0, 0)))
        in_specs.append(pl.BlockSpec((1, bi.shape[0]), lambda b, i: (0, 0)))
        args += [w.astype(MXU_DTYPE), bi.reshape(1, -1)]

    return pl.pallas_call(
        kernel,
        out_shape=jax.ShapeDtypeStruct((B, N, Cout), jnp.float32),
        grid=(B, N // tn),
        in_specs=in_specs,
        out_specs=pl.BlockSpec((1, tn, Cout), lambda b, i: (b, i, 0)),
        compiler_params=pltpu.CompilerParams(
            dimension_semantics=("parallel", "parallel")),
    )(*args)


def graph_tail(x, params, *, row_tile=512):
    """Fused linear2 -> conv2 -> max over points -> mlp2.  x: (B, N, 128) -> (B, 1, fd)."""
    B, N, C = x.shape
    tn = _row_tile(N, row_tile)
    wl, bl = params["lin2_w"], params["lin2_b"]
    wc, bc = params["conv2_w"], params["conv2_b"]
    (wm1, wm2), (bm1, bm2) = params["mlp2_w"], params["mlp2_b"]
    D = wc.shape[1]            # 1024
    fd = wm2.shape[1]

    def kernel(x_ref, wl_ref, bl_ref, wc_ref, bc_ref,
               wm1_ref, bm1_ref, wm2_ref, bm2_ref, out_ref, acc_ref):
        i = pl.program_id(1)

        @pl.when(i == 0)
        def _init():
            acc_ref[...] = jnp.full(acc_ref.shape, -jnp.inf, acc_ref.dtype)

        h = x_ref[0]                                     # (tn, 128)
        h = _mdot(h, wl_ref[...]) + bl_ref[...]          # linear2 (no ReLU)
        h = _mdot(h, wc_ref[...]) + bc_ref[...]          # conv2   (no ReLU) -> (tn, 1024)
        acc_ref[...] = jnp.maximum(acc_ref[...],
                                   jnp.max(h, axis=0, keepdims=True))

        @pl.when(i == pl.num_programs(1) - 1)
        def _finalize():
            g = acc_ref[...]                             # (1, 1024) global max
            g = jnp.maximum(_mdot(g, wm1_ref[...]) + bm1_ref[...], 0.0)
            g = _mdot(g, wm2_ref[...]) + bm2_ref[...]
            out_ref[0] = g

    const = lambda shp: pl.BlockSpec(shp, lambda b, i: (0, 0))
    return pl.pallas_call(
        kernel,
        out_shape=jax.ShapeDtypeStruct((B, 1, fd), jnp.float32),
        grid=(B, N // tn),
        in_specs=[pl.BlockSpec((1, tn, C), lambda b, i: (b, i, 0)),
                  const(wl.shape), const((1, bl.shape[0])),
                  const(wc.shape), const((1, bc.shape[0])),
                  const(wm1.shape), const((1, bm1.shape[0])),
                  const(wm2.shape), const((1, bm2.shape[0]))],
        out_specs=pl.BlockSpec((1, 1, fd), lambda b, i: (b, 0, 0)),
        scratch_shapes=[pltpu.VMEM((1, D), jnp.float32)],
        compiler_params=pltpu.CompilerParams(
            dimension_semantics=("parallel", "arbitrary")),
    )(x,
      wl.astype(MXU_DTYPE), bl.reshape(1, -1),
      wc.astype(MXU_DTYPE), bc.reshape(1, -1),
      wm1.astype(MXU_DTYPE), bm1.reshape(1, -1),
      wm2.astype(MXU_DTYPE), bm2.reshape(1, -1))


# ----------------------------------------------------------------------------
# JAX glue (index-based gathers, top-k)
# ----------------------------------------------------------------------------
def knn_idx(pts_cl, k):
    pd = pairwise_neg_sqdist(pts_cl)          # (B, N, N)
    _, idx = jax.lax.top_k(pd, k)             # (B, N, k) -- k nearest (incl. self)
    return idx


def _gather_rows(feat_cl, idx2d):
    # feat_cl: (B, N, C); idx2d: (B, M) -> (B, M, C)
    return jax.vmap(lambda f, i: f[i])(feat_cl, idx2d)


def local_maxpool(feat_cl, idx):
    # Running max over k neighbors: peak (B, N, C) instead of (B, N, k, C).
    k = idx.shape[-1]
    acc = _gather_rows(feat_cl, idx[:, :, 0])
    for j in range(1, k):
        acc = jnp.maximum(acc, _gather_rows(feat_cl, idx[:, :, j]))
    return acc


def local_cov(pts_cl, idx):
    B, N, _ = pts_cl.shape
    n0 = _gather_rows(pts_cl, idx[:, :, 0])   # the point itself
    n1 = _gather_rows(pts_cl, idx[:, :, 1])   # nearest neighbor
    cov = (n0[..., :, None] * n1[..., None, :]).reshape(B, N, 9)
    return jnp.concatenate([pts_cl, cov], axis=-1)   # (B, N, 12)


# ----------------------------------------------------------------------------
# FoldNet encoder
# ----------------------------------------------------------------------------
def encoder_forward(params, pts_cl, k):
    idx = knn_idx(pts_cl, k)
    x = local_cov(pts_cl, idx)                                               # (B,N,12)
    x = pointwise_mlp(x, params["mlp1_w"], params["mlp1_b"],
                      [True, True, True])                                    # (B,N,64)
    # graph layer
    x = local_maxpool(x, idx)                                                # (B,N,64)
    x = pointwise_mlp(x, [params["lin1_w"], params["conv1_w"]],
                      [params["lin1_b"], params["conv1_b"]],
                      [False, True])                                         # (B,N,128)
    x = local_maxpool(x, idx)                                                # (B,N,128)
    feat = graph_tail(x, params)                                             # (B,1,fd)
    return feat


# ----------------------------------------------------------------------------
# FoldNet decoder (plane shape), fold1 + fold2 fused in one kernel
# ----------------------------------------------------------------------------
def build_plane_grid_padded(m_side=45, lo=-0.3, hi=0.3, m_pad=M_PAD):
    lin = jnp.linspace(lo, hi, m_side)
    gx, gy = jnp.meshgrid(lin, lin, indexing="ij")   # matches itertools.product(x, y)
    g = jnp.stack([gx.ravel(), gy.ravel()], axis=-1).astype(jnp.float32)   # (2025, 2)
    pad = jnp.zeros((m_pad - g.shape[0], 2), jnp.float32)
    return jnp.concatenate([g, pad], axis=0)                                # (m_pad, 2)


def decoder_forward(params, feat, *, m_tile=512):
    B, _, fd = feat.shape
    grid2d = build_plane_grid_padded()
    tm = _row_tile(M_PAD, m_tile)

    f1w, f1b = params["fold1_w"], params["fold1_b"]
    f2w, f2b = params["fold2_w"], params["fold2_b"]
    # Split the first fold layer: codeword contribution is constant over m.
    f1w0_feat, f1w0_grid = f1w[0][:fd], f1w[0][fd:]          # (fd,fd), (2,fd)
    f2w0_feat, f2w0_prev = f2w[0][:fd], f2w[0][fd:]          # (fd,fd), (3,fd)

    def kernel(feat_ref, grid_ref,
               a0f, a0g, ab0, a1, ab1, a2, ab2,
               c0f, c0p, cb0, c1, cb1, c2, cb2,
               out_ref):
        cw = feat_ref[0]                                      # (1, fd) codeword
        g = grid_ref[...]                                     # (tm, 2)
        # folding 1
        h = _mdot(g, a0g[...]) + _mdot(cw, a0f[...]) + ab0[...]
        h = jnp.maximum(h, 0.0)
        h = jnp.maximum(_mdot(h, a1[...]) + ab1[...], 0.0)
        f1 = _mdot(h, a2[...]) + ab2[...]                     # (tm, 3)
        # folding 2
        h = _mdot(f1, c0p[...]) + _mdot(cw, c0f[...]) + cb0[...]
        h = jnp.maximum(h, 0.0)
        h = jnp.maximum(_mdot(h, c1[...]) + cb1[...], 0.0)
        out_ref[0] = _mdot(h, c2[...]) + cb2[...]             # (tm, 3)

    const = lambda shp: pl.BlockSpec(shp, lambda b, i: (0, 0))
    weight_args = [f1w0_feat, f1w0_grid, f1b[0], f1w[1], f1b[1], f1w[2], f1b[2],
                   f2w0_feat, f2w0_prev, f2b[0], f2w[1], f2b[1], f2w[2], f2b[2]]

    in_specs = [pl.BlockSpec((1, 1, fd), lambda b, i: (b, 0, 0)),
                pl.BlockSpec((tm, 2), lambda b, i: (i, 0))]
    args = [feat, grid2d]
    for wa in weight_args:
        if wa.ndim == 1:                                      # bias
            in_specs.append(const((1, wa.shape[0])))
            args.append(wa.reshape(1, -1))
        else:                                                 # weight
            in_specs.append(const(wa.shape))
            args.append(wa.astype(MXU_DTYPE))

    out = pl.pallas_call(
        kernel,
        out_shape=jax.ShapeDtypeStruct((B, M_PAD, 3), jnp.float32),
        grid=(B, M_PAD // tm),
        in_specs=in_specs,
        out_specs=pl.BlockSpec((1, tm, 3), lambda b, i: (b, i, 0)),
        compiler_params=pltpu.CompilerParams(
            dimension_semantics=("parallel", "parallel")),
    )(*args)
    return out[:, :M_GRID, :]                                 # == torch output.transpose(1,2)


def foldnet_forward(params, pts_cl, k):
    feat = encoder_forward(params, pts_cl, k)
    return decoder_forward(params, feat)


# ----------------------------------------------------------------------------
# Deterministic parameter init (synthetic, PyTorch-default-style uniform)
# ----------------------------------------------------------------------------
def init_linear(key, fan_in, fan_out):
    kw, kb = jax.random.split(key)
    bound = 1.0 / jnp.sqrt(jnp.float32(fan_in))
    w = jax.random.uniform(kw, (fan_in, fan_out), jnp.float32, -bound, bound)
    b = jax.random.uniform(kb, (fan_out,), jnp.float32, -bound, bound)
    return w, b


def make_params(key, feat_dims):
    layer_shapes = {
        "mlp1": [(12, 64), (64, 64), (64, 64)],
        "lin1": [(64, 64)],
        "conv1": [(64, 128)],
        "lin2": [(128, 128)],
        "conv2": [(128, 1024)],
        "mlp2": [(1024, feat_dims), (feat_dims, feat_dims)],
        "fold1": [(feat_dims + 2, feat_dims), (feat_dims, feat_dims), (feat_dims, 3)],
        "fold2": [(feat_dims + 3, feat_dims), (feat_dims, feat_dims), (feat_dims, 3)],
    }
    n_layers = sum(len(v) for v in layer_shapes.values())
    keys = iter(jax.random.split(key, n_layers))
    params = {}
    for name, shapes in layer_shapes.items():
        ws, bs = [], []
        for (fi, fo) in shapes:
            w, b = init_linear(next(keys), fi, fo)
            ws.append(w)
            bs.append(b)
        if len(ws) == 1:
            params[name + "_w"], params[name + "_b"] = ws[0], bs[0]
        else:
            params[name + "_w"], params[name + "_b"] = ws, bs
    return params


# ----------------------------------------------------------------------------
if __name__ == "__main__":
    key = jax.random.PRNGKey(0)
    kp, kx = jax.random.split(key)

    B, N, K_NN, FEAT_DIMS = 2, 64, 8, 32   # small shapes (point count shrunk from 2048)
    params = make_params(kp, FEAT_DIMS)
    pts = jax.random.uniform(kx, (B, N, 3), jnp.float32, -1.0, 1.0)

    fwd = jax.jit(lambda p: foldnet_forward(params, p, K_NN))
    out = jax.block_until_ready(fwd(pts))

    assert out.shape == (B, M_GRID, 3), out.shape
    assert out.dtype == jnp.float32
    print("KERNEL_OK")
</pallas_src>

<mosaic_0001>
module attributes {stable_mosaic.version = 11 : i64} {
  func.func @kernel(%arg0: i32, %arg1: i32, %arg2: memref<1x64x3xf32, #tpu.memory_space<vmem>>, %arg3: memref<1x64x3xf32, #tpu.memory_space<vmem>>, %arg4: memref<1x64x64xf32, #tpu.memory_space<vmem>>) attributes {dimension_semantics = [#tpu.dimension_semantics<parallel>, #tpu.dimension_semantics<parallel>], iteration_bounds = array<i64: 2, 1>, scalar_prefetch = 0 : i64, scratch_operands = 0 : i64, tpu.core_type = #tpu.core_type<tc>, window_params = [{transform_indices = @transform_0, window_bounds = array<i64: 1, 64, 3>}, {transform_indices = @transform_1, window_bounds = array<i64: 1, 64, 3>}, {transform_indices = @transform_2, window_bounds = array<i64: 1, 64, 64>}]} {
    %c0 = arith.constant 0 : index
    %c0_0 = arith.constant 0 : index
    %c0_1 = arith.constant 0 : index
    %0 = vector.load %arg2[%c0, %c0_0, %c0_1] : memref<1x64x3xf32, #tpu.memory_space<vmem>>, vector<1x64x3xf32>
    %1 = vector.shape_cast %0 : vector<1x64x3xf32> to vector<64x3xf32>
    %c0_2 = arith.constant 0 : index
    %c0_3 = arith.constant 0 : index
    %c0_4 = arith.constant 0 : index
    %2 = vector.load %arg3[%c0_2, %c0_3, %c0_4] : memref<1x64x3xf32, #tpu.memory_space<vmem>>, vector<1x64x3xf32>
    %3 = vector.shape_cast %2 : vector<1x64x3xf32> to vector<64x3xf32>
    %cst = arith.constant dense<0.000000e+00> : vector<64x64xf32>
    %4 = tpu.matmul %1, %3, %cst {dimension_numbers = #tpu.dot_dimension_numbers<[1], [1], [0], [0], [0, 0, 1, 0], [], []>} : vector<64x3xf32>, vector<64x3xf32>, vector<64x64xf32> -> vector<64x64xf32>
    %5 = arith.mulf %1, %1 : vector<64x3xf32>
    %cst_5 = arith.constant dense<0.000000e+00> : vector<64xf32>
    %6 = vector.multi_reduction <add>, %5, %cst_5 [1] : vector<64x3xf32> to vector<64xf32>
    %7 = vector.shape_cast %6 : vector<64xf32> to vector<64x1xf32>
    %8 = arith.mulf %3, %3 : vector<64x3xf32>
    %cst_6 = arith.constant dense<0.000000e+00> : vector<64xf32>
    %9 = vector.multi_reduction <add>, %8, %cst_6 [1] : vector<64x3xf32> to vector<64xf32>
    %10 = vector.shape_cast %9 : vector<64xf32> to vector<64x1xf32>
    %cst_7 = arith.constant 2.000000e+00 : f32
    %11 = vector.broadcast %cst_7 : f32 to vector<64x64xf32>
    %12 = arith.mulf %11, %4 : vector<64x64xf32>
    %13 = vector.broadcast %7 : vector<64x1xf32> to vector<64x64xf32>
    %14 = arith.subf %12, %13 : vector<64x64xf32>
    %15 = tpu.transpose %10, [1, 0] : vector<64x1xf32> -> vector<1x64xf32>
    %16 = vector.broadcast %15 : vector<1x64xf32> to vector<64x64xf32>
    %17 = arith.subf %14, %16 : vector<64x64xf32>
    %c0_8 = arith.constant 0 : index
    %c0_9 = arith.constant 0 : index
    %c0_10 = arith.constant 0 : index
    %18 = vector.load %arg4[%c0_8, %c0_9, %c0_10] : memref<1x64x64xf32, #tpu.memory_space<vmem>>, vector<1x64x64xf32>
    %19 = vector.shape_cast %18 : vector<1x64x64xf32> to vector<64x64xf32>
    %20 = vector.shape_cast %17 : vector<64x64xf32> to vector<1x64x64xf32>
    tpu.vector_store %arg4[%c0_8, %c0_9, %c0_10], %20 {strides = array<i32>} : memref<1x64x64xf32, #tpu.memory_space<vmem>>, vector<1x64x64xf32>,
    return
  }
  func.func @transform_0(%arg0: i32, %arg1: i32) -> (i32, i32, i32) {
    %c0_i32 = arith.constant 0 : i32
    %c0_i32_0 = arith.constant 0 : i32
    return %arg0, %arg1, %c0_i32 : i32, i32, i32
  }
  func.func @transform_1(%arg0: i32, %arg1: i32) -> (i32, i32, i32) {
    %c0_i32 = arith.constant 0 : i32
    %c0_i32_0 = arith.constant 0 : i32
    %c0_i32_1 = arith.constant 0 : i32
    return %arg0, %c0_i32, %c0_i32_0 : i32, i32, i32
  }
  func.func @transform_2(%arg0: i32, %arg1: i32) -> (i32, i32, i32) {
    %c0_i32 = arith.constant 0 : i32
    %c0_i32_0 = arith.constant 0 : i32
    return %arg0, %arg1, %c0_i32 : i32, i32, i32
  }
}

module attributes {stable_mosaic.version = 11 : i64} {
  func.func @kernel(%arg0: i32, %arg1: i32, %arg2: memref<1x64x12xf32, #tpu.memory_space<vmem>>, %arg3: memref<12x64xbf16, #tpu.memory_space<vmem>>, %arg4: memref<1x64xf32, #tpu.memory_space<vmem>>, %arg5: memref<64x64xbf16, #tpu.memory_space<vmem>>, %arg6: memref<1x64xf32, #tpu.memory_space<vmem>>, %arg7: memref<64x64xbf16, #tpu.memory_space<vmem>>, %arg8: memref<1x64xf32, #tpu.memory_space<vmem>>, %arg9: memref<1x64x64xf32, #tpu.memory_space<vmem>>) attributes {dimension_semantics = [#tpu.dimension_semantics<parallel>, #tpu.dimension_semantics<parallel>], iteration_bounds = array<i64: 2, 1>, scalar_prefetch = 0 : i64, scratch_operands = 0 : i64, tpu.core_type = #tpu.core_type<tc>, window_params = [{transform_indices = @transform_0, window_bounds = array<i64: 1, 64, 12>}, {pipeline_mode = #tpu.pipeline_mode<synchronous>, transform_indices = @transform_1, window_bounds = array<i64: 12, 64>}, {pipeline_mode = #tpu.pipeline_mode<synchronous>, transform_indices = @transform_2, window_bounds = array<i64: 1, 64>}, {pipeline_mode = #tpu.pipeline_mode<synchronous>, transform_indices = @transform_3, window_bounds = array<i64: 64, 64>}, {pipeline_mode = #tpu.pipeline_mode<synchronous>, transform_indices = @transform_4, window_bounds = array<i64: 1, 64>}, {pipeline_mode = #tpu.pipeline_mode<synchronous>, transform_indices = @transform_5, window_bounds = array<i64: 64, 64>}, {pipeline_mode = #tpu.pipeline_mode<synchronous>, transform_indices = @transform_6, window_bounds = array<i64: 1, 64>}, {transform_indices = @transform_7, window_bounds = array<i64: 1, 64, 64>}]} {
    %c0 = arith.constant 0 : index
    %c0_0 = arith.constant 0 : index
    %c0_1 = arith.constant 0 : index
    %0 = vector.load %arg2[%c0, %c0_0, %c0_1] : memref<1x64x12xf32, #tpu.memory_space<vmem>>, vector<1x64x12xf32>
    %1 = vector.shape_cast %0 : vector<1x64x12xf32> to vector<64x12xf32>
    %c0_2 = arith.constant 0 : index
    %c0_3 = arith.constant 0 : index
    %2 = vector.load %arg3[%c0_2, %c0_3] : memref<12x64xbf16, #tpu.memory_space<vmem>>, vector<12x64xbf16>
    %c0_4 = arith.constant 0 : index
    %c0_5 = arith.constant 0 : index
    %3 = vector.load %arg4[%c0_4, %c0_5] : memref<1x64xf32, #tpu.memory_space<vmem>>, vector<1x64xf32>
    %4 = arith.truncf %1 : vector<64x12xf32> to vector<64x12xbf16>
    %cst = arith.constant dense<0.000000e+00> : vector<64x64xf32>
    %5 = tpu.matmul %4, %2, %cst {dimension_numbers = #tpu.dot_dimension_numbers<[1], [0], [0], [1], [0, 0, 1, 1], [], []>} : vector<64x12xbf16>, vector<12x64xbf16>, vector<64x64xf32> -> vector<64x64xf32>
    %6 = vector.broadcast %3 : vector<1x64xf32> to vector<64x64xf32>
    %7 = arith.addf %5, %6 : vector<64x64xf32>
    %cst_6 = arith.constant 0.000000e+00 : f32
    %8 = vector.broadcast %cst_6 : f32 to vector<64x64xf32>
    %9 = arith.maximumf %7, %8 : vector<64x64xf32>
    %c0_7 = arith.constant 0 : index
    %c0_8 = arith.constant 0 : index
    %10 = vector.load %arg5[%c0_7, %c0_8] : memref<64x64xbf16, #tpu.memory_space<vmem>>, vector<64x64xbf16>
    %c0_9 = arith.constant 0 : index
    %c0_10 = arith.constant 0 : index
    %11 = vector.load %arg6[%c0_9, %c0_10] : memref<1x64xf32, #tpu.memory_space<vmem>>, vector<1x64xf32>
    %12 = arith.truncf %9 : vector<64x64xf32> to vector<64x64xbf16>
    %cst_11 = arith.constant dense<0.000000e+00> : vector<64x64xf32>
    %13 = tpu.matmul %12, %10, %cst_11 {dimension_numbers = #tpu.dot_dimension_numbers<[1], [0], [0], [1], [0, 0, 1, 1], [], []>} : vector<64x64xbf16>, vector<64x64xbf16>, vector<64x64xf32> -> vector<64x64xf32>
    %14 = vector.broadcast %11 : vector<1x64xf32> to vector<64x64xf32>
    %15 = arith.addf %13, %14 : vector<64x64xf32>
    %cst_12 = arith.constant 0.000000e+00 : f32
    %16 = vector.broadcast %cst_12 : f32 to vector<64x64xf32>
    %17 = arith.maximumf %15, %16 : vector<64x64xf32>
    %c0_13 = arith.constant 0 : index
    %c0_14 = arith.constant 0 : index
    %18 = vector.load %arg7[%c0_13, %c0_14] : memref<64x64xbf16, #tpu.memory_space<vmem>>, vector<64x64xbf16>
    %c0_15 = arith.constant 0 : index
    %c0_16 = arith.constant 0 : index
    %19 = vector.load %arg8[%c0_15, %c0_16] : memref<1x64xf32, #tpu.memory_space<vmem>>, vector<1x64xf32>
    %20 = arith.truncf %17 : vector<64x64xf32> to vector<64x64xbf16>
    %cst_17 = arith.constant dense<0.000000e+00> : vector<64x64xf32>
    %21 = tpu.matmul %20, %18, %cst_17 {dimension_numbers = #tpu.dot_dimension_numbers<[1], [0], [0], [1], [0, 0, 1, 1], [], []>} : vector<64x64xbf16>, vector<64x64xbf16>, vector<64x64xf32> -> vector<64x64xf32>
    %22 = vector.broadcast %19 : vector<1x64xf32> to vector<64x64xf32>
    %23 = arith.addf %21, %22 : vector<64x64xf32>
    %cst_18 = arith.constant 0.000000e+00 : f32
    %24 = vector.broadcast %cst_18 : f32 to vector<64x64xf32>
    %25 = arith.maximumf %23, %24 : vector<64x64xf32>
    %c0_19 = arith.constant 0 : index
    %c0_20 = arith.constant 0 : index
    %c0_21 = arith.constant 0 : index
    %26 = vector.load %arg9[%c0_19, %c0_20, %c0_21] : memref<1x64x64xf32, #tpu.memory_space<vmem>>, vector<1x64x64xf32>
    %27 = vector.shape_cast %26 : vector<1x64x64xf32> to vector<64x64xf32>
    %28 = vector.shape_cast %25 : vector<64x64xf32> to vector<1x64x64xf32>
    tpu.vector_store %arg9[%c0_19, %c0_20, %c0_21], %28 {strides = array<i32>} : memref<1x64x64xf32, #tpu.memory_space<vmem>>, vector<1x64x64xf32>,
    return
  }
  func.func @transform_0(%arg0: i32, %arg1: i32) -> (i32, i32, i32) {
    %c0_i32 = arith.constant 0 : i32
    %c0_i32_0 = arith.constant 0 : i32
    return %arg0, %arg1, %c0_i32 : i32, i32, i32
  }
  func.func @transform_1(%arg0: i32, %arg1: i32) -> (i32, i32) {
    %c0_i32 = arith.constant 0 : i32
    %c0_i32_0 = arith.constant 0 : i32
    %c0_i32_1 = arith.constant 0 : i32
    return %c0_i32, %c0_i32_0 : i32, i32
  }
  func.func @transform_2(%arg0: i32, %arg1: i32) -> (i32, i32) {
    %c0_i32 = arith.constant 0 : i32
    %c0_i32_0 = arith.constant 0 : i32
    %c0_i32_1 = arith.constant 0 : i32
    return %c0_i32, %c0_i32_0 : i32, i32
  }
  func.func @transform_3(%arg0: i32, %arg1: i32) -> (i32, i32) {
    %c0_i32 = arith.constant 0 : i32
    %c0_i32_0 = arith.constant 0 : i32
    %c0_i32_1 = arith.constant 0 : i32
    return %c0_i32, %c0_i32_0 : i32, i32
  }
  func.func @transform_4(%arg0: i32, %arg1: i32) -> (i32, i32) {
    %c0_i32 = arith.constant 0 : i32
    %c0_i32_0 = arith.constant 0 : i32
    %c0_i32_1 = arith.constant 0 : i32
    return %c0_i32, %c0_i32_0 : i32, i32
  }
  func.func @transform_5(%arg0: i32, %arg1: i32) -> (i32, i32) {
    %c0_i32 = arith.constant 0 : i32
    %c0_i32_0 = arith.constant 0 : i32
    %c0_i32_1 = arith.constant 0 : i32
    return %c0_i32, %c0_i32_0 : i32, i32
  }
  func.func @transform_6(%arg0: i32, %arg1: i32) -> (i32, i32) {
    %c0_i32 = arith.constant 0 : i32
    %c0_i32_0 = arith.constant 0 : i32
    %c0_i32_1 = arith.constant 0 : i32
    return %c0_i32, %c0_i32_0 : i32, i32
  }
  func.func @transform_7(%arg0: i32, %arg1: i32) -> (i32, i32, i32) {
    %c0_i32 = arith.constant 0 : i32
    %c0_i32_0 = arith.constant 0 : i32
    return %arg0, %arg1, %c0_i32 : i32, i32, i32
  }
}

module attributes {stable_mosaic.version = 11 : i64} {
  func.func @kernel(%arg0: i32, %arg1: i32, %arg2: memref<1x64x64xf32, #tpu.memory_space<vmem>>, %arg3: memref<64x64xbf16, #tpu.memory_space<vmem>>, %arg4: memref<1x64xf32, #tpu.memory_space<vmem>>, %arg5: memref<64x128xbf16, #tpu.memory_space<vmem>>, %arg6: memref<1x128xf32, #tpu.memory_space<vmem>>, %arg7: memref<1x64x128xf32, #tpu.memory_space<vmem>>) attributes {dimension_semantics = [#tpu.dimension_semantics<parallel>, #tpu.dimension_semantics<parallel>], iteration_bounds = array<i64: 2, 1>, scalar_prefetch = 0 : i64, scratch_operands = 0 : i64, tpu.core_type = #tpu.core_type<tc>, window_params = [{transform_indices = @transform_0, window_bounds = array<i64: 1, 64, 64>}, {pipeline_mode = #tpu.pipeline_mode<synchronous>, transform_indices = @transform_1, window_bounds = array<i64: 64, 64>}, {pipeline_mode = #tpu.pipeline_mode<synchronous>, transform_indices = @transform_2, window_bounds = array<i64: 1, 64>}, {pipeline_mode = #tpu.pipeline_mode<synchronous>, transform_indices = @transform_3, window_bounds = array<i64: 64, 128>}, {pipeline_mode = #tpu.pipeline_mode<synchronous>, transform_indices = @transform_4, window_bounds = array<i64: 1, 128>}, {transform_indices = @transform_5, window_bounds = array<i64: 1, 64, 128>}]} {
    %c0 = arith.constant 0 : index
    %c0_0 = arith.constant 0 : index
    %c0_1 = arith.constant 0 : index
    %0 = vector.load %arg2[%c0, %c0_0, %c0_1] : memref<1x64x64xf32, #tpu.memory_space<vmem>>, vector<1x64x64xf32>
    %1 = vector.shape_cast %0 : vector<1x64x64xf32> to vector<64x64xf32>
    %c0_2 = arith.constant 0 : index
    %c0_3 = arith.constant 0 : index
    %2 = vector.load %arg3[%c0_2, %c0_3] : memref<64x64xbf16, #tpu.memory_space<vmem>>, vector<64x64xbf16>
    %c0_4 = arith.constant 0 : index
    %c0_5 = arith.constant 0 : index
    %3 = vector.load %arg4[%c0_4, %c0_5] : memref<1x64xf32, #tpu.memory_space<vmem>>, vector<1x64xf32>
    %4 = arith.truncf %1 : vector<64x64xf32> to vector<64x64xbf16>
    %cst = arith.constant dense<0.000000e+00> : vector<64x64xf32>
    %5 = tpu.matmul %4, %2, %cst {dimension_numbers = #tpu.dot_dimension_numbers<[1], [0], [0], [1], [0, 0, 1, 1], [], []>} : vector<64x64xbf16>, vector<64x64xbf16>, vector<64x64xf32> -> vector<64x64xf32>
    %6 = vector.broadcast %3 : vector<1x64xf32> to vector<64x64xf32>
    %7 = arith.addf %5, %6 : vector<64x64xf32>
    %c0_6 = arith.constant 0 : index
    %c0_7 = arith.constant 0 : index
    %8 = vector.load %arg5[%c0_6, %c0_7] : memref<64x128xbf16, #tpu.memory_space<vmem>>, vector<64x128xbf16>
    %c0_8 = arith.constant 0 : index
    %c0_9 = arith.constant 0 : index
    %9 = vector.load %arg6[%c0_8, %c0_9] : memref<1x128xf32, #tpu.memory_space<vmem>>, vector<1x128xf32>
    %10 = arith.truncf %7 : vector<64x64xf32> to vector<64x64xbf16>
    %cst_10 = arith.constant dense<0.000000e+00> : vector<64x128xf32>
    %11 = tpu.matmul %10, %8, %cst_10 {dimension_numbers = #tpu.dot_dimension_numbers<[1], [0], [0], [1], [0, 0, 1, 1], [], []>} : vector<64x64xbf16>, vector<64x128xbf16>, vector<64x128xf32> -> vector<64x128xf32>
    %12 = vector.broadcast %9 : vector<1x128xf32> to vector<64x128xf32>
    %13 = arith.addf %11, %12 : vector<64x128xf32>
    %cst_11 = arith.constant 0.000000e+00 : f32
    %14 = vector.broadcast %cst_11 : f32 to vector<64x128xf32>
    %15 = arith.maximumf %13, %14 : vector<64x128xf32>
    %c0_12 = arith.constant 0 : index
    %c0_13 = arith.constant 0 : index
    %c0_14 = arith.constant 0 : index
    %16 = vector.load %arg7[%c0_12, %c0_13, %c0_14] : memref<1x64x128xf32, #tpu.memory_space<vmem>>, vector<1x64x128xf32>
    %17 = vector.shape_cast %16 : vector<1x64x128xf32> to vector<64x128xf32>
    %18 = vector.shape_cast %15 : vector<64x128xf32> to vector<1x64x128xf32>
    tpu.vector_store %arg7[%c0_12, %c0_13, %c0_14], %18 {strides = array<i32>} : memref<1x64x128xf32, #tpu.memory_space<vmem>>, vector<1x64x128xf32>,
    return
  }
  func.func @transform_0(%arg0: i32, %arg1: i32) -> (i32, i32, i32) {
    %c0_i32 = arith.constant 0 : i32
    %c0_i32_0 = arith.constant 0 : i32
    return %arg0, %arg1, %c0_i32 : i32, i32, i32
  }
  func.func @transform_1(%arg0: i32, %arg1: i32) -> (i32, i32) {
    %c0_i32 = arith.constant 0 : i32
    %c0_i32_0 = arith.constant 0 : i32
    %c0_i32_1 = arith.constant 0 : i32
    return %c0_i32, %c0_i32_0 : i32, i32
  }
  func.func @transform_2(%arg0: i32, %arg1: i32) -> (i32, i32) {
    %c0_i32 = arith.constant 0 : i32
    %c0_i32_0 = arith.constant 0 : i32
    %c0_i32_1 = arith.constant 0 : i32
    return %c0_i32, %c0_i32_0 : i32, i32
  }
  func.func @transform_3(%arg0: i32, %arg1: i32) -> (i32, i32) {
    %c0_i32 = arith.constant 0 : i32
    %c0_i32_0 = arith.constant 0 : i32
    %c0_i32_1 = arith.constant 0 : i32
    return %c0_i32, %c0_i32_0 : i32, i32
  }
  func.func @transform_4(%arg0: i32, %arg1: i32) -> (i32, i32) {
    %c0_i32 = arith.constant 0 : i32
    %c0_i32_0 = arith.constant 0 : i32
    %c0_i32_1 = arith.constant 0 : i32
    return %c0_i32, %c0_i32_0 : i32, i32
  }
  func.func @transform_5(%arg0: i32, %arg1: i32) -> (i32, i32, i32) {
    %c0_i32 = arith.constant 0 : i32
    %c0_i32_0 = arith.constant 0 : i32
    return %arg0, %arg1, %c0_i32 : i32, i32, i32
  }
}

module attributes {stable_mosaic.version = 11 : i64} {
  func.func @kernel(%arg0: i32, %arg1: i32, %arg2: memref<1x64x128xf32, #tpu.memory_space<vmem>>, %arg3: memref<128x128xbf16, #tpu.memory_space<vmem>>, %arg4: memref<1x128xf32, #tpu.memory_space<vmem>>, %arg5: memref<128x1024xbf16, #tpu.memory_space<vmem>>, %arg6: memref<1x1024xf32, #tpu.memory_space<vmem>>, %arg7: memref<1024x32xbf16, #tpu.memory_space<vmem>>, %arg8: memref<1x32xf32, #tpu.memory_space<vmem>>, %arg9: memref<32x32xbf16, #tpu.memory_space<vmem>>, %arg10: memref<1x32xf32, #tpu.memory_space<vmem>>, %arg11: memref<1x1x32xf32, #tpu.memory_space<vmem>>, %arg12: memref<1x1024xf32, #tpu.memory_space<vmem>>) attributes {dimension_semantics = [#tpu.dimension_semantics<parallel>, #tpu.dimension_semantics<arbitrary>], iteration_bounds = array<i64: 2, 1>, scalar_prefetch = 0 : i64, scratch_operands = 1 : i64, tpu.core_type = #tpu.core_type<tc>, window_params = [{transform_indices = @transform_0, window_bounds = array<i64: 1, 64, 128>}, {pipeline_mode = #tpu.pipeline_mode<synchronous>, transform_indices = @transform_1, window_bounds = array<i64: 128, 128>}, {pipeline_mode = #tpu.pipeline_mode<synchronous>, transform_indices = @transform_2, window_bounds = array<i64: 1, 128>}, {pipeline_mode = #tpu.pipeline_mode<synchronous>, transform_indices = @transform_3, window_bounds = array<i64: 128, 1024>}, {pipeline_mode = #tpu.pipeline_mode<synchronous>, transform_indices = @transform_4, window_bounds = array<i64: 1, 1024>}, {pipeline_mode = #tpu.pipeline_mode<synchronous>, transform_indices = @transform_5, window_bounds = array<i64: 1024, 32>}, {pipeline_mode = #tpu.pipeline_mode<synchronous>, transform_indices = @transform_6, window_bounds = array<i64: 1, 32>}, {pipeline_mode = #tpu.pipeline_mode<synchronous>, transform_indices = @transform_7, window_bounds = array<i64: 32, 32>}, {pipeline_mode = #tpu.pipeline_mode<synchronous>, transform_indices = @transform_8, window_bounds = array<i64: 1, 32>}, {transform_indices = @transform_9, window_bounds = array<i64: 1, 1, 32>}]} {
    %c0_i32 = arith.constant 0 : i32
    %0 = arith.cmpi eq, %arg1, %c0_i32 : i32
    %1 = arith.extui %0 : i1 to i32
    %c0_i32_0 = arith.constant 0 : i32
    %2 = arith.cmpi ne, %1, %c0_i32_0 : i32
    scf.if %2 {
      %cst_19 = arith.constant 0xFF800000 : f32
      %25 = vector.broadcast %cst_19 : f32 to vector<1x1024xf32>
      %c0_20 = arith.constant 0 : index
      %c0_21 = arith.constant 0 : index
      %26 = vector.load %arg12[%c0_20, %c0_21] : memref<1x1024xf32, #tpu.memory_space<vmem>>, vector<1x1024xf32>
      tpu.vector_store %arg12[%c0_20, %c0_21], %25 {strides = array<i32>} : memref<1x1024xf32, #tpu.memory_space<vmem>>, vector<1x1024xf32>,
    } else {
    }
    %c0 = arith.constant 0 : index
    %c0_1 = arith.constant 0 : index
    %c0_2 = arith.constant 0 : index
    %3 = vector.load %arg2[%c0, %c0_1, %c0_2] : memref<1x64x128xf32, #tpu.memory_space<vmem>>, vector<1x64x128xf32>
    %4 = vector.shape_cast %3 : vector<1x64x128xf32> to vector<64x128xf32>
    %c0_3 = arith.constant 0 : index
    %c0_4 = arith.constant 0 : index
    %5 = vector.load %arg3[%c0_3, %c0_4] : memref<128x128xbf16, #tpu.memory_space<vmem>>, vector<128x128xbf16>
    %6 = arith.truncf %4 : vector<64x128xf32> to vector<64x128xbf16>
    %cst = arith.constant dense<0.000000e+00> : vector<64x128xf32>
    %7 = tpu.matmul %6, %5, %cst {dimension_numbers = #tpu.dot_dimension_numbers<[1], [0], [0], [1], [0, 0, 1, 1], [], []>} : vector<64x128xbf16>, vector<128x128xbf16>, vector<64x128xf32> -> vector<64x128xf32>
    %c0_5 = arith.constant 0 : index
    %c0_6 = arith.constant 0 : index
    %8 = vector.load %arg4[%c0_5, %c0_6] : memref<1x128xf32, #tpu.memory_space<vmem>>, vector<1x128xf32>
    %9 = vector.broadcast %8 : vector<1x128xf32> to vector<64x128xf32>
    %10 = arith.addf %7, %9 : vector<64x128xf32>
    %c0_7 = arith.constant 0 : index
    %c0_8 = arith.constant 0 : index
    %11 = vector.load %arg5[%c0_7, %c0_8] : memref<128x1024xbf16, #tpu.memory_space<vmem>>, vector<128x1024xbf16>
    %12 = arith.truncf %10 : vector<64x128xf32> to vector<64x128xbf16>
    %cst_9 = arith.constant dense<0.000000e+00> : vector<64x1024xf32>
    %13 = tpu.matmul %12, %11, %cst_9 {dimension_numbers = #tpu.dot_dimension_numbers<[1], [0], [0], [1], [0, 0, 1, 1], [], []>} : vector<64x128xbf16>, vector<128x1024xbf16>, vector<64x1024xf32> -> vector<64x1024xf32>
    %c0_10 = arith.constant 0 : index
    %c0_11 = arith.constant 0 : index
    %14 = vector.load %arg6[%c0_10, %c0_11] : memref<1x1024xf32, #tpu.memory_space<vmem>>, vector<1x1024xf32>
    %15 = vector.broadcast %14 : vector<1x1024xf32> to vector<64x1024xf32>
    %16 = arith.addf %13, %15 : vector<64x1024xf32>
    %c0_12 = arith.constant 0 : index
    %c0_13 = arith.constant 0 : index
    %17 = vector.load %arg12[%c0_12, %c0_13] : memref<1x1024xf32, #tpu.memory_space<vmem>>, vector<1x1024xf32>
    %cst_14 = arith.constant dense<0xFF800000> : vector<1024xf32>
    %18 = vector.multi_reduction <maximumf>, %16, %cst_14 [0] : vector<64x1024xf32> to vector<1024xf32>
    %19 = vector.shape_cast %18 : vector<1024xf32> to vector<1x1024xf32>
    %20 = arith.maximumf %17, %19 : vector<1x1024xf32>
    %c0_15 = arith.constant 0 : index
    %c0_16 = arith.constant 0 : index
    %21 = vector.load %arg12[%c0_15, %c0_16] : memref<1x1024xf32, #tpu.memory_space<vmem>>, vector<1x1024xf32>
    tpu.vector_store %arg12[%c0_15, %c0_16], %20 {strides = array<i32>} : memref<1x1024xf32, #tpu.memory_space<vmem>>, vector<1x1024xf32>,
    %c0_i32_17 = arith.constant 0 : i32
    %22 = arith.cmpi eq, %arg1, %c0_i32_17 : i32
    %23 = arith.extui %22 : i1 to i32
    %c0_i32_18 = arith.constant 0 : i32
    %24 = arith.cmpi ne, %23, %c0_i32_18 : i32
    scf.if %24 {
      %c0_19 = arith.constant 0 : index
      %c0_20 = arith.constant 0 : index
      %25 = vector.load %arg12[%c0_19, %c0_20] : memref<1x1024xf32, #tpu.memory_space<vmem>>, vector<1x1024xf32>
      %c0_21 = arith.constant 0 : index
      %c0_22 = arith.constant 0 : index
      %26 = vector.load %arg7[%c0_21, %c0_22] : memref<1024x32xbf16, #tpu.memory_space<vmem>>, vector<1024x32xbf16>
      %27 = arith.truncf %25 : vector<1x1024xf32> to vector<1x1024xbf16>
      %cst_23 = arith.constant dense<0.000000e+00> : vector<1x32xf32>
      %28 = tpu.matmul %27, %26, %cst_23 {dimension_numbers = #tpu.dot_dimension_numbers<[1], [0], [0], [1], [0, 0, 1, 1], [], []>} : vector<1x1024xbf16>, vector<1024x32xbf16>, vector<1x32xf32> -> vector<1x32xf32>
      %c0_24 = arith.constant 0 : index
      %c0_25 = arith.constant 0 : index
      %29 = vector.load %arg8[%c0_24, %c0_25] : memref<1x32xf32, #tpu.memory_space<vmem>>, vector<1x32xf32>
      %30 = arith.addf %28, %29 : vector<1x32xf32>
      %cst_26 = arith.constant 0.000000e+00 : f32
      %31 = vector.broadcast %cst_26 : f32 to vector<1x32xf32>
      %32 = arith.maximumf %30, %31 : vector<1x32xf32>
      %c0_27 = arith.constant 0 : index
      %c0_28 = arith.constant 0 : index
      %33 = vector.load %arg9[%c0_27, %c0_28] : memref<32x32xbf16, #tpu.memory_space<vmem>>, vector<32x32xbf16>
      %34 = arith.truncf %32 : vector<1x32xf32> to vector<1x32xbf16>
      %cst_29 = arith.constant dense<0.000000e+00> : vector<1x32xf32>
      %35 = tpu.matmul %34, %33, %cst_29 {dimension_numbers = #tpu.dot_dimension_numbers<[1], [0], [0], [1], [0, 0, 1, 1], [], []>} : vector<1x32xbf16>, vector<32x32xbf16>, vector<1x32xf32> -> vector<1x32xf32>
      %c0_30 = arith.constant 0 : index
      %c0_31 = arith.constant 0 : index
      %36 = vector.load %arg10[%c0_30, %c0_31] : memref<1x32xf32, #tpu.memory_space<vmem>>, vector<1x32xf32>
      %37 = arith.addf %35, %36 : vector<1x32xf32>
      %c0_32 = arith.constant 0 : index
      %c0_33 = arith.constant 0 : index
      %c0_34 = arith.constant 0 : index
      %38 = vector.load %arg11[%c0_32, %c0_33, %c0_34] : memref<1x1x32xf32, #tpu.memory_space<vmem>>, vector<1x1x32xf32>
      %39 = vector.shape_cast %38 : vector<1x1x32xf32> to vector<1x32xf32>
      %40 = vector.shape_cast %37 : vector<1x32xf32> to vector<1x1x32xf32>
      tpu.vector_store %arg11[%c0_32, %c0_33, %c0_34], %40 {strides = array<i32>} : memref<1x1x32xf32, #tpu.memory_space<vmem>>, vector<1x1x32xf32>,
    } else {
    }
    return
  }
  func.func @transform_0(%arg0: i32, %arg1: i32) -> (i32, i32, i32) {
    %c0_i32 = arith.constant 0 : i32
    %c0_i32_0 = arith.constant 0 : i32
    return %arg0, %arg1, %c0_i32 : i32, i32, i32
  }
  func.func @transform_1(%arg0: i32, %arg1: i32) -> (i32, i32) {
    %c0_i32 = arith.constant 0 : i32
    %c0_i32_0 = arith.constant 0 : i32
    %c0_i32_1 = arith.constant 0 : i32
    return %c0_i32, %c0_i32_0 : i32, i32
  }
  func.func @transform_2(%arg0: i32, %arg1: i32) -> (i32, i32) {
    %c0_i32 = arith.constant 0 : i32
    %c0_i32_0 = arith.constant 0 : i32
    %c0_i32_1 = arith.constant 0 : i32
    return %c0_i32, %c0_i32_0 : i32, i32
  }
  func.func @transform_3(%arg0: i32, %arg1: i32) -> (i32, i32) {
    %c0_i32 = arith.constant 0 : i32
    %c0_i32_0 = arith.constant 0 : i32
    %c0_i32_1 = arith.constant 0 : i32
    return %c0_i32, %c0_i32_0 : i32, i32
  }
  func.func @transform_4(%arg0: i32, %arg1: i32) -> (i32, i32) {
    %c0_i32 = arith.constant 0 : i32
    %c0_i32_0 = arith.constant 0 : i32
    %c0_i32_1 = arith.constant 0 : i32
    return %c0_i32, %c0_i32_0 : i32, i32
  }
  func.func @transform_5(%arg0: i32, %arg1: i32) -> (i32, i32) {
    %c0_i32 = arith.constant 0 : i32
    %c0_i32_0 = arith.constant 0 : i32
    %c0_i32_1 = arith.constant 0 : i32
    return %c0_i32, %c0_i32_0 : i32, i32
  }
  func.func @transform_6(%arg0: i32, %arg1: i32) -> (i32, i32) {
    %c0_i32 = arith.constant 0 : i32
    %c0_i32_0 = arith.constant 0 : i32
    %c0_i32_1 = arith.constant 0 : i32
    return %c0_i32, %c0_i32_0 : i32, i32
  }
  func.func @transform_7(%arg0: i32, %arg1: i32) -> (i32, i32) {
    %c0_i32 = arith.constant 0 : i32
    %c0_i32_0 = arith.constant 0 : i32
    %c0_i32_1 = arith.constant 0 : i32
    return %c0_i32, %c0_i32_0 : i32, i32
  }
  func.func @transform_8(%arg0: i32, %arg1: i32) -> (i32, i32) {
    %c0_i32 = arith.constant 0 : i32
    %c0_i32_0 = arith.constant 0 : i32
    %c0_i32_1 = arith.constant 0 : i32
    return %c0_i32, %c0_i32_0 : i32, i32
  }
  func.func @transform_9(%arg0: i32, %arg1: i32) -> (i32, i32, i32) {
    %c0_i32 = arith.constant 0 : i32
    %c0_i32_0 = arith.constant 0 : i32
    %c0_i32_1 = arith.constant 0 : i32
    return %arg0, %c0_i32, %c0_i32_0 : i32, i32, i32
  }
}

module attributes {stable_mosaic.version = 11 : i64} {
  func.func @kernel(%arg0: i32, %arg1: i32, %arg2: memref<1x1x32xf32, #tpu.memory_space<vmem>>, %arg3: memref<512x2xf32, #tpu.memory_space<vmem>>, %arg4: memref<32x32xbf16, #tpu.memory_space<vmem>>, %arg5: memref<2x32xbf16, #tpu.memory_space<vmem>>, %arg6: memref<1x32xf32, #tpu.memory_space<vmem>>, %arg7: memref<32x32xbf16, #tpu.memory_space<vmem>>, %arg8: memref<1x32xf32, #tpu.memory_space<vmem>>, %arg9: memref<32x3xbf16, #tpu.memory_space<vmem>>, %arg10: memref<1x3xf32, #tpu.memory_space<vmem>>, %arg11: memref<32x32xbf16, #tpu.memory_space<vmem>>, %arg12: memref<3x32xbf16, #tpu.memory_space<vmem>>, %arg13: memref<1x32xf32, #tpu.memory_space<vmem>>, %arg14: memref<32x32xbf16, #tpu.memory_space<vmem>>, %arg15: memref<1x32xf32, #tpu.memory_space<vmem>>, %arg16: memref<32x3xbf16, #tpu.memory_space<vmem>>, %arg17: memref<1x3xf32, #tpu.memory_space<vmem>>, %arg18: memref<1x512x3xf32, #tpu.memory_space<vmem>>) attributes {dimension_semantics = [#tpu.dimension_semantics<parallel>, #tpu.dimension_semantics<parallel>], iteration_bounds = array<i64: 2, 4>, scalar_prefetch = 0 : i64, scratch_operands = 0 : i64, tpu.core_type = #tpu.core_type<tc>, window_params = [{transform_indices = @transform_0, window_bounds = array<i64: 1, 1, 32>}, {transform_indices = @transform_1, window_bounds = array<i64: 512, 2>}, {pipeline_mode = #tpu.pipeline_mode<synchronous>, transform_indices = @transform_2, window_bounds = array<i64: 32, 32>}, {pipeline_mode = #tpu.pipeline_mode<synchronous>, transform_indices = @transform_3, window_bounds = array<i64: 2, 32>}, {pipeline_mode = #tpu.pipeline_mode<synchronous>, transform_indices = @transform_4, window_bounds = array<i64: 1, 32>}, {pipeline_mode = #tpu.pipeline_mode<synchronous>, transform_indices = @transform_5, window_bounds = array<i64: 32, 32>}, {pipeline_mode = #tpu.pipeline_mode<synchronous>, transform_indices = @transform_6, window_bounds = array<i64: 1, 32>}, {pipeline_mode = #tpu.pipeline_mode<synchronous>, transform_indices = @transform_7, window_bounds = array<i64: 32, 3>}, {pipeline_mode = #tpu.pipeline_mode<synchronous>, transform_indices = @transform_8, window_bounds = array<i64: 1, 3>}, {pipeline_mode = #tpu.pipeline_mode<synchronous>, transform_indices = @transform_9, window_bounds = array<i64: 32, 32>}, {pipeline_mode = #tpu.pipeline_mode<synchronous>, transform_indices = @transform_10, window_bounds = array<i64: 3, 32>}, {pipeline_mode = #tpu.pipeline_mode<synchronous>, transform_indices = @transform_11, window_bounds = array<i64: 1, 32>}, {pipeline_mode = #tpu.pipeline_mode<synchronous>, transform_indices = @transform_12, window_bounds = array<i64: 32, 32>}, {pipeline_mode = #tpu.pipeline_mode<synchronous>, transform_indices = @transform_13, window_bounds = array<i64: 1, 32>}, {pipeline_mode = #tpu.pipeline_mode<synchronous>, transform_indices = @transform_14, window_bounds = array<i64: 32, 3>}, {pipeline_mode = #tpu.pipeline_mode<synchronous>, transform_indices = @transform_15, window_bounds = array<i64: 1, 3>}, {transform_indices = @transform_16, window_bounds = array<i64: 1, 512, 3>}]} {
    %c0 = arith.constant 0 : index
    %c0_0 = arith.constant 0 : index
    %c0_1 = arith.constant 0 : index
    %0 = vector.load %arg2[%c0, %c0_0, %c0_1] : memref<1x1x32xf32, #tpu.memory_space<vmem>>, vector<1x1x32xf32>
    %1 = vector.shape_cast %0 : vector<1x1x32xf32> to vector<1x32xf32>
    %c0_2 = arith.constant 0 : index
    %c0_3 = arith.constant 0 : index
    %2 = vector.load %arg3[%c0_2, %c0_3] : memref<512x2xf32, #tpu.memory_space<vmem>>, vector<512x2xf32>
    %c0_4 = arith.constant 0 : index
    %c0_5 = arith.constant 0 : index
    %3 = vector.load %arg5[%c0_4, %c0_5] : memref<2x32xbf16, #tpu.memory_space<vmem>>, vector<2x32xbf16>
    %4 = arith.truncf %2 : vector<512x2xf32> to vector<512x2xbf16>
    %cst = arith.constant dense<0.000000e+00> : vector<512x32xf32>
    %5 = tpu.matmul %4, %3, %cst {dimension_numbers = #tpu.dot_dimension_numbers<[1], [0], [0], [1], [0, 0, 1, 1], [], []>} : vector<512x2xbf16>, vector<2x32xbf16>, vector<512x32xf32> -> vector<512x32xf32>
    %c0_6 = arith.constant 0 : index
    %c0_7 = arith.constant 0 : index
    %6 = vector.load %arg4[%c0_6, %c0_7] : memref<32x32xbf16, #tpu.memory_space<vmem>>, vector<32x32xbf16>
    %7 = arith.truncf %1 : vector<1x32xf32> to vector<1x32xbf16>
    %cst_8 = arith.constant dense<0.000000e+00> : vector<1x32xf32>
    %8 = tpu.matmul %7, %6, %cst_8 {dimension_numbers = #tpu.dot_dimension_numbers<[1], [0], [0], [1], [0, 0, 1, 1], [], []>} : vector<1x32xbf16>, vector<32x32xbf16>, vector<1x32xf32> -> vector<1x32xf32>
    %9 = vector.broadcast %8 : vector<1x32xf32> to vector<512x32xf32>
    %10 = arith.addf %5, %9 : vector<512x32xf32>
    %c0_9 = arith.constant 0 : index
    %c0_10 = arith.constant 0 : index
    %11 = vector.load %arg6[%c0_9, %c0_10] : memref<1x32xf32, #tpu.memory_space<vmem>>, vector<1x32xf32>
    %12 = vector.broadcast %11 : vector<1x32xf32> to vector<512x32xf32>
    %13 = arith.addf %10, %12 : vector<512x32xf32>
    %cst_11 = arith.constant 0.000000e+00 : f32
    %14 = vector.broadcast %cst_11 : f32 to vector<512x32xf32>
    %15 = arith.maximumf %13, %14 : vector<512x32xf32>
    %c0_12 = arith.constant 0 : index
    %c0_13 = arith.constant 0 : index
    %16 = vector.load %arg7[%c0_12, %c0_13] : memref<32x32xbf16, #tpu.memory_space<vmem>>, vector<32x32xbf16>
    %17 = arith.truncf %15 : vector<512x32xf32> to vector<512x32xbf16>
    %cst_14 = arith.constant dense<0.000000e+00> : vector<512x32xf32>
    %18 = tpu.matmul %17, %16, %cst_14 {dimension_numbers = #tpu.dot_dimension_numbers<[1], [0], [0], [1], [0, 0, 1, 1], [], []>} : vector<512x32xbf16>, vector<32x32xbf16>, vector<512x32xf32> -> vector<512x32xf32>
    %c0_15 = arith.constant 0 : index
    %c0_16 = arith.constant 0 : index
    %19 = vector.load %arg8[%c0_15, %c0_16] : memref<1x32xf32, #tpu.memory_space<vmem>>, vector<1x32xf32>
    %20 = vector.broadcast %19 : vector<1x32xf32> to vector<512x32xf32>
    %21 = arith.addf %18, %20 : vector<512x32xf32>
    %cst_17 = arith.constant 0.000000e+00 : f32
    %22 = vector.broadcast %cst_17 : f32 to vector<512x32xf32>
    %23 = arith.maximumf %21, %22 : vector<512x32xf32>
    %c0_18 = arith.constant 0 : index
    %c0_19 = arith.constant 0 : index
    %24 = vector.load %arg9[%c0_18, %c0_19] : memref<32x3xbf16, #tpu.memory_space<vmem>>, vector<32x3xbf16>
    %25 = arith.truncf %23 : vector<512x32xf32> to vector<512x32xbf16>
    %cst_20 = arith.constant dense<0.000000e+00> : vector<512x3xf32>
    %26 = tpu.matmul %25, %24, %cst_20 {dimension_numbers = #tpu.dot_dimension_numbers<[1], [0], [0], [1], [0, 0, 1, 1], [], []>} : vector<512x32xbf16>, vector<32x3xbf16>, vector<512x3xf32> -> vector<512x3xf32>
    %c0_21 = arith.constant 0 : index
    %c0_22 = arith.constant 0 : index
    %27 = vector.load %arg10[%c0_21, %c0_22] : memref<1x3xf32, #tpu.memory_space<vmem>>, vector<1x3xf32>
    %28 = vector.broadcast %27 : vector<1x3xf32> to vector<512x3xf32>
    %29 = arith.addf %26, %28 : vector<512x3xf32>
    %c0_23 = arith.constant 0 : index
    %c0_24 = arith.constant 0 : index
    %30 = vector.load %arg12[%c0_23, %c0_24] : memref<3x32xbf16, #tpu.memory_space<vmem>>, vector<3x32xbf16>
    %31 = arith.truncf %29 : vector<512x3xf32> to vector<512x3xbf16>
    %cst_25 = arith.constant dense<0.000000e+00> : vector<512x32xf32>
    %32 = tpu.matmul %31, %30, %cst_25 {dimension_numbers = #tpu.dot_dimension_numbers<[1], [0], [0], [1], [0, 0, 1, 1], [], []>} : vector<512x3xbf16>, vector<3x32xbf16>, vector<512x32xf32> -> vector<512x32xf32>
    %c0_26 = arith.constant 0 : index
    %c0_27 = arith.constant 0 : index
    %33 = vector.load %arg11[%c0_26, %c0_27] : memref<32x32xbf16, #tpu.memory_space<vmem>>, vector<32x32xbf16>
    %34 = arith.truncf %1 : vector<1x32xf32> to vector<1x32xbf16>
    %cst_28 = arith.constant dense<0.000000e+00> : vector<1x32xf32>
    %35 = tpu.matmul %34, %33, %cst_28 {dimension_numbers = #tpu.dot_dimension_numbers<[1], [0], [0], [1], [0, 0, 1, 1], [], []>} : vector<1x32xbf16>, vector<32x32xbf16>, vector<1x32xf32> -> vector<1x32xf32>
    %36 = vector.broadcast %35 : vector<1x32xf32> to vector<512x32xf32>
    %37 = arith.addf %32, %36 : vector<512x32xf32>
    %c0_29 = arith.constant 0 : index
    %c0_30 = arith.constant 0 : index
    %38 = vector.load %arg13[%c0_29, %c0_30] : memref<1x32xf32, #tpu.memory_space<vmem>>, vector<1x32xf32>
    %39 = vector.broadcast %38 : vector<1x32xf32> to vector<512x32xf32>
    %40 = arith.addf %37, %39 : vector<512x32xf32>
    %cst_31 = arith.constant 0.000000e+00 : f32
    %41 = vector.broadcast %cst_31 : f32 to vector<512x32xf32>
    %42 = arith.maximumf %40, %41 : vector<512x32xf32>
    %c0_32 = arith.constant 0 : index
    %c0_33 = arith.constant 0 : index
    %43 = vector.load %arg14[%c0_32, %c0_33] : memref<32x32xbf16, #tpu.memory_space<vmem>>, vector<32x32xbf16>
    %44 = arith.truncf %42 : vector<512x32xf32> to vector<512x32xbf16>
    %cst_34 = arith.constant dense<0.000000e+00> : vector<512x32xf32>
    %45 = tpu.matmul %44, %43, %cst_34 {dimension_numbers = #tpu.dot_dimension_numbers<[1], [0], [0], [1], [0, 0, 1, 1], [], []>} : vector<512x32xbf16>, vector<32x32xbf16>, vector<512x32xf32> -> vector<512x32xf32>
    %c0_35 = arith.constant 0 : index
    %c0_36 = arith.constant 0 : index
    %46 = vector.load %arg15[%c0_35, %c0_36] : memref<1x32xf32, #tpu.memory_space<vmem>>, vector<1x32xf32>
    %47 = vector.broadcast %46 : vector<1x32xf32> to vector<512x32xf32>
    %48 = arith.addf %45, %47 : vector<512x32xf32>
    %cst_37 = arith.constant 0.000000e+00 : f32
    %49 = vector.broadcast %cst_37 : f32 to vector<512x32xf32>
    %50 = arith.maximumf %48, %49 : vector<512x32xf32>
    %c0_38 = arith.constant 0 : index
    %c0_39 = arith.constant 0 : index
    %51 = vector.load %arg16[%c0_38, %c0_39] : memref<32x3xbf16, #tpu.memory_space<vmem>>, vector<32x3xbf16>
    %52 = arith.truncf %50 : vector<512x32xf32> to vector<512x32xbf16>
    %cst_40 = arith.constant dense<0.000000e+00> : vector<512x3xf32>
    %53 = tpu.matmul %52, %51, %cst_40 {dimension_numbers = #tpu.dot_dimension_numbers<[1], [0], [0], [1], [0, 0, 1, 1], [], []>} : vector<512x32xbf16>, vector<32x3xbf16>, vector<512x3xf32> -> vector<512x3xf32>
    %c0_41 = arith.constant 0 : index
    %c0_42 = arith.constant 0 : index
    %54 = vector.load %arg17[%c0_41, %c0_42] : memref<1x3xf32, #tpu.memory_space<vmem>>, vector<1x3xf32>
    %55 = vector.broadcast %54 : vector<1x3xf32> to vector<512x3xf32>
    %56 = arith.addf %53, %55 : vector<512x3xf32>
    %c0_43 = arith.constant 0 : index
    %c0_44 = arith.constant 0 : index
    %c0_45 = arith.constant 0 : index
    %57 = vector.load %arg18[%c0_43, %c0_44, %c0_45] : memref<1x512x3xf32, #tpu.memory_space<vmem>>, vector<1x512x3xf32>
    %58 = vector.shape_cast %57 : vector<1x512x3xf32> to vector<512x3xf32>
    %59 = vector.shape_cast %56 : vector<512x3xf32> to vector<1x512x3xf32>
    tpu.vector_store %arg18[%c0_43, %c0_44, %c0_45], %59 {strides = array<i32>} : memref<1x512x3xf32, #tpu.memory_space<vmem>>, vector<1x512x3xf32>,
    return
  }
  func.func @transform_0(%arg0: i32, %arg1: i32) -> (i32, i32, i32) {
    %c0_i32 = arith.constant 0 : i32
    %c0_i32_0 = arith.constant 0 : i32
    %c0_i32_1 = arith.constant 0 : i32
    return %arg0, %c0_i32, %c0_i32_0 : i32, i32, i32
  }
  func.func @transform_1(%arg0: i32, %arg1: i32) -> (i32, i32) {
    %c0_i32 = arith.constant 0 : i32
    %c0_i32_0 = arith.constant 0 : i32
    return %arg1, %c0_i32 : i32, i32
  }
  func.func @transform_2(%arg0: i32, %arg1: i32) -> (i32, i32) {
    %c0_i32 = arith.constant 0 : i32
    %c0_i32_0 = arith.constant 0 : i32
    %c0_i32_1 = arith.constant 0 : i32
    return %c0_i32, %c0_i32_0 : i32, i32
  }
  func.func @transform_3(%arg0: i32, %arg1: i32) -> (i32, i32) {
    %c0_i32 = arith.constant 0 : i32
    %c0_i32_0 = arith.constant 0 : i32
    %c0_i32_1 = arith.constant 0 : i32
    return %c0_i32, %c0_i32_0 : i32, i32
  }
  func.func @transform_4(%arg0: i32, %arg1: i32) -> (i32, i32) {
    %c0_i32 = arith.constant 0 : i32
    %c0_i32_0 = arith.constant 0 : i32
    %c0_i32_1 = arith.constant 0 : i32
    return %c0_i32, %c0_i32_0 : i32, i32
  }
  func.func @transform_5(%arg0: i32, %arg1: i32) -> (i32, i32) {
    %c0_i32 = arith.constant 0 : i32
    %c0_i32_0 = arith.constant 0 : i32
    %c0_i32_1 = arith.constant 0 : i32
    return %c0_i32, %c0_i32_0 : i32, i32
  }
  func.func @transform_6(%arg0: i32, %arg1: i32) -> (i32, i32) {
    %c0_i32 = arith.constant 0 : i32
    %c0_i32_0 = arith.constant 0 : i32
    %c0_i32_1 = arith.constant 0 : i32
    return %c0_i32, %c0_i32_0 : i32, i32
  }
  func.func @transform_7(%arg0: i32, %arg1: i32) -> (i32, i32) {
    %c0_i32 = arith.constant 0 : i32
    %c0_i32_0 = arith.constant 0 : i32
    %c0_i32_1 = arith.constant 0 : i32
    return %c0_i32, %c0_i32_0 : i32, i32
  }
  func.func @transform_8(%arg0: i32, %arg1: i32) -> (i32, i32) {
    %c0_i32 = arith.constant 0 : i32
    %c0_i32_0 = arith.constant 0 : i32
    %c0_i32_1 = arith.constant 0 : i32
    return %c0_i32, %c0_i32_0 : i32, i32
  }
  func.func @transform_9(%arg0: i32, %arg1: i32) -> (i32, i32) {
    %c0_i32 = arith.constant 0 : i32
    %c0_i32_0 = arith.constant 0 : i32
    %c0_i32_1 = arith.constant 0 : i32
    return %c0_i32, %c0_i32_0 : i32, i32
  }
  func.func @transform_10(%arg0: i32, %arg1: i32) -> (i32, i32) {
    %c0_i32 = arith.constant 0 : i32
    %c0_i32_0 = arith.constant 0 : i32
    %c0_i32_1 = arith.constant 0 : i32
    return %c0_i32, %c0_i32_0 : i32, i32
  }
  func.func @transform_11(%arg0: i32, %arg1: i32) -> (i32, i32) {
    %c0_i32 = arith.constant 0 : i32
    %c0_i32_0 = arith.constant 0 : i32
    %c0_i32_1 = arith.constant 0 : i32
    return %c0_i32, %c0_i32_0 : i32, i32
  }
  func.func @transform_12(%arg0: i32, %arg1: i32) -> (i32, i32) {
    %c0_i32 = arith.constant 0 : i32
    %c0_i32_0 = arith.constant 0 : i32
    %c0_i32_1 = arith.constant 0 : i32
    return %c0_i32, %c0_i32_0 : i32, i32
  }
  func.func @transform_13(%arg0: i32, %arg1: i32) -> (i32, i32) {
    %c0_i32 = arith.constant 0 : i32
    %c0_i32_0 = arith.constant 0 : i32
    %c0_i32_1 = arith.constant 0 : i32
    return %c0_i32, %c0_i32_0 : i32, i32
  }
  func.func @transform_14(%arg0: i32, %arg1: i32) -> (i32, i32) {
    %c0_i32 = arith.constant 0 : i32
    %c0_i32_0 = arith.constant 0 : i32
    %c0_i32_1 = arith.constant 0 : i32
    return %c0_i32, %c0_i32_0 : i32, i32
  }
  func.func @transform_15(%arg0: i32, %arg1: i32) -> (i32, i32) {
    %c0_i32 = arith.constant 0 : i32
    %c0_i32_0 = arith.constant 0 : i32
    %c0_i32_1 = arith.constant 0 : i32
    return %c0_i32, %c0_i32_0 : i32, i32
  }
  func.func @transform_16(%arg0: i32, %arg1: i32) -> (i32, i32, i32) {
    %c0_i32 = arith.constant 0 : i32
    %c0_i32_0 = arith.constant 0 : i32
    return %arg0, %arg1, %c0_i32 : i32, i32, i32
  }
}

</mosaic_0001>

<bundles_post_ra>
// kernel: _lambda_.5
= control target key start
LH: loop header
LB: loop body
LE: loop exit
PB: predicated region body
PF: predicated region fallthrough
CT: control target
= control target key end

     0   :  { %s777_s9 = smov 0   ;;  %s779_s10 = smov 0   ;;  %s908_s0 = inlined_call_operand.vmem [shape: f32[2,64,3], index: 0, kind: input, shape index: {}, may-alias: {0,1}]   ;;  %s909_s1 = inlined_call_operand.vmem [shape: f32[2,64,3], index: 1, kind: input, shape index: {}, may-alias: {0,1}]   ;;  %s910_s2 = inlined_call_operand.vmem [shape: f32[2,64,64], index: 2, kind: output, shape index: {}]  }
   0x1   :  { %s781_s11 = smov 0  }
   0x2 LB: > { %s24_s12 = sadd.s32 1, %s756_s10  ;;  %p609_p0 = scmp.ge.s32.totalorder %s760_s11, 1  ;;  %s760_s11 = sphi %s781_s11, %s12_s11   ;;  %s756_s10 = sphi %s779_s10, %s914_s10   ;;  %s752_s9 = sphi %s777_s9, %s913_s9  }
   0x3   : > { %p26_p1 = scmp.ge.s32.totalorder %s24_s12, 2  ;;  %p143_p2 = scmp.lt.s32.totalorder %s760_s11, 3 }
   0x5   : > { %s916_s12 = smov (%p26_p1, %s24_s12), 0  ;;  %p144_p3 = pnand %p609_p0, %p143_p2 }
   0x6   : > { %p179_p4 = scmp.lt.s32.totalorder (!%p144_p3), %s752_s9, 1  ;;  %vm219_vm0 = vcmask (!%p144_p3), 23552   ;;  %vm497_vm2 = vcmask (!%p144_p3), 523264  }
   0x7   : > { %147 = sbr.rel (%p144_p3) target bundleno = 300 (0x12c), region = 28  ;;  %vm805_vm1 = vmpackc.low (!%p144_p3), %vm219_vm0, %vm219_vm0 }
   0xe   : > { %s918_s9 = smov (!%p179_p4, %s752_s9), 1 }
   0xf   : > { %s795_s13 = sshll.u32 %s918_s9, 6 }
  0x10   : > { %s801_s16 = scalar_lea.vmem %s909_s1, %s795_s13  ;;  %s817_s19 = scalar_lea.vmem %s908_s0, %s795_s13 }
  0x11   : > { %v211_v1 = vld [vmem:[%s801_s16] sm:$0xff]  ;;  %v212_v2 = vld [vmem:[%s801_s16 + $0x8] sm:$0xff]  ;;  %v213_v3 = vld [vmem:[%s801_s16 + $0x10] sm:$0xff]  ;;  %s201_s22 = scalar_lea.vmem %s910_s2, %s795_s13 }
  0x12   : > { %v681_v4 = vpack.c.bf16 %v212_v2, %v211_v1  ;;  %v405_v5 = vmul.f32 %v211_v1, %v211_v1  ;;  %v406_v6 = vmul.f32 %v212_v2, %v212_v2  ;;  %v214_v7 = vld [vmem:[%s801_s16 + $0x18] sm:$0xff]  ;;  %v407_v8 = vmul.f32 %v213_v3, %v213_v3  ;;  %v215_v10 = vld [vmem:[%s801_s16 + $0x20] sm:$0xff]  ;;  %v216_v18 = vld [vmem:[%s801_s16 + $0x28] sm:$0xff] }
  0x13   : > { %v687_v9 = vpack.c.bf16 %v214_v7, %v213_v3  ;;  %v408_v13 = vmul.f32 %v214_v7, %v214_v7  ;;  %v203_v14 = vld [vmem:[%s817_s19] sm:$0xff]  ;;  %v409_v17 = vmul.f32 %v215_v10, %v215_v10  ;;  %v217_v19 = vld [vmem:[%s801_s16 + $0x30] sm:$0xff]  ;;  %v410_v21 = vmul.f32 %v216_v18, %v216_v18  ;;  %v218_v25 = vld [vmem:[%s801_s16 + $0x38] sm:$0xff] }
  0x14   : > { %683 = vmatprep.subr.msk.bf16.mxu0 %vm805_vm1, %v681_v4  ;;  %705 = vmatprep.subr.msk.bf16.mxu1 %vm805_vm1, %v681_v4  ;;  %v413_v11 = vsel %vm219_vm0, %v405_v5, 0.0  ;;  %v419_v12 = vsel %vm219_vm0, %v407_v8, 0.0  ;;  %v207_v15 = vld [vmem:[%s817_s19 + $0x20] sm:$0xff]  ;;  %v416_v16 = vsel %vm219_vm0, %v406_v6, 0.0  ;;  %v693_v22 = vpack.c.bf16 %v216_v18, %v215_v10  ;;  %v204_v30 = vld [vmem:[%s817_s19 + $0x8] sm:$0xff]  ;;  %v205_v33 = vld [vmem:[%s817_s19 + $0x10] sm:$0xff] }
  0x15   : > { %414 = vadd.xlane.f32.xlu0 %v413_v11  ;;  %686 = vmatpush3.bf16.xpose.msk.msra.mxu0 %vm805_vm1, %v681_v4  ;;  %v422_v20 = vsel %vm219_vm0, %v408_v13, 0.0  ;;  %v425_v23 = vsel %vm219_vm0, %v409_v17, 0.0  ;;  %v411_v24 = vmul.f32 %v217_v19, %v217_v19  ;;  %v428_v26 = vsel %vm219_vm0, %v410_v21, 0.0  ;;  %v206_v37 = vld [vmem:[%s817_s19 + $0x18] sm:$0xff]  ;;  %v208_v42 = vld [vmem:[%s817_s19 + $0x28] sm:$0xff]  ;;  %v209_v45 = vld [vmem:[%s817_s19 + $0x30] sm:$0xff] }
  0x16   : > { %709 = vmatpush3.bf16.xpose.msk.msra.mxu1 %vm805_vm1, %v681_v4  ;;  %689 = vmatprep.subr.msk.bf16.mxu0 %vm805_vm1, %v687_v9  ;;  %v412_v27 = vmul.f32 %v218_v25, %v218_v25  ;;  %v373_v29 = vmul.f32 %v203_v14, %v203_v14  ;;  %v374_v32 = vmul.f32 %v204_v30, %v204_v30  ;;  %v210_v48 = vld [vmem:[%s817_s19 + $0x38] sm:$0xff] }
  0x17   : > { %706 = vmatprep.subr.msk.bf16.mxu1 %vm805_vm1, %v687_v9  ;;  %420 = vadd.xlane.f32.xlu1 %v419_v12  ;;  %v431_v28 = vsel %vm219_vm0, %v411_v24, 0.0  ;;  %v699_v34 = vpack.c.bf16 %v218_v25, %v217_v19  ;;  %v375_v36 = vmul.f32 %v205_v33, %v205_v33  ;;  %v376_v39 = vmul.f32 %v206_v37, %v206_v37 }
  0x18   : > { %669 = vmatprep.mubr.msk.f32.mxu0 %vm219_vm0, %v203_v14  ;;  %675 = vmatprep.mubr.msk.f32.mxu1 %vm219_vm0, %v207_v15  ;;  %v434_v31 = vsel %vm219_vm0, %v412_v27, 0.0  ;;  %v381_v35 = vsel %vm219_vm0, %v373_v29, 0.0  ;;  %v384_v38 = vsel %vm219_vm0, %v374_v32, 0.0  ;;  %v377_v40 = vmul.f32 %v207_v15, %v207_v15 }
  0x19   : > { %417 = vadd.xlane.f32.xlu0 %v416_v16  ;;  %v387_v41 = vsel %vm219_vm0, %v375_v36, 0.0  ;;  %v390_v43 = vsel %vm219_vm0, %v376_v39, 0.0  ;;  %v378_v44 = vmul.f32 %v208_v42, %v208_v42  ;;  %v379_v47 = vmul.f32 %v209_v45, %v209_v45 }
  0x1a   : > { %v393_v46 = vsel %vm219_vm0, %v377_v40, 0.0  ;;  %v380_v50 = vmul.f32 %v210_v48, %v210_v48 }
  0x1b   : > { %423 = vadd.xlane.f32.xlu1 %v422_v20  ;;  %v396_v49 = vsel %vm219_vm0, %v378_v44, 0.0  ;;  %v399_v51 = vsel %vm219_vm0, %v379_v47, 0.0 }
  0x1c   : > { %v402_v52 = vsel %vm219_vm0, %v380_v50, 0.0 }
  0x1d   : > { %692 = vmatpush3.bf16.xpose.msk.msra.mxu0 %vm805_vm1, %v687_v9  ;;  %426 = vadd.xlane.f32.xlu0 %v425_v23 }
  0x1e   : > { %710 = vmatpush3.bf16.xpose.msk.msra.mxu1 %vm805_vm1, %v687_v9  ;;  %695 = vmatprep.subr.msk.bf16.mxu0 %vm805_vm1, %v693_v22  ;;  %v485_v9 = vlaneseq }
  0x1f   : > { %707 = vmatprep.subr.msk.bf16.mxu1 %vm805_vm1, %v693_v22  ;;  %429 = vadd.xlane.f32.xlu1 %v428_v26 }
  0x20   : > { %v486_v12 = vshrl.u32 %v485_v9, 7 }
  0x21   : > { %432 = vadd.xlane.f32.xlu0 %v431_v28 }
  0x22   : > { %v487_v20 = vsub.s32 0, %v486_v12 }
  0x23   : > { %435 = vadd.xlane.f32.xlu1 %v434_v31 }
  0x25   : > { %698 = vmatpush3.bf16.xpose.msk.msra.mxu0 %vm805_vm1, %v693_v22  ;;  %382 = vadd.xlane.f32.xlu0 %v381_v35 }
  0x26   : > { %711 = vmatpush3.bf16.xpose.msk.msra.mxu1 %vm805_vm1, %v693_v22  ;;  %701 = vmatprep.subr.msk.bf16.mxu0 %vm805_vm1, %v699_v34 }
  0x27   : > { %708 = vmatprep.subr.msk.bf16.mxu1 %vm805_vm1, %v699_v34  ;;  %385 = vadd.xlane.f32.xlu1 %v384_v38 }
  0x29   : > { %388 = vadd.xlane.f32.xlu0 %v387_v41 }
  0x2b   : > { %391 = vadd.xlane.f32.xlu1 %v390_v43 }
  0x2d   : > { %704 = vmatpush3.bf16.xpose.msk.msra.mxu0 %vm805_vm1, %v699_v34  ;;  %394 = vadd.xlane.f32.xlu0 %v393_v46 }
  0x2e   : > { %712 = vmatpush3.bf16.xpose.msk.msra.mxu1 %vm805_vm1, %v699_v34 }
  0x2f   : > { %397 = vadd.xlane.f32.xlu1 %v396_v49 }
  0x31   : > { %400 = vadd.xlane.f32.xlu0 %v399_v51 }
  0x33   : > { %403 = vadd.xlane.f32.xlu1 %v402_v52 }
  0x34   : > { %670 = vmatmul.mubr.msk.f32.vlgmr.msra.gmra.mrb[0].mxu0 %vm219_vm0, %v204_v30 }
  0x35   : > { %676 = vmatmul.mubr.msk.f32.vlgmr.msra.gmra.mrb[0].mxu1 %vm219_vm0, %v208_v42  ;;  %672 = vmatprep.mubr.msk.f32.mxu0 %vm219_vm0, %v205_v33 }
  0x36   : > { %678 = vmatprep.mubr.msk.f32.mxu1 %vm219_vm0, %v209_v45 }
  0x38   : > { %673 = vmatmul.mubr.msk.f32.gmra.mrb[2].mxu0 %vm219_vm0, %v206_v37 }
  0x39   : > { %679 = vmatmul.mubr.msk.f32.gmra.mrb[2].mxu1 %vm219_vm0, %v210_v48 }
  0xa2   : > { %v415_v53 = vpop.xlane.xlu0 %414 }
  0xa3   : > { %453 = vxpose.xlu0.b32.start [1/8] (short) (narrow) %v415_v53, 8 }
  0xa4   : > { %v421_v55 = vpop.xlane.xlu1 %420 }
  0xa6   : > { %v418_v54 = vpop.xlane.xlu0 %417 }
  0xa7   : > { %454 = vxpose.xlu0.b32.cont [2/8] (short) (narrow) %v418_v54, 8 }
  0xa8   : > { %v424_v56 = vpop.xlane.xlu1 %423 }
  0xaa   : > { %v427_v57 = vpop.xlane.xlu0 %426 }
  0xab   : > { %455 = vxpose.xlu0.b32.cont [3/8] (short) (narrow) %v421_v55, 8 }
  0xac   : > { %v430_v58 = vpop.xlane.xlu1 %429 }
  0xae   : > { %v433_v59 = vpop.xlane.xlu0 %432 }
  0xaf   : > { %456 = vxpose.xlu0.b32.cont [4/8] (short) (narrow) %v424_v56, 8 }
  0xb0   : > { %v436_v60 = vpop.xlane.xlu1 %435 }
  0xb2   : > { %v383_v4 = vpop.xlane.xlu0 %382 }
  0xb3   : > { %457 = vxpose.xlu0.b32.cont [5/8] (short) (narrow) %v427_v57, 8 }
  0xb4   : > { %v386_v6 = vpop.xlane.xlu1 %385 }
  0xb6   : > { %v389_v7 = vpop.xlane.xlu0 %388 }
  0xb7   : > { %458 = vxpose.xlu0.b32.cont [6/8] (short) (narrow) %v430_v58, 8 }
  0xb8   : > { %v392_v8 = vpop.xlane.xlu1 %391 }
  0xba   : > { %v395_v10 = vpop.xlane.xlu0 %394 }
  0xbb   : > { %459 = vxpose.xlu0.b32.cont [7/8] (short) (narrow) %v433_v59, 8 }
  0xbc   : > { %v398_v11 = vpop.xlane.xlu1 %397 }
  0xbe   : > { %v401_v13 = vpop.xlane.xlu0 %400 }
  0xbf   : > { %460 = vxpose.xlu0.b32.end [8/8] (short) (narrow) %v436_v60, 8 }
  0xc0   : > { %v404_v19 = vpop.xlane.xlu1 %403 }
 0x107   : > { %v671_v61 = vpop.f32.mrb[0].mxu0 }
 0x108   : > { %v677_v62 = vpop.f32.mrb[0].mxu1  ;;  %v334_v63 = vpop.f32.mrb[1].mxu0  ;;  %v438_v14 = vmul.f32 2.0, %v671_v61 }
 0x109   : > { %v354_v0 = vpop.f32.mrb[1].mxu1  ;;  %v437_v16 = vmul.f32 2.0, %v334_v63  ;;  %v442_v21 = vmul.f32 2.0, %v677_v62 }
 0x10a   : > { %v441_v22 = vmul.f32 2.0, %v354_v0  ;;  %v446_v24 = vsub.f32 %v438_v14, %v386_v6 }
 0x10b   : > { %v674_v1 = vpop.f32.mrb[2].mxu0  ;;  %v445_v27 = vsub.f32 %v437_v16, %v383_v4  ;;  %v450_v33 = vsub.f32 %v442_v21, %v398_v11 }
 0x10c   : > { %v680_v2 = vpop.f32.mrb[2].mxu1  ;;  %v344_v3 = vpop.f32.mrb[3].mxu0  ;;  %v440_v17 = vmul.f32 2.0, %v674_v1  ;;  %v449_v31 = vsub.f32 %v441_v22, %v395_v10 }
 0x10d   : > { %v364_v5 = vpop.f32.mrb[3].mxu1  ;;  %v444_v15 = vmul.f32 2.0, %v680_v2  ;;  %v439_v18 = vmul.f32 2.0, %v344_v3 }
 0x10e   : > { %v443_v23 = vmul.f32 2.0, %v364_v5  ;;  %v448_v29 = vsub.f32 %v440_v17, %v392_v8 }
 0x10f   : > { %v452_v25 = vsub.f32 %v444_v15, %v404_v19  ;;  %v447_v28 = vsub.f32 %v439_v18, %v389_v7 }
 0x110   : > { %v451_v32 = vsub.f32 %v443_v23, %v401_v13 }
 0x123   : > { %v469_v26 = vpop.trf.xlu0 }
 0x124   : > { %v488_v30 = vrot.slane %v469_v26, %v487_v20 }
 0x126   : > { %v489_v34 = vsub.f32 %v445_v27, %v488_v30  ;;  %v490_v35 = vsub.f32 %v446_v24, %v488_v30  ;;  %v491_v36 = vsub.f32 %v447_v28, %v488_v30  ;;  %v492_v37 = vsub.f32 %v448_v29, %v488_v30 }
 0x127   : > { %v493_v38 = vsub.f32 %v449_v31, %v488_v30  ;;  %v494_v39 = vsub.f32 %v450_v33, %v488_v30  ;;  %v495_v40 = vsub.f32 %v451_v32, %v488_v30  ;;  %v496_v41 = vsub.f32 %v452_v25, %v488_v30 }
 0x128   : > { %498 = vst.msk [vmem:[%s201_s22] sm:$0xff] %vm497_vm2, %v489_v34  ;;  %499 = vst.msk [vmem:[%s201_s22 + $0x8] sm:$0xff] %vm497_vm2, %v490_v35 }
 0x129   : > { %500 = vst.msk [vmem:[%s201_s22 + $0x10] sm:$0xff] %vm497_vm2, %v491_v36  ;;  %501 = vst.msk [vmem:[%s201_s22 + $0x18] sm:$0xff] %vm497_vm2, %v492_v37 }
 0x12a   : > { %502 = vst.msk [vmem:[%s201_s22 + $0x20] sm:$0xff] %vm497_vm2, %v493_v38  ;;  %503 = vst.msk [vmem:[%s201_s22 + $0x28] sm:$0xff] %vm497_vm2, %v494_v39 }
 0x12b   : > { %504 = vst.msk [vmem:[%s201_s22 + $0x30] sm:$0xff] %vm497_vm2, %v495_v40  ;;  %505 = vst.msk [vmem:[%s201_s22 + $0x38] sm:$0xff] %vm497_vm2, %v496_v41 }
 0x12c PF: > { %s12_s11 = sadd.s32 1, %s760_s11   ;;  %s913_s9 = smov %s756_s10 }
 0x12d   : > { %p9_p5 = scmp.ge.s32.totalorder %s12_s11, 4   ;;  %s914_s10 = smov %s916_s12 }
 0x12f   :  { %11 = sbr.rel (!%p9_p5) target bundleno = 2 (0x2), region = 61 }

// kernel: _lambda_.6
= control target key start
LH: loop header
LB: loop body
LE: loop exit
PB: predicated region body
PF: predicated region fallthrough
CT: control target
= control target key end

     0   :  { %s985_s24 = smov 0   ;;  %s987_s25 = smov 0   ;;  %s1077_s0 = inlined_call_operand.vmem [shape: f32[2,64,12], index: 0, kind: input, shape index: {}]   ;;  %s1078_s1 = inlined_call_operand.vmem [shape: bf16[12,64], index: 1, kind: input, shape index: {}]   ;;  %s1079_s2 = inlined_call_operand.vmem [shape: f32[1,64], index: 2, kind: input, shape index: {}]   ;;  %s1080_s3 = inlined_call_operand.vmem [shape: bf16[64,64], index: 3, kind: input, shape index: {}]   ;;  %s1081_s4 = inlined_call_operand.vmem [shape: f32[1,64], index: 4, kind: input, shape index: {}]   ;;  %s1082_s5 = inlined_call_operand.vmem [shape: bf16[64,64], index: 5, kind: input, shape index: {}]   ;;  %s1083_s6 = inlined_call_operand.vmem [shape: f32[1,64], index: 6, kind: input, shape index: {}]   ;;  %s1084_s7 = inlined_call_operand.vmem [shape: f32[2,64,64], index: 7, kind: output, shape index: {}]  }
   0x1   :  { %s989_s26 = smov 0  }
   0x2 LB: > { %s29_s27 = sadd.s32 1, %s939_s25  ;;  %p791_p0 = scmp.ge.s32.totalorder %s943_s26, 1  ;;  %s943_s26 = sphi %s989_s26, %s17_s26   ;;  %s939_s25 = sphi %s987_s25, %s1086_s25   ;;  %s935_s24 = sphi %s985_s24, %s1085_s24  }
   0x3   : > { %p31_p1 = scmp.ge.s32.totalorder %s29_s27, 2  ;;  %p258_p2 = scmp.lt.s32.totalorder %s943_s26, 3 }
   0x5   : > { %s1088_s27 = smov (%p31_p1, %s29_s27), 0  ;;  %p259_p3 = pnand %p791_p0, %p258_p2 }
   0x6   : > { %v912_v0 = vld [vmem:[%s1078_s1] sm:$0x3f] (!%p259_p3)   ;;  %vm358_vm0 = vcmask (!%p259_p3), 1045504   ;;  %p299_p4 = scmp.lt.s32.totalorder (!%p259_p3), %s935_s24, 1  ;;  %v914_v3 = vld [vmem:[%s1080_s3 + $0x8] sm:$0xff] (!%p259_p3)   ;;  %vm345_vm1 = vcmask (!%p259_p3), 97280  }
   0x7   : > { %262 = sbr.rel (%p259_p3) target bundleno = 693 (0x2b5), region = 48  ;;  %v913_v1 = vld [vmem:[%s1080_s3] sm:$0xff] (!%p259_p3)   ;;  %887 = vmatprep.subr.msk.bf16.mxu0 (!%p259_p3), %vm358_vm0, %v912_v0  ;;  %v360_v2 = vsel (!%p259_p3), %vm358_vm0, %v912_v0, 0  ;;  %v915_v16 = vld [vmem:[%s1080_s3 + $0x10] sm:$0xff] (!%p259_p3)   ;;  %v916_v17 = vld [vmem:[%s1080_s3 + $0x18] sm:$0xff] (!%p259_p3)   ;;  %vm478_vm2 = vcmask (!%p259_p3), 523264  }
   0x8   : > { %846 = vmatpush3.bf16.msra.mxu0 (!%p259_p3), %v360_v2  ;;  %855 = vmatprep.subr.bf16.mxu1 (!%p259_p3), %v913_v1  ;;  %v917_v18 = vld [vmem:[%s1082_s5] sm:$0xff] (!%p259_p3)   ;;  %v918_v19 = vld [vmem:[%s1082_s5 + $0x8] sm:$0xff] (!%p259_p3)   ;;  %v919_v49 = vld [vmem:[%s1082_s5 + $0x10] sm:$0xff] (!%p259_p3)  }
   0x9   : > { %856 = vmatpush3.bf16.msra.mxu1 (!%p259_p3), %v913_v1  ;;  %871 = vmatprep.subr.bf16.mxu0 (!%p259_p3), %v917_v18  ;;  %v796_v20 = vld [vmem:[%s1079_s2] ss:$0 sm:$0xff] (!%p259_p3)  ;;  %v920_v50 = vld [vmem:[%s1082_s5 + $0x18] sm:$0xff] (!%p259_p3)  }
   0xa   : > { %857 = vmatprep.subr.bf16.mxu1 (!%p259_p3), %v914_v3  ;;  %v802_v51 = vld [vmem:[%s1081_s4] ss:$0 sm:$0xff] (!%p259_p3) }
   0xd   : > { %858 = vmatpush3.bf16.msra.mxu1 (!%p259_p3), %v914_v3 }
   0xe   : > { %s1090_s24 = smov (!%p299_p4, %s935_s24), 1  ;;  %859 = vmatprep.subr.bf16.mxu1 %v915_v16 }
   0xf   : > { %s822_s11 = sshll.u32 %s1090_s24, 6 }
  0x10   : > { %s306_s14 = scalar_lea.vmem %s1077_s0, %s822_s11  ;;  %s316_s17 = scalar_lea.vmem %s1084_s7, %s822_s11 }
  0x11   : > { %v319_v4 = vld [vmem:[%s306_s14] sm:$0xff]  ;;  %v320_v5 = vld [vmem:[%s306_s14 + $0x8] sm:$0xff]  ;;  %v321_v6 = vld [vmem:[%s306_s14 + $0x10] sm:$0xff]  ;;  %860 = vmatpush3.bf16.msra.mxu1 %v915_v16 }
  0x12   : > { %v330_v7 = vpack.c.bf16 %v320_v5, %v319_v4  ;;  %v322_v8 = vld [vmem:[%s306_s14 + $0x18] sm:$0xff]  ;;  %v323_v9 = vld [vmem:[%s306_s14 + $0x20] sm:$0xff]  ;;  %v324_v10 = vld [vmem:[%s306_s14 + $0x28] sm:$0xff]  ;;  %861 = vmatprep.subr.bf16.mxu1 %v916_v17 }
  0x13   : > { %v331_v11 = vpack.c.bf16 %v322_v8, %v321_v6  ;;  %v332_v12 = vpack.c.bf16 %v324_v10, %v323_v9  ;;  %v325_v13 = vld [vmem:[%s306_s14 + $0x30] sm:$0xff]  ;;  %v326_v14 = vld [vmem:[%s306_s14 + $0x38] sm:$0xff]  ;;  %v811_v16 = vld [vmem:[%s1083_s6] ss:$0 sm:$0xff] }
  0x14   : > { %847 = vmatprep.mubr.msk.bf16.mxu0 %vm345_vm1, %v330_v7  ;;  %v333_v15 = vpack.c.bf16 %v326_v14, %v325_v13 }
  0x15   : > { %848 = vmatmul.mubr.msk.bf16.vlgmr.msra.gmra.mrb[0].mxu0 %vm345_vm1, %v331_v11  ;;  %862 = vmatpush3.bf16.msra.mxu1 %v916_v17 }
  0x16   : > { %851 = vmatprep.mubr.msk.bf16.mxu0 %vm345_vm1, %v332_v12  ;;  %872 = vmatpush3.bf16.msra.mxu0 %v917_v18 }
  0x17   : > { %873 = vmatprep.subr.bf16.mxu0 %v918_v19 }
  0x1a   : > { %874 = vmatpush3.bf16.msra.mxu0 %v918_v19 }
  0x1b   : > { %875 = vmatprep.subr.bf16.mxu0 %v919_v49 }
  0x1d   : > { %852 = vmatmul.mubr.msk.bf16.gmra.mrb[4].mxu0 %vm345_vm1, %v333_v15 }
  0x1e   : > { %876 = vmatpush3.bf16.msra.mxu0 %v919_v49 }
  0x1f   : > { %877 = vmatprep.subr.bf16.mxu0 %v920_v50 }
  0x22   : > { %878 = vmatpush3.bf16.msra.mxu0 %v920_v50 }
  0xe8   : > { %v849_v21 = vpop.f32.mrb[0].mxu0 }
  0xe9   : > { %v405_v22 = vadd.f32 %v849_v21, %v796_v20  ;;  %v396_v23 = vpop.f32.mrb[1].mxu0 }
  0xea   : > { %v397_v24 = vadd.f32 %v796_v20, %v396_v23  ;;  %v850_v25 = vpop.f32.mrb[2].mxu0 }
  0xeb   : > { %v408_v26 = vadd.f32 %v850_v25, %v796_v20  ;;  %v399_v27 = vpop.f32.mrb[3].mxu0  ;;  %v429_v29 = vmax.f32 %v405_v22, 0.0 }
  0xec   : > { %v400_v28 = vadd.f32 %v796_v20, %v399_v27  ;;  %v427_v31 = vmax.f32 %v397_v24, 0.0 }
  0xed   : > { %v430_v30 = vmax.f32 %v408_v26, 0.0 }
  0xee   : > { %v428_v32 = vmax.f32 %v400_v28, 0.0 }
  0xef   : > { %v445_v33 = vpack.c.bf16 %v430_v30, %v429_v29 }
  0xf0   : > { %v853_v34 = vpop.f32.mrb[4].mxu0  ;;  %v444_v35 = vpack.c.bf16 %v428_v32, %v427_v31 }
  0xf1   : > { %v421_v36 = vadd.f32 %v853_v34, %v796_v20  ;;  %v412_v37 = vpop.f32.mrb[5].mxu0 }
  0xf2   : > { %v413_v38 = vadd.f32 %v796_v20, %v412_v37  ;;  %v854_v39 = vpop.f32.mrb[6].mxu0  ;;  %863 = vmatprep.mubr.msk.bf16.mxu1 %vm478_vm2, %v444_v35 }
  0xf3   : > { %v424_v40 = vadd.f32 %v854_v39, %v796_v20  ;;  %v415_v41 = vpop.f32.mrb[7].mxu0  ;;  %864 = vmatmul.mubr.msk.bf16.vlgmr.msra.gmra.mrb[0].mxu1 %vm478_vm2, %v445_v33  ;;  %v433_v43 = vmax.f32 %v421_v36, 0.0 }
  0xf4   : > { %v416_v42 = vadd.f32 %v796_v20, %v415_v41  ;;  %v431_v45 = vmax.f32 %v413_v38, 0.0 }
  0xf5   : > { %v434_v44 = vmax.f32 %v424_v40, 0.0 }
  0xf6   : > { %v432_v46 = vmax.f32 %v416_v42, 0.0 }
  0xf7   : > { %v447_v47 = vpack.c.bf16 %v434_v44, %v433_v43 }
  0xf8   : > { %v446_v48 = vpack.c.bf16 %v432_v46, %v431_v45 }
  0xfa   : > { %867 = vmatprep.mubr.msk.bf16.mxu1 %vm478_vm2, %v446_v48 }
  0xfb   : > { %868 = vmatmul.mubr.msk.bf16.gmra.mrb[4].mxu1 %vm478_vm2, %v447_v47 }
 0x1c6   : > { %v865_v52 = vpop.f32.mrb[0].mxu1 }
 0x1c7   : > { %v534_v53 = vadd.f32 %v865_v52, %v802_v51  ;;  %v525_v54 = vpop.f32.mrb[1].mxu1 }
 0x1c8   : > { %v526_v55 = vadd.f32 %v802_v51, %v525_v54  ;;  %v866_v56 = vpop.f32.mrb[2].mxu1 }
 0x1c9   : > { %v537_v57 = vadd.f32 %v866_v56, %v802_v51  ;;  %v528_v58 = vpop.f32.mrb[3].mxu1  ;;  %v558_v60 = vmax.f32 %v534_v53, 0.0 }
 0x1ca   : > { %v529_v59 = vadd.f32 %v802_v51, %v528_v58  ;;  %v556_v62 = vmax.f32 %v526_v55, 0.0 }
 0x1cb   : > { %v559_v61 = vmax.f32 %v537_v57, 0.0 }
 0x1cc   : > { %v557_v63 = vmax.f32 %v529_v59, 0.0 }
 0x1cd   : > { %v574_v0 = vpack.c.bf16 %v559_v61, %v558_v60 }
 0x1ce   : > { %v573_v1 = vpack.c.bf16 %v557_v63, %v556_v62  ;;  %v869_v2 = vpop.f32.mrb[4].mxu1 }
 0x1cf   : > { %v550_v3 = vadd.f32 %v869_v2, %v802_v51  ;;  %v541_v4 = vpop.f32.mrb[5].mxu1 }
 0x1d0   : > { %v542_v5 = vadd.f32 %v802_v51, %v541_v4  ;;  %v870_v6 = vpop.f32.mrb[6].mxu1  ;;  %879 = vmatprep.mubr.msk.bf16.mxu0 %vm478_vm2, %v573_v1 }
 0x1d1   : > { %v553_v7 = vadd.f32 %v870_v6, %v802_v51  ;;  %v544_v8 = vpop.f32.mrb[7].mxu1  ;;  %880 = vmatmul.mubr.msk.bf16.vlgmr.msra.gmra.mrb[8].mxu0 %vm478_vm2, %v574_v0  ;;  %v562_v10 = vmax.f32 %v550_v3, 0.0 }
 0x1d2   : > { %v545_v9 = vadd.f32 %v802_v51, %v544_v8  ;;  %v560_v12 = vmax.f32 %v542_v5, 0.0 }
 0x1d3   : > { %v563_v11 = vmax.f32 %v553_v7, 0.0 }
 0x1d4   : > { %v561_v13 = vmax.f32 %v545_v9, 0.0 }
 0x1d5   : > { %v576_v14 = vpack.c.bf16 %v563_v11, %v562_v10 }
 0x1d6   : > { %v575_v15 = vpack.c.bf16 %v561_v13, %v560_v12 }
 0x1d8   : > { %883 = vmatprep.mubr.msk.bf16.mxu0 %vm478_vm2, %v575_v15 }
 0x1d9   : > { %884 = vmatmul.mubr.msk.bf16.gmra.mrb[12].mxu0 %vm478_vm2, %v576_v14 }
 0x2a4   : > { %v881_v17 = vpop.f32.mrb[8].mxu0 }
 0x2a5   : > { %v662_v18 = vadd.f32 %v881_v17, %v811_v16  ;;  %v653_v19 = vpop.f32.mrb[9].mxu0 }
 0x2a6   : > { %v654_v20 = vadd.f32 %v811_v16, %v653_v19  ;;  %v882_v21 = vpop.f32.mrb[10].mxu0 }
 0x2a7   : > { %v686_v22 = vmax.f32 %v662_v18, 0.0  ;;  %v665_v23 = vadd.f32 %v882_v21, %v811_v16  ;;  %v656_v24 = vpop.f32.mrb[11].mxu0 }
 0x2a8   : > { %v684_v25 = vmax.f32 %v654_v20, 0.0  ;;  %v657_v26 = vadd.f32 %v811_v16, %v656_v24 }
 0x2a9   : > { %694 = vst.msk [vmem:[%s316_s17 + $0x10] sm:$0xff] %vm478_vm2, %v686_v22  ;;  %v687_v27 = vmax.f32 %v665_v23, 0.0 }
 0x2aa   : > { %692 = vst.msk [vmem:[%s316_s17] sm:$0xff] %vm478_vm2, %v684_v25  ;;  %v685_v28 = vmax.f32 %v657_v26, 0.0 }
 0x2ab   : > { %695 = vst.msk [vmem:[%s316_s17 + $0x18] sm:$0xff] %vm478_vm2, %v687_v27 }
 0x2ac   : > { %693 = vst.msk [vmem:[%s316_s17 + $0x8] sm:$0xff] %vm478_vm2, %v685_v28  ;;  %v885_v29 = vpop.f32.mrb[12].mxu0 }
 0x2ad   : > { %v678_v30 = vadd.f32 %v885_v29, %v811_v16  ;;  %v669_v31 = vpop.f32.mrb[13].mxu0 }
 0x2ae   : > { %v670_v32 = vadd.f32 %v811_v16, %v669_v31  ;;  %v886_v33 = vpop.f32.mrb[14].mxu0 }
 0x2af   : > { %v690_v34 = vmax.f32 %v678_v30, 0.0  ;;  %v681_v35 = vadd.f32 %v886_v33, %v811_v16  ;;  %v672_v36 = vpop.f32.mrb[15].mxu0 }
 0x2b0   : > { %v688_v37 = vmax.f32 %v670_v32, 0.0  ;;  %v673_v38 = vadd.f32 %v811_v16, %v672_v36 }
 0x2b1   : > { %698 = vst.msk [vmem:[%s316_s17 + $0x30] sm:$0xff] %vm478_vm2, %v690_v34  ;;  %v691_v39 = vmax.f32 %v681_v35, 0.0 }
 0x2b2   : > { %696 = vst.msk [vmem:[%s316_s17 + $0x20] sm:$0xff] %vm478_vm2, %v688_v37  ;;  %v689_v40 = vmax.f32 %v673_v38, 0.0 }
 0x2b3   : > { %699 = vst.msk [vmem:[%s316_s17 + $0x38] sm:$0xff] %vm478_vm2, %v691_v39 }
 0x2b4   : > { %697 = vst.msk [vmem:[%s316_s17 + $0x28] sm:$0xff] %vm478_vm2, %v689_v40 }
 0x2b5 PF: > { %s17_s26 = sadd.s32 1, %s943_s26   ;;  %s1085_s24 = smov %s939_s25 }
 0x2b6   : > { %p14_p5 = scmp.ge.s32.totalorder %s17_s26, 4   ;;  %s1086_s25 = smov %s1088_s27 }
 0x2b8   :  { %16 = sbr.rel (!%p14_p5) target bundleno = 2 (0x2), region = 78 }

// kernel: _lambda_.7
= control target key start
LH: loop header
LB: loop body
LE: loop exit
PB: predicated region body
PF: predicated region fallthrough
CT: control target
= control target key end

     0   :  { %s782_s18 = smov 0   ;;  %s784_s19 = smov 0   ;;  %s860_s0 = inlined_call_operand.vmem [shape: f32[2,64,64], index: 0, kind: input, shape index: {}]   ;;  %s861_s1 = inlined_call_operand.vmem [shape: bf16[64,64], index: 1, kind: input, shape index: {}]   ;;  %s862_s2 = inlined_call_operand.vmem [shape: f32[1,64], index: 2, kind: input, shape index: {}]   ;;  %s863_s3 = inlined_call_operand.vmem [shape: bf16[64,128], index: 3, kind: input, shape index: {}]   ;;  %s864_s4 = inlined_call_operand.vmem [shape: f32[1,128], index: 4, kind: input, shape index: {}]   ;;  %s865_s5 = inlined_call_operand.vmem [shape: f32[2,64,128], index: 5, kind: output, shape index: {}]  }
   0x1   :  { %s786_s20 = smov 0  }
   0x2 LB: > { %s27_s21 = sadd.s32 1, %s746_s19  ;;  %p621_p0 = scmp.ge.s32.totalorder %s750_s20, 1  ;;  %s750_s20 = sphi %s786_s20, %s15_s20   ;;  %s746_s19 = sphi %s784_s19, %s867_s19   ;;  %s742_s18 = sphi %s782_s18, %s866_s18  }
   0x3   : > { %p29_p1 = scmp.ge.s32.totalorder %s27_s21, 2  ;;  %p208_p2 = scmp.lt.s32.totalorder %s750_s20, 3 }
   0x5   : > { %s869_s21 = smov (%p29_p1, %s27_s21), 0  ;;  %p209_p3 = pnand %p621_p0, %p208_p2 }
   0x6   : > { %v720_v0 = vld [vmem:[%s861_s1] sm:$0xff] (!%p209_p3)   ;;  %p245_p4 = scmp.lt.s32.totalorder (!%p209_p3), %s742_s18, 1  ;;  %v721_v1 = vld [vmem:[%s861_s1 + $0x8] sm:$0xff] (!%p209_p3)   ;;  %v722_v2 = vld [vmem:[%s861_s1 + $0x10] sm:$0xff] (!%p209_p3)   ;;  %vm316_vm0 = vcmask (!%p209_p3), 523264  }
   0x7   : > { %212 = sbr.rel (%p209_p3) target bundleno = 471 (0x1d7), region = 40  ;;  %664 = vmatprep.subr.bf16.mxu0 (!%p209_p3), %v720_v0  ;;  %v724_v3 = vld [vmem:[%s863_s3] sm:$0xff] (!%p209_p3)   ;;  %v725_v4 = vld [vmem:[%s863_s3 + $0x8] sm:$0xff] (!%p209_p3)   ;;  %v723_v8 = vld [vmem:[%s861_s1 + $0x18] sm:$0xff] (!%p209_p3)  }
   0x8   : > { %665 = vmatpush3.bf16.msra.mxu0 (!%p209_p3), %v720_v0  ;;  %680 = vmatprep.subr.bf16.mxu1 (!%p209_p3), %v724_v3  ;;  %v726_v18 = vld [vmem:[%s863_s3 + $0x10] sm:$0xff] (!%p209_p3)   ;;  %v727_v19 = vld [vmem:[%s863_s3 + $0x18] sm:$0xff] (!%p209_p3)   ;;  %v626_v21 = vld [vmem:[%s862_s2] ss:$0 sm:$0xff] (!%p209_p3) }
   0x9   : > { %666 = vmatprep.subr.bf16.mxu0 (!%p209_p3), %v721_v1  ;;  %681 = vmatpush3.bf16.msra.mxu1 (!%p209_p3), %v724_v3  ;;  %v635_v41 = vld [vmem:[%s864_s4] ss:$0 sm:$0xff] (!%p209_p3) }
   0xa   : > { %682 = vmatprep.subr.bf16.mxu1 (!%p209_p3), %v725_v4 }
   0xc   : > { %667 = vmatpush3.bf16.msra.mxu0 (!%p209_p3), %v721_v1 }
   0xd   : > { %668 = vmatprep.subr.bf16.mxu0 (!%p209_p3), %v722_v2  ;;  %683 = vmatpush3.bf16.msra.mxu1 (!%p209_p3), %v725_v4 }
   0xe   : > { %s871_s18 = smov (!%p245_p4, %s742_s18), 1  ;;  %684 = vmatprep.subr.bf16.mxu1 %v726_v18 }
   0xf   : > { %s646_s28 = sshll.u32 %s871_s18, 6 }
  0x10   : > { %s252_s8 = scalar_lea.vmem %s860_s0, %s646_s28  ;;  %669 = vmatpush3.bf16.msra.mxu0 %v722_v2  ;;  %s262_s27 = scalar_lea.vmem %s865_s5, %s646_s28 }
  0x11   : > { %v265_v5 = vld [vmem:[%s252_s8] sm:$0xff]  ;;  %v266_v6 = vld [vmem:[%s252_s8 + $0x8] sm:$0xff]  ;;  %v267_v9 = vld [vmem:[%s252_s8 + $0x10] sm:$0xff]  ;;  %670 = vmatprep.subr.bf16.mxu0 %v723_v8  ;;  %685 = vmatpush3.bf16.msra.mxu1 %v726_v18 }
  0x12   : > { %v282_v7 = vpack.c.bf16 %v266_v6, %v265_v5  ;;  %v268_v10 = vld [vmem:[%s252_s8 + $0x18] sm:$0xff]  ;;  %v269_v11 = vld [vmem:[%s252_s8 + $0x20] sm:$0xff]  ;;  %v270_v12 = vld [vmem:[%s252_s8 + $0x28] sm:$0xff]  ;;  %686 = vmatprep.subr.bf16.mxu1 %v727_v19 }
  0x13   : > { %v283_v13 = vpack.c.bf16 %v268_v10, %v267_v9  ;;  %v284_v14 = vpack.c.bf16 %v270_v12, %v269_v11  ;;  %v271_v15 = vld [vmem:[%s252_s8 + $0x30] sm:$0xff]  ;;  %v272_v16 = vld [vmem:[%s252_s8 + $0x38] sm:$0xff] }
  0x14   : > { %672 = vmatprep.mubr.msk.bf16.mxu0 %vm316_vm0, %v282_v7  ;;  %671 = vmatpush3.bf16.msra.mxu0 %v723_v8  ;;  %v285_v17 = vpack.c.bf16 %v272_v16, %v271_v15 }
  0x15   : > { %687 = vmatpush3.bf16.msra.mxu1 %v727_v19 }
  0x17   : > { %673 = vmatmul.mubr.msk.bf16.vlgmr.msra.gmra.mrb[0].mxu0 %vm316_vm0, %v283_v13 }
  0x18   : > { %676 = vmatprep.mubr.msk.bf16.mxu0 %vm316_vm0, %v284_v14 }
  0x1f   : > { %677 = vmatmul.mubr.msk.bf16.gmra.mrb[4].mxu0 %vm316_vm0, %v285_v17 }
  0xea   : > { %v674_v20 = vpop.f32.mrb[0].mxu0 }
  0xeb   : > { %v363_v22 = vpop.f32.mrb[1].mxu0  ;;  %v372_v24 = vadd.f32 %v674_v20, %v626_v21 }
  0xec   : > { %v675_v23 = vpop.f32.mrb[2].mxu0  ;;  %v364_v27 = vadd.f32 %v626_v21, %v363_v22 }
  0xed   : > { %v375_v25 = vadd.f32 %v675_v23, %v626_v21  ;;  %v366_v26 = vpop.f32.mrb[3].mxu0 }
  0xee   : > { %v367_v28 = vadd.f32 %v626_v21, %v366_v26 }
  0xef   : > { %v404_v29 = vpack.c.bf16 %v375_v25, %v372_v24 }
  0xf0   : > { %v403_v30 = vpack.c.bf16 %v367_v28, %v364_v27 }
  0xf2   : > { %v678_v31 = vpop.f32.mrb[4].mxu0  ;;  %688 = vmatprep.mubr.msk.bf16.mxu1 %vm316_vm0, %v403_v30 }
  0xf3   : > { %v379_v32 = vpop.f32.mrb[5].mxu0  ;;  %689 = vmatmul.mubr.msk.bf16.vlgmr.msra.gmra.mrb[0].mxu1 %vm316_vm0, %v404_v29  ;;  %v388_v34 = vadd.f32 %v678_v31, %v626_v21 }
  0xf4   : > { %v679_v33 = vpop.f32.mrb[6].mxu0  ;;  %v380_v37 = vadd.f32 %v626_v21, %v379_v32 }
  0xf5   : > { %v391_v35 = vadd.f32 %v679_v33, %v626_v21  ;;  %v382_v36 = vpop.f32.mrb[7].mxu0 }
  0xf6   : > { %v383_v38 = vadd.f32 %v626_v21, %v382_v36 }
  0xf7   : > { %v406_v39 = vpack.c.bf16 %v391_v35, %v388_v34 }
  0xf8   : > { %v405_v40 = vpack.c.bf16 %v383_v38, %v380_v37 }
  0xfa   : > { %692 = vmatprep.mubr.msk.bf16.mxu1 %vm316_vm0, %v405_v40 }
  0xfb   : > { %693 = vmatmul.mubr.msk.bf16.gmra.mrb[4].mxu1 %vm316_vm0, %v406_v39 }
 0x1c6   : > { %v690_v42 = vpop.f32.mrb[0].mxu1 }
 0x1c7   : > { %v492_v43 = vadd.f32 %v690_v42, %v635_v41  ;;  %v483_v44 = vpop.f32.mrb[1].mxu1 }
 0x1c8   : > { %v484_v45 = vadd.f32 %v635_v41, %v483_v44  ;;  %v691_v46 = vpop.f32.mrb[2].mxu1 }
 0x1c9   : > { %v516_v47 = vmax.f32 %v492_v43, 0.0  ;;  %v495_v48 = vadd.f32 %v691_v46, %v635_v41  ;;  %v486_v49 = vpop.f32.mrb[3].mxu1 }
 0x1ca   : > { %v514_v50 = vmax.f32 %v484_v45, 0.0  ;;  %v487_v51 = vadd.f32 %v635_v41, %v486_v49 }
 0x1cb   : > { %524 = vst [vmem:[%s262_s27 + $0x10] sm:$0xff] %v516_v47  ;;  %v517_v52 = vmax.f32 %v495_v48, 0.0 }
 0x1cc   : > { %522 = vst [vmem:[%s262_s27] sm:$0xff] %v514_v50  ;;  %v515_v53 = vmax.f32 %v487_v51, 0.0 }
 0x1cd   : > { %525 = vst [vmem:[%s262_s27 + $0x18] sm:$0xff] %v517_v52 }
 0x1ce   : > { %523 = vst [vmem:[%s262_s27 + $0x8] sm:$0xff] %v515_v53  ;;  %v694_v54 = vpop.f32.mrb[4].mxu1 }
 0x1cf   : > { %v508_v55 = vadd.f32 %v694_v54, %v635_v41  ;;  %v499_v56 = vpop.f32.mrb[5].mxu1 }
 0x1d0   : > { %v500_v57 = vadd.f32 %v635_v41, %v499_v56  ;;  %v695_v58 = vpop.f32.mrb[6].mxu1 }
 0x1d1   : > { %v520_v59 = vmax.f32 %v508_v55, 0.0  ;;  %v511_v60 = vadd.f32 %v695_v58, %v635_v41  ;;  %v502_v61 = vpop.f32.mrb[7].mxu1 }
 0x1d2   : > { %v518_v62 = vmax.f32 %v500_v57, 0.0  ;;  %v503_v63 = vadd.f32 %v635_v41, %v502_v61 }
 0x1d3   : > { %528 = vst [vmem:[%s262_s27 + $0x30] sm:$0xff] %v520_v59  ;;  %v521_v0 = vmax.f32 %v511_v60, 0.0 }
 0x1d4   : > { %526 = vst [vmem:[%s262_s27 + $0x20] sm:$0xff] %v518_v62  ;;  %v519_v1 = vmax.f32 %v503_v63, 0.0 }
 0x1d5   : > { %529 = vst [vmem:[%s262_s27 + $0x38] sm:$0xff] %v521_v0 }
 0x1d6   : > { %527 = vst [vmem:[%s262_s27 + $0x28] sm:$0xff] %v519_v1 }
 0x1d7 PF: > { %s15_s20 = sadd.s32 1, %s750_s20   ;;  %s866_s18 = smov %s746_s19 }
 0x1d8   : > { %p12_p5 = scmp.ge.s32.totalorder %s15_s20, 4   ;;  %s867_s19 = smov %s869_s21 }
 0x1da   :  { %14 = sbr.rel (!%p12_p5) target bundleno = 2 (0x2), region = 70 }

// kernel: _lambda_.8
= control target key start
LH: loop header
LB: loop body
LE: loop exit
PB: predicated region body
PF: predicated region fallthrough
CT: control target
= control target key end

     0   :  { %s2715_s30 = smov 0   ;;  %s2717_s10 = smov 0   ;;  %s3388_s0 = inlined_call_operand.vmem [shape: f32[2,64,128], index: 0, kind: input, shape index: {}]   ;;  %s3389_s1 = inlined_call_operand.vmem [shape: bf16[128,128], index: 1, kind: input, shape index: {}]   ;;  %s3390_s2 = inlined_call_operand.vmem [shape: f32[1,128], index: 2, kind: input, shape index: {}]   ;;  %s3391_s3 = inlined_call_operand.vmem [shape: bf16[128,1024], index: 3, kind: input, shape index: {}]   ;;  %s3392_s4 = inlined_call_operand.vmem [shape: f32[1,1024], index: 4, kind: input, shape index: {}]   ;;  %s3393_s5 = inlined_call_operand.vmem [shape: bf16[1024,32], index: 5, kind: input, shape index: {}]   ;;  %s3394_s6 = inlined_call_operand.vmem [shape: f32[1,32], index: 6, kind: input, shape index: {}]   ;;  %s3395_s7 = inlined_call_operand.vmem [shape: bf16[32,32], index: 7, kind: input, shape index: {}]   ;;  %s3396_s8 = inlined_call_operand.vmem [shape: f32[1,32], index: 8, kind: input, shape index: {}]   ;;  %s3397_s9 = inlined_call_operand.vmem [shape: f32[2,1,32], index: 9, kind: output, shape index: {}]  }
   0x1   :  { %s2719_s11 = smov 0  }
   0x2 LB: > { %s31_s12 = sadd.s32 1, %s2655_s10  ;;  %p2254_p0 = scmp.ge.s32.totalorder %s2659_s11, 1  ;;  %s2659_s11 = sphi %s2719_s11, %s19_s11   ;;  %s2655_s10 = sphi %s2717_s10, %s3399_s10   ;;  %s2651_s30 = sphi %s2715_s30, %s3398_s30  }
   0x3   : > { %p33_p1 = scmp.ge.s32.totalorder %s31_s12, 2  ;;  %p306_p2 = scmp.lt.s32.totalorder %s2659_s11, 3 }
   0x5   : > { %s3401_s12 = smov (%p33_p1, %s31_s12), 0  ;;  %p307_p3 = pnand %p2254_p0, %p306_p2 }
   0x6   : > { %v2563_v0 = vld [vmem:[%s3389_s1] sm:$0xff] (!%p307_p3)   ;;  %p345_p4 = scmp.lt.s32.totalorder (!%p307_p3), %s2651_s30, 1  ;;  %v2564_v1 = vld [vmem:[%s3389_s1 + $0x8] sm:$0xff] (!%p307_p3)   ;;  %v2565_v2 = vld [vmem:[%s3389_s1 + $0x10] sm:$0xff] (!%p307_p3)   ;;  %vm2664_vm0 = vmmov (!%p307_p3), 0   ;;  %vm2143_vm1 = vcmask (!%p307_p3), 261120  }
   0x7   : > { %310 = sbr.rel (%p307_p3) target bundleno = 1030 (0x406), region = 56  ;;  %2503 = vmatprep.subr.bf16.mxu0 (!%p307_p3), %v2563_v0  ;;  %v2566_v3 = vld [vmem:[%s3389_s1 + $0x18] sm:$0xff] (!%p307_p3)   ;;  %v511_v7 = vld [vmem:[%s3391_s3] sm:$0xff] (!%p307_p3)  ;;  %v2568_v18 = vld [vmem:[%s3389_s1 + $0x28] sm:$0xff] (!%p307_p3)   ;;  %vm2187_vm2 = vcmask (!%p307_p3), 253952  }
   0x8   : > { %2504 = vmatpush3.bf16.msra.mxu0 (!%p307_p3), %v2563_v0  ;;  %v515_v8 = vld [vmem:[%s3391_s3 + $0x20] sm:$0xff] (!%p307_p3)  ;;  %v2569_v22 = vld [vmem:[%s3389_s1 + $0x30] sm:$0xff] (!%p307_p3)   ;;  %v2570_v27 = vld [vmem:[%s3389_s1 + $0x38] sm:$0xff] (!%p307_p3)  }
   0x9   : > { %2505 = vmatprep.subr.bf16.mxu0 (!%p307_p3), %v2564_v1  ;;  %v2567_v9 = vld [vmem:[%s3389_s1 + $0x20] sm:$0xff] (!%p307_p3)   ;;  %v2267_v10 = vcombine.high (!%p307_p3), %v511_v7, %v515_v8  ;;  %v2266_v11 = vcombine.low (!%p307_p3), %v511_v7, %v515_v8  ;;  %v512_v28 = vld [vmem:[%s3391_s3 + $0x8] sm:$0xff] (!%p307_p3) }
   0xa   : > { %v519_v12 = vld [vmem:[%s3391_s3 + $0x40] sm:$0xff] (!%p307_p3)  ;;  %v516_v29 = vld [vmem:[%s3391_s3 + $0x28] sm:$0xff] (!%p307_p3) }
   0xb   : > { %v523_v13 = vld [vmem:[%s3391_s3 + $0x60] sm:$0xff] (!%p307_p3)  ;;  %941 = vmatprep.subr.bf16.mxu1 (!%p307_p3), %v2267_v10  ;;  %v520_v38 = vld [vmem:[%s3391_s3 + $0x48] sm:$0xff] (!%p307_p3)  ;;  %v2269_v41 = vcombine.high (!%p307_p3), %v512_v28, %v516_v29  ;;  %v2268_v47 = vcombine.low (!%p307_p3), %v512_v28, %v516_v29 }
   0xc   : > { %2506 = vmatpush3.bf16.msra.mxu0 (!%p307_p3), %v2564_v1  ;;  %v2275_v14 = vcombine.high (!%p307_p3), %v519_v12, %v523_v13  ;;  %v527_v15 = vld [vmem:[%s3391_s3 + $0x80] sm:$0xff] (!%p307_p3)  ;;  %942 = vmatpush1.bf16.msra.mxu1 (!%p307_p3), %v2266_v11  ;;  %v2274_v17 = vcombine.low (!%p307_p3), %v519_v12, %v523_v13  ;;  %v524_v39 = vld [vmem:[%s3391_s3 + $0x68] sm:$0xff] (!%p307_p3) }
   0xd   : > { %2507 = vmatprep.subr.bf16.mxu0 (!%p307_p3), %v2565_v2  ;;  %v531_v16 = vld [vmem:[%s3391_s3 + $0xa0] sm:$0xff] (!%p307_p3)  ;;  %v528_v48 = vld [vmem:[%s3391_s3 + $0x88] sm:$0xff] (!%p307_p3)  ;;  %v2277_v50 = vcombine.high (!%p307_p3), %v520_v38, %v524_v39  ;;  %v2276_v55 = vcombine.low (!%p307_p3), %v520_v38, %v524_v39  ;;  %v522_v38 = vld [vmem:[%s3391_s3 + $0x58] sm:$0xff] (!%p307_p3) }
   0xe   : > { %s3403_s30 = smov (!%p345_p4, %s2651_s30), 1  ;;  %943 = vmatprep.subr.bf16.mxu1 %v2275_v14  ;;  %v2283_v19 = vcombine.high %v527_v15, %v531_v16  ;;  %v535_v20 = vld [vmem:[%s3391_s3 + $0xc0] sm:$0xff]  ;;  %v2282_v23 = vcombine.low %v527_v15, %v531_v16  ;;  %v532_v49 = vld [vmem:[%s3391_s3 + $0xa8] sm:$0xff]  ;;  %v526_v39 = vld [vmem:[%s3391_s3 + $0x78] sm:$0xff] }
   0xf   : > { %s2399_s19 = sshll.u32 %s3403_s30, 6  ;;  %v539_v21 = vld [vmem:[%s3391_s3 + $0xe0] sm:$0xff]  ;;  %v536_v56 = vld [vmem:[%s3391_s3 + $0xc8] sm:$0xff]  ;;  %v2285_v58 = vcombine.high %v528_v48, %v532_v49  ;;  %v2284_v60 = vcombine.low %v528_v48, %v532_v49  ;;  %v530_v48 = vld [vmem:[%s3391_s3 + $0x98] sm:$0xff]  ;;  %s356_s16 = scalar_lea.vmem %s3397_s9, %s3403_s30 }
  0x10   : > { %s2748_s22 = scalar_lea.vmem %s3388_s0, %s2399_s19  ;;  %2508 = vmatpush3.bf16.msra.mxu0 %v2565_v2  ;;  %944 = vmatpush1.bf16.msra.mxu1 %v2274_v17  ;;  %v543_v24 = vld [vmem:[%s3391_s3 + $0x100] sm:$0xff]  ;;  %v2291_v26 = vcombine.high %v535_v20, %v539_v21  ;;  %v2290_v30 = vcombine.low %v535_v20, %v539_v21  ;;  %v540_v57 = vld [vmem:[%s3391_s3 + $0xe8] sm:$0xff]  ;;  %v513_v20 = vld [vmem:[%s3391_s3 + $0x10] sm:$0xff] }
  0x11   : > { %v363_v4 = vld [vmem:[%s2748_s22] sm:$0xff]  ;;  %v364_v5 = vld [vmem:[%s2748_s22 + $0x8] sm:$0xff]  ;;  %2509 = vmatprep.subr.bf16.mxu0 %v2566_v3  ;;  %945 = vmatprep.subr.bf16.mxu1 %v2283_v19  ;;  %v365_v34 = vld [vmem:[%s2748_s22 + $0x10] sm:$0xff]  ;;  %v2293_v63 = vcombine.high %v536_v56, %v540_v57  ;;  %v2292_v0 = vcombine.low %v536_v56, %v540_v57 }
  0x12   : > { %v387_v6 = vpack.c.bf16 %v364_v5, %v363_v4  ;;  %v547_v25 = vld [vmem:[%s3391_s3 + $0x120] sm:$0xff]  ;;  %v366_v35 = vld [vmem:[%s2748_s22 + $0x18] sm:$0xff]  ;;  %v368_v37 = vld [vmem:[%s2748_s22 + $0x28] sm:$0xff] }
  0x13   : > { %v551_v31 = vld [vmem:[%s3391_s3 + $0x140] sm:$0xff]  ;;  %v2299_v33 = vcombine.high %v543_v24, %v547_v25  ;;  %v2298_v40 = vcombine.low %v543_v24, %v547_v25  ;;  %v388_v45 = vpack.c.bf16 %v366_v35, %v365_v34  ;;  %v369_v52 = vld [vmem:[%s2748_s22 + $0x30] sm:$0xff]  ;;  %v370_v53 = vld [vmem:[%s2748_s22 + $0x38] sm:$0xff] }
  0x14   : > { %2519 = vmatprep.mubr.bf16.mxu0 %v387_v6  ;;  %2510 = vmatpush3.bf16.msra.mxu0 %v2566_v3  ;;  %v555_v32 = vld [vmem:[%s3391_s3 + $0x160] sm:$0xff]  ;;  %v390_v59 = vpack.c.bf16 %v370_v53, %v369_v52  ;;  %v544_v61 = vld [vmem:[%s3391_s3 + $0x108] sm:$0xff]  ;;  %v517_v21 = vld [vmem:[%s3391_s3 + $0x30] sm:$0xff]  ;;  %v2280_v52 = vcombine.low %v522_v38, %v526_v39 }
  0x15   : > { %2511 = vmatprep.subr.bf16.mxu0 %v2567_v9  ;;  %946 = vmatpush1.bf16.msra.mxu1 %v2282_v23  ;;  %v367_v36 = vld [vmem:[%s2748_s22 + $0x20] sm:$0xff]  ;;  %v2307_v42 = vcombine.high %v551_v31, %v555_v32  ;;  %v2306_v51 = vcombine.low %v551_v31, %v555_v32  ;;  %v548_v62 = vld [vmem:[%s3391_s3 + $0x128] sm:$0xff]  ;;  %v2270_v23 = vcombine.low %v513_v20, %v517_v21  ;;  %v518_v25 = vld [vmem:[%s3391_s3 + $0x38] sm:$0xff] }
  0x16   : > { %947 = vmatprep.subr.bf16.mxu1 %v2291_v26  ;;  %v559_v43 = vld [vmem:[%s3391_s3 + $0x180] sm:$0xff]  ;;  %v389_v46 = vpack.c.bf16 %v368_v37, %v367_v36  ;;  %v552_v1 = vld [vmem:[%s3391_s3 + $0x148] sm:$0xff]  ;;  %v2301_v3 = vcombine.high %v544_v61, %v548_v62  ;;  %v2300_v4 = vcombine.low %v544_v61, %v548_v62  ;;  %v2271_v24 = vcombine.high %v513_v20, %v517_v21  ;;  %v525_v37 = vld [vmem:[%s3391_s3 + $0x70] sm:$0xff] }
  0x17   : > { %v563_v44 = vld [vmem:[%s3391_s3 + $0x1a0] sm:$0xff]  ;;  %v556_v2 = vld [vmem:[%s3391_s3 + $0x168] sm:$0xff]  ;;  %v2661_v26 = vmov 0   ;;  %v534_v49 = vld [vmem:[%s3391_s3 + $0xb8] sm:$0xff] }
  0x18   : > { %2512 = vmatpush3.bf16.msra.mxu0 %v2567_v9  ;;  %v2315_v54 = vcombine.high %v559_v43, %v563_v44  ;;  %v560_v5 = vld [vmem:[%s3391_s3 + $0x188] sm:$0xff]  ;;  %v2309_v7 = vcombine.high %v552_v1, %v556_v2  ;;  %v2308_v8 = vcombine.low %v552_v1, %v556_v2  ;;  %v2314_v11 = vcombine.low %v559_v43, %v563_v44  ;;  %v567_v12 = vld [vmem:[%s3391_s3 + $0x1c0] sm:$0xff]  ;;  %v541_v62 = vld [vmem:[%s3391_s3 + $0xf0] sm:$0xff] }
  0x19   : > { %2513 = vmatprep.subr.bf16.mxu0 %v2568_v18  ;;  %948 = vmatpush1.bf16.msra.mxu1 %v2290_v30  ;;  %v564_v6 = vld [vmem:[%s3391_s3 + $0x1a8] sm:$0xff]  ;;  %v571_v13 = vld [vmem:[%s3391_s3 + $0x1e0] sm:$0xff] }
  0x1a   : > { %949 = vmatprep.subr.bf16.mxu1 %v2299_v33  ;;  %v2317_v9 = vcombine.high %v560_v5, %v564_v6  ;;  %v2316_v10 = vcombine.low %v560_v5, %v564_v6  ;;  %v568_v14 = vld [vmem:[%s3391_s3 + $0x1c8] sm:$0xff]  ;;  %v2323_v15 = vcombine.high %v567_v12, %v571_v13  ;;  %v2322_v19 = vcombine.low %v567_v12, %v571_v13  ;;  %v2257_v30 = vld [vmem:[%s3390_s2] ss:$0 sm:$0xff]  ;;  %v521_v33 = vld [vmem:[%s3391_s3 + $0x50] sm:$0xff] }
  0x1b   : > { %v572_v16 = vld [vmem:[%s3391_s3 + $0x1e8] sm:$0xff]  ;;  %973 = vmatprep.mubr.bf16.mxu1 %v2661_v26  ;;  %v2279_v44 = vcombine.high %v521_v33, %v525_v37 }
  0x1c   : > { %2514 = vmatpush3.bf16.msra.mxu0 %v2568_v18  ;;  %v2324_v17 = vcombine.low %v568_v14, %v572_v16  ;;  %v2325_v18 = vcombine.high %v568_v14, %v572_v16  ;;  %v553_v16 = vld [vmem:[%s3391_s3 + $0x150] sm:$0xff] }
  0x1d   : > { %2515 = vmatprep.subr.bf16.mxu0 %v2569_v22  ;;  %950 = vmatpush1.bf16.msra.mxu1 %v2298_v40 }
  0x1e   : > { %951 = vmatprep.subr.bf16.mxu1 %v2307_v42 }
  0x20   : > { %2516 = vmatpush3.bf16.msra.mxu0 %v2569_v22  ;;  %v514_v22 = vld [vmem:[%s3391_s3 + $0x18] sm:$0xff] }
  0x21   : > { %2517 = vmatprep.subr.bf16.mxu0 %v2570_v27  ;;  %952 = vmatpush1.bf16.msra.mxu1 %v2306_v51  ;;  %v2273_v28 = vcombine.high %v514_v22, %v518_v25  ;;  %v2278_v51 = vcombine.low %v521_v33, %v525_v37  ;;  %v569_v33 = vld [vmem:[%s3391_s3 + $0x1d0] sm:$0xff] }
  0x22   : > { %953 = vmatprep.subr.bf16.mxu1 %v2315_v54 }
  0x24   : > { %2518 = vmatpush3.bf16.msra.mxu0 %v2570_v27  ;;  %v2272_v27 = vcombine.low %v514_v22, %v518_v25  ;;  %v565_v25 = vld [vmem:[%s3391_s3 + $0x1b0] sm:$0xff] }
  0x25   : > { %1014 = vmatprep.subr.bf16.mxu0 %v2269_v41  ;;  %954 = vmatpush1.bf16.msra.mxu1 %v2314_v11  ;;  %v550_v11 = vld [vmem:[%s3391_s3 + $0x138] sm:$0xff] }
  0x26   : > { %955 = vmatprep.subr.bf16.mxu1 %v2323_v15 }
  0x27   : > { %2520 = vmatmul.mubr.bf16.vlgmr.msra.gmra.mrb[0].mxu0 %v388_v45  ;;  %v2281_v45 = vcombine.high %v522_v38, %v526_v39 }
  0x28   : > { %2523 = vmatprep.mubr.bf16.mxu0 %v389_v46  ;;  %1015 = vmatpush1.bf16.msra.mxu0 %v2268_v47  ;;  %v529_v46 = vld [vmem:[%s3391_s3 + $0x90] sm:$0xff] }
  0x29   : > { %1016 = vmatprep.subr.bf16.mxu0 %v2277_v50  ;;  %956 = vmatpush1.bf16.msra.mxu1 %v2322_v19  ;;  %v533_v47 = vld [vmem:[%s3391_s3 + $0xb0] sm:$0xff]  ;;  %v558_v19 = vld [vmem:[%s3391_s3 + $0x178] sm:$0xff] }
  0x2a   : > { %1087 = vmatprep.subr.bf16.mxu1 %v2271_v24  ;;  %v2287_v57 = vcombine.high %v529_v46, %v533_v47  ;;  %v561_v24 = vld [vmem:[%s3391_s3 + $0x190] sm:$0xff] }
  0x2b   : > { %v2318_v37 = vcombine.low %v561_v24, %v565_v25 }
  0x2c   : > { %1017 = vmatpush1.bf16.msra.mxu0 %v2276_v55 }
  0x2d   : > { %1018 = vmatprep.subr.bf16.mxu0 %v2285_v58  ;;  %v2289_v58 = vcombine.high %v530_v48, %v534_v49 }
  0x2f   : > { %2524 = vmatmul.mubr.bf16.gmra.mrb[4].mxu0 %v390_v59  ;;  %v537_v59 = vld [vmem:[%s3391_s3 + $0xd0] sm:$0xff] }
  0x30   : > { %1019 = vmatpush1.bf16.msra.mxu0 %v2284_v60  ;;  %1046 = vmatprep.mubr.bf16.mxu0 %v2661_v26  ;;  %v2295_v6 = vcombine.high %v537_v59, %v541_v62  ;;  %v2294_v12 = vcombine.low %v537_v59, %v541_v62  ;;  %v2588_v59 = vld [vmem:[%s3393_s5 + $0xe0] sm:$0xff]   ;;  %v2591_v62 = vld [vmem:[%s3393_s5 + $0x68] sm:$0xff]  }
  0x31   : > { %1020 = vmatprep.subr.bf16.mxu0 %v2293_v63  ;;  %v538_v63 = vld [vmem:[%s3391_s3 + $0xd8] sm:$0xff] }
  0x34   : > { %1021 = vmatpush1.bf16.msra.mxu0 %v2292_v0  ;;  %v542_v0 = vld [vmem:[%s3391_s3 + $0xf8] sm:$0xff] }
  0x35   : > { %1022 = vmatprep.subr.bf16.mxu0 %v2301_v3  ;;  %v2286_v3 = vcombine.low %v529_v46, %v533_v47  ;;  %v2296_v13 = vcombine.low %v538_v63, %v542_v0  ;;  %v2575_v46 = vld [vmem:[%s3393_s5 + $0x48] sm:$0xff]  }
  0x36   : > { %v2576_v47 = vld [vmem:[%s3393_s5 + $0xc8] sm:$0xff]  }
  0x38   : > { %1023 = vmatpush1.bf16.msra.mxu0 %v2300_v4  ;;  %v2288_v4 = vcombine.low %v530_v48, %v534_v49  ;;  %v2577_v48 = vld [vmem:[%s3393_s5 + $0x8] sm:$0xff]  }
  0x39   : > { %1024 = vmatprep.subr.bf16.mxu0 %v2309_v7  ;;  %v2297_v7 = vcombine.high %v538_v63, %v542_v0  ;;  %v2578_v49 = vld [vmem:[%s3393_s5 + $0x88] sm:$0xff]  }
  0x3a   : > { %v2592_v63 = vld [vmem:[%s3393_s5 + $0xe8] sm:$0xff]  }
  0x3b   : > { %v2593_v0 = vld [vmem:[%s3393_s5 + $0x28] sm:$0xff]  }
  0x3c   : > { %1025 = vmatpush1.bf16.msra.mxu0 %v2308_v8  ;;  %v545_v8 = vld [vmem:[%s3391_s3 + $0x110] sm:$0xff] }
  0x3d   : > { %1026 = vmatprep.subr.bf16.mxu0 %v2317_v9  ;;  %v549_v9 = vld [vmem:[%s3391_s3 + $0x130] sm:$0xff] }
  0x3e   : > { %v2303_v14 = vcombine.high %v545_v8, %v549_v9  ;;  %v2302_v20 = vcombine.low %v545_v8, %v549_v9  ;;  %v2601_v8 = vld [vmem:[%s3393_s5 + $0x38] sm:$0xff]  }
  0x3f   : > { %v2602_v9 = vld [vmem:[%s3393_s5 + $0xb8] sm:$0xff]  }
  0x40   : > { %1027 = vmatpush1.bf16.msra.mxu0 %v2316_v10  ;;  %v546_v10 = vld [vmem:[%s3391_s3 + $0x118] sm:$0xff] }
  0x41   : > { %1028 = vmatprep.subr.bf16.mxu0 %v2325_v18  ;;  %v2305_v15 = vcombine.high %v546_v10, %v550_v11  ;;  %v554_v18 = vld [vmem:[%s3391_s3 + $0x158] sm:$0xff]  ;;  %v2304_v21 = vcombine.low %v546_v10, %v550_v11  ;;  %v2603_v10 = vld [vmem:[%s3393_s5 + $0x140] sm:$0xff]  }
  0x42   : > { %v2604_v11 = vld [vmem:[%s3393_s5 + $0x1c0] sm:$0xff]  }
  0x44   : > { %1029 = vmatpush1.bf16.msra.mxu0 %v2324_v17  ;;  %v557_v17 = vld [vmem:[%s3391_s3 + $0x170] sm:$0xff] }
  0x45   : > { %1160 = vmatprep.subr.bf16.mxu0 %v2273_v28  ;;  %v2311_v22 = vcombine.high %v553_v16, %v557_v17  ;;  %v566_v28 = vld [vmem:[%s3391_s3 + $0x1b8] sm:$0xff] }
  0xfa   : > { %v2521_v29 = vpop.f32.mrb[0].mxu0 }
  0xfb   : > { %v480_v31 = vpop.f32.mrb[1].mxu0  ;;  %v489_v34 = vadd.f32 %v2521_v29, %v2257_v30  ;;  %v2310_v29 = vcombine.low %v553_v16, %v557_v17  ;;  %v3117_v16 = vld [vmem:[%s3392_s4] sm:$0xff] }
  0xfc   : > { %v2522_v32 = vpop.f32.mrb[2].mxu0  ;;  %v481_v40 = vadd.f32 %v2257_v30, %v480_v31  ;;  %v2319_v31 = vcombine.high %v561_v24, %v565_v25 }
  0xfd   : > { %v492_v35 = vadd.f32 %v2522_v32, %v2257_v30  ;;  %v483_v36 = vpop.f32.mrb[3].mxu0 }
  0xfe   : > { %v484_v41 = vadd.f32 %v2257_v30, %v483_v36  ;;  %v574_v36 = vld [vmem:[%s3391_s3 + $0x1f8] sm:$0xff] }
  0xff   : > { %v2898_v42 = vpack.c.bf16 %v492_v35, %v489_v34  ;;  %v573_v34 = vld [vmem:[%s3391_s3 + $0x1f0] sm:$0xff]  ;;  %v570_v35 = vld [vmem:[%s3391_s3 + $0x1d8] sm:$0xff] }
 0x100   : > { %v2900_v43 = vpack.c.bf16 %v484_v41, %v481_v40  ;;  %v2327_v39 = vcombine.high %v569_v33, %v573_v34  ;;  %v2329_v40 = vcombine.high %v570_v35, %v574_v36  ;;  %v2326_v41 = vcombine.low %v569_v33, %v573_v34 }
 0x102   : > { %974 = vmatmul.mubr.bf16.vlgmr.msra.gmra.mrb[0].mxu1 %v2900_v43  ;;  %1047 = vmatmul.mubr.bf16.vlgmr.msra.gmra.mrb[8].mxu0 %v2900_v43  ;;  %v2525_v50 = vpop.f32.mrb[4].mxu0 }
 0x103   : > { %1088 = vmatpush1.bf16.msra.mxu1 %v2270_v23  ;;  %1161 = vmatpush1.bf16.msra.mxu0 %v2272_v27  ;;  %v505_v53 = vadd.f32 %v2525_v50, %v2257_v30  ;;  %v496_v54 = vpop.f32.mrb[5].mxu0  ;;  %v2313_v23 = vcombine.high %v554_v18, %v558_v19  ;;  %v562_v27 = vld [vmem:[%s3391_s3 + $0x198] sm:$0xff]  ;;  %v2579_v50 = vld [vmem:[%s3393_s5 + $0x50] sm:$0xff]  }
 0x104   : > { %1089 = vmatprep.subr.bf16.mxu1 %v2279_v44  ;;  %1162 = vmatprep.subr.bf16.mxu0 %v2281_v45  ;;  %v497_v55 = vadd.f32 %v2257_v30, %v496_v54  ;;  %v2526_v56 = vpop.f32.mrb[6].mxu0  ;;  %v2321_v32 = vcombine.high %v562_v27, %v566_v28  ;;  %v2320_v38 = vcombine.low %v562_v27, %v566_v28  ;;  %v2573_v45 = vld [vmem:[%s3393_s5] sm:$0xff]   ;;  %v2583_v54 = vld [vmem:[%s3393_s5 + $0x58] sm:$0xff]  }
 0x105   : > { %v508_v60 = vadd.f32 %v2526_v56, %v2257_v30  ;;  %983 = vmatprep.mubr.bf16.mxu1 %v2661_v26  ;;  %1056 = vmatprep.mubr.bf16.mxu0 %v2661_v26  ;;  %v499_v61 = vpop.f32.mrb[7].mxu0  ;;  %v2328_v44 = vcombine.low %v570_v35, %v574_v36  ;;  %v2585_v56 = vld [vmem:[%s3393_s5 + $0x18] sm:$0xff]  }
 0x106   : > { %v500_v1 = vadd.f32 %v2257_v30, %v499_v61  ;;  %v2312_v30 = vcombine.low %v554_v18, %v558_v19  ;;  %v2590_v61 = vld [vmem:[%s3393_s5 + $0xa0] sm:$0xff]  }
 0x107   : > { %1090 = vmatpush1.bf16.msra.mxu1 %v2278_v51  ;;  %1163 = vmatpush1.bf16.msra.mxu0 %v2280_v52  ;;  %v2930_v2 = vpack.c.bf16 %v508_v60, %v505_v53  ;;  %v2580_v51 = vld [vmem:[%s3393_s5 + $0xd0] sm:$0xff]   ;;  %v2589_v60 = vld [vmem:[%s3393_s5 + $0x20] sm:$0xff]  }
 0x108   : > { %1091 = vmatprep.subr.bf16.mxu1 %v2287_v57  ;;  %1164 = vmatprep.subr.bf16.mxu0 %v2289_v58  ;;  %v2932_v5 = vpack.c.bf16 %v500_v1, %v497_v55  ;;  %v2581_v52 = vld [vmem:[%s3393_s5 + $0x10] sm:$0xff]   ;;  %v2584_v55 = vld [vmem:[%s3393_s5 + $0xd8] sm:$0xff]   ;;  %v2587_v58 = vld [vmem:[%s3393_s5 + $0x60] sm:$0xff]  }
 0x109   : > { %v2582_v53 = vld [vmem:[%s3393_s5 + $0x90] sm:$0xff]   ;;  %v2586_v57 = vld [vmem:[%s3393_s5 + $0x98] sm:$0xff]   ;;  %v2594_v1 = vld [vmem:[%s3393_s5 + $0xa8] sm:$0xff]  }
 0x10a   : > { %984 = vmatmul.mubr.bf16.gmra.mrb[4].mxu1 %v2898_v42  ;;  %1057 = vmatmul.mubr.bf16.gmra.mrb[12].mxu0 %v2898_v42 }
 0x10b   : > { %1092 = vmatpush1.bf16.msra.mxu1 %v2286_v3  ;;  %1165 = vmatpush1.bf16.msra.mxu0 %v2288_v4  ;;  %v2596_v3 = vld [vmem:[%s3393_s5 + $0xf0] sm:$0xff]  }
 0x10c   : > { %1093 = vmatprep.subr.bf16.mxu1 %v2295_v6  ;;  %1166 = vmatprep.subr.bf16.mxu0 %v2297_v7  ;;  %v2597_v4 = vld [vmem:[%s3393_s5 + $0x30] sm:$0xff]   ;;  %v2599_v6 = vld [vmem:[%s3393_s5 + $0x78] sm:$0xff]  }
 0x10d   : > { %993 = vmatprep.mubr.bf16.mxu1 %v2661_v26  ;;  %1066 = vmatprep.mubr.bf16.mxu0 %v2661_v26  ;;  %v2600_v7 = vld [vmem:[%s3393_s5 + $0xf8] sm:$0xff]  }
 0x10f   : > { %1094 = vmatpush1.bf16.msra.mxu1 %v2294_v12  ;;  %1167 = vmatpush1.bf16.msra.mxu0 %v2296_v13  ;;  %v581_v12 = vlaneseq }
 0x110   : > { %1095 = vmatprep.subr.bf16.mxu1 %v2303_v14  ;;  %1168 = vmatprep.subr.bf16.mxu0 %v2305_v15 }
 0x111   : > { %v3110_v13 = vshrl.u32 %v581_v12, 7 }
 0x112   : > { %994 = vmatmul.mubr.bf16.gmra.mrb[8].mxu1 %v2932_v5  ;;  %1067 = vmatmul.mubr.bf16.gmra.mrb[16].mxu0 %v2932_v5 }
 0x113   : > { %1096 = vmatpush1.bf16.msra.mxu1 %v2302_v20  ;;  %1169 = vmatpush1.bf16.msra.mxu0 %v2304_v21  ;;  %v583_v14 = vsub.s32 0, %v3110_v13  ;;  %v591_v15 = vsub.s32 2, %v3110_v13  ;;  %v587_v17 = vsub.s32 1, %v3110_v13  ;;  %v595_v18 = vsub.s32 3, %v3110_v13 }
 0x114   : > { %1097 = vmatprep.subr.bf16.mxu1 %v2311_v22  ;;  %1170 = vmatprep.subr.bf16.mxu0 %v2313_v23 }
 0x115   : > { %1003 = vmatprep.mubr.bf16.mxu1 %v2661_v26  ;;  %1076 = vmatprep.mubr.bf16.mxu0 %v2661_v26  ;;  %v3124_v19 = vrot.slane %v3117_v16, %v583_v14  ;;  %v3129_v20 = vrot.slane %v3117_v16, %v591_v15  ;;  %v3134_v23 = vrot.slane %v3117_v16, %v587_v17 }
 0x116   : > { %v3139_v24 = vrot.slane %v3117_v16, %v595_v18 }
 0x117   : > { %1098 = vmatpush1.bf16.msra.mxu1 %v2310_v29  ;;  %1171 = vmatpush1.bf16.msra.mxu0 %v2312_v30 }
 0x118   : > { %1099 = vmatprep.subr.bf16.mxu1 %v2319_v31  ;;  %1172 = vmatprep.subr.bf16.mxu0 %v2321_v32 }
 0x11a   : > { %1004 = vmatmul.mubr.bf16.gmra.mrb[12].mxu1 %v2930_v2  ;;  %1077 = vmatmul.mubr.bf16.gmra.mrb[20].mxu0 %v2930_v2 }
 0x11b   : > { %1100 = vmatpush1.bf16.msra.mxu1 %v2318_v37  ;;  %1173 = vmatpush1.bf16.msra.mxu0 %v2320_v38 }
 0x11c   : > { %1101 = vmatprep.subr.bf16.mxu1 %v2327_v39  ;;  %1174 = vmatprep.subr.bf16.mxu0 %v2329_v40 }
 0x11d   : > { %1119 = vmatprep.mubr.bf16.mxu1 %v2661_v26  ;;  %1192 = vmatprep.mubr.bf16.mxu0 %v2661_v26 }
 0x11f   : > { %1102 = vmatpush1.bf16.msra.mxu1 %v2326_v41  ;;  %1175 = vmatpush1.bf16.msra.mxu0 %v2328_v44 }
 0x122   : > { %1120 = vmatmul.mubr.bf16.vlgmr.msra.gmra.mrb[16].mxu1 %v2900_v43  ;;  %1193 = vmatmul.mubr.bf16.vlgmr.msra.gmra.mrb[24].mxu0 %v2900_v43  ;;  %v2572_v43 = vld [vmem:[%s3393_s5 + $0xc0] sm:$0xff]  }
 0x123   : > { %1129 = vmatprep.mubr.bf16.mxu1 %v2661_v26  ;;  %1202 = vmatprep.mubr.bf16.mxu0 %v2661_v26 }
 0x124   : > { %2434 = vmatprep.subr.bf16.mxu0 %v2572_v43 }
 0x12a   : > { %1130 = vmatmul.mubr.bf16.gmra.mrb[20].mxu1 %v2898_v42  ;;  %1203 = vmatmul.mubr.bf16.gmra.mrb[28].mxu0 %v2898_v42  ;;  %v2571_v42 = vld [vmem:[%s3393_s5 + $0x40] sm:$0xff]  }
 0x12b   : > { %1139 = vmatprep.mubr.bf16.mxu1 %v2661_v26  ;;  %1212 = vmatprep.mubr.bf16.mxu0 %v2661_v26 }
 0x12c   : > { %2412 = vmatprep.subr.bf16.mxu1 %v2571_v42 }
 0x12d   : > { %2413 = vmatpush3.bf16.msra.mxu1 %v2573_v45 }
 0x12e   : > { %2414 = vmatprep.subr.bf16.mxu1 %v2575_v46 }
 0x131   : > { %2415 = vmatpush3.bf16.msra.mxu1 %v2577_v48 }
 0x132   : > { %1140 = vmatmul.mubr.bf16.gmra.mrb[24].mxu1 %v2932_v5  ;;  %1213 = vmatmul.mubr.bf16.gmra.mrb[32].mxu0 %v2932_v5  ;;  %v2598_v5 = vld [vmem:[%s3393_s5 + $0xb0] sm:$0xff]  }
 0x133   : > { %1149 = vmatprep.mubr.bf16.mxu1 %v2661_v26  ;;  %1222 = vmatprep.mubr.bf16.mxu0 %v2661_v26  ;;  %v2574_v26 = vld [vmem:[%s3393_s5 + $0x80] sm:$0xff]  }
 0x134   : > { %2435 = vmatpush3.bf16.msra.mxu0 %v2574_v26  ;;  %2416 = vmatprep.subr.bf16.mxu1 %v2579_v50 }
 0x135   : > { %2436 = vmatprep.subr.bf16.mxu0 %v2576_v47  ;;  %2417 = vmatpush3.bf16.msra.mxu1 %v2581_v52 }
 0x136   : > { %2418 = vmatprep.subr.bf16.mxu1 %v2583_v54 }
 0x138   : > { %2437 = vmatpush3.bf16.msra.mxu0 %v2578_v49 }
 0x139   : > { %2438 = vmatprep.subr.bf16.mxu0 %v2580_v51  ;;  %2419 = vmatpush3.bf16.msra.mxu1 %v2585_v56 }
 0x13a   : > { %1150 = vmatmul.mubr.bf16.gmra.mrb[28].mxu1 %v2930_v2  ;;  %1223 = vmatmul.mubr.bf16.gmra.mrb[36].mxu0 %v2930_v2  ;;  %v2595_v2 = vld [vmem:[%s3393_s5 + $0x70] sm:$0xff]  }
 0x13b   : > { %2420 = vmatprep.subr.bf16.mxu1 %v2587_v58 }
 0x13c   : > { %2439 = vmatpush3.bf16.msra.mxu0 %v2582_v53 }
 0x13d   : > { %2440 = vmatprep.subr.bf16.mxu0 %v2584_v55  ;;  %2421 = vmatpush3.bf16.msra.mxu1 %v2589_v60 }
 0x13e   : > { %2422 = vmatprep.subr.bf16.mxu1 %v2591_v62 }
 0x140   : > { %2441 = vmatpush3.bf16.msra.mxu0 %v2586_v57 }
 0x141   : > { %2442 = vmatprep.subr.bf16.mxu0 %v2588_v59  ;;  %2423 = vmatpush3.bf16.msra.mxu1 %v2593_v0 }
 0x142   : > { %2424 = vmatprep.subr.bf16.mxu1 %v2595_v2 }
 0x144   : > { %2443 = vmatpush3.bf16.msra.mxu0 %v2590_v61 }
 0x145   : > { %2444 = vmatprep.subr.bf16.mxu0 %v2592_v63  ;;  %2425 = vmatpush3.bf16.msra.mxu1 %v2597_v4 }
 0x146   : > { %2426 = vmatprep.subr.bf16.mxu1 %v2599_v6 }
 0x148   : > { %2445 = vmatpush3.bf16.msra.mxu0 %v2594_v1 }
 0x149   : > { %2446 = vmatprep.subr.bf16.mxu0 %v2596_v3  ;;  %2427 = vmatpush3.bf16.msra.mxu1 %v2601_v8 }
 0x14a   : > { %2456 = vmatprep.subr.bf16.mxu1 %v2603_v10 }
 0x14c   : > { %2447 = vmatpush3.bf16.msra.mxu0 %v2598_v5 }
 0x14d   : > { %2448 = vmatprep.subr.bf16.mxu0 %v2600_v7 }
 0x150   : > { %2449 = vmatpush3.bf16.msra.mxu0 %v2602_v9 }
 0x151   : > { %2478 = vmatprep.subr.bf16.mxu0 %v2604_v11 }
 0x1d5   : > { %v975_v21 = vpop.f32.mrb[0].mxu1  ;;  %v1048_v22 = vpop.f32.mrb[8].mxu0 }
 0x1d6   : > { %v977_v25 = vpop.f32.mrb[1].mxu1  ;;  %v1050_v27 = vpop.f32.mrb[9].mxu0  ;;  %v976_v30 = vadd.f32 %v975_v21, %v3124_v19  ;;  %v1049_v31 = vadd.f32 %v1048_v22, %v3129_v20 }
 0x1d7   : > { %v979_v28 = vpop.f32.mrb[2].mxu1  ;;  %v1052_v29 = vpop.f32.mrb[10].mxu0  ;;  %v978_v36 = vadd.f32 %v977_v25, %v3134_v23  ;;  %v1051_v37 = vadd.f32 %v1050_v27, %v3139_v24 }
 0x1d8   : > { %v980_v32 = vadd.f32 %v979_v28, %v3124_v19  ;;  %v1053_v33 = vadd.f32 %v1052_v29, %v3129_v20  ;;  %v981_v34 = vpop.f32.mrb[3].mxu1  ;;  %v1054_v35 = vpop.f32.mrb[11].mxu0 }
 0x1d9   : > { %v982_v38 = vadd.f32 %v981_v34, %v3134_v23  ;;  %v1055_v39 = vadd.f32 %v1054_v35, %v3139_v24 }
 0x1da   : > { %v1234_v40 = vmax.f32 %v976_v30, %v980_v32  ;;  %v1260_v41 = vmax.f32 %v1049_v31, %v1053_v33 }
 0x1db   : > { %v1247_v44 = vmax.f32 %v978_v36, %v982_v38  ;;  %v1273_v42 = vmax.f32 %v1051_v37, %v1055_v39 }
 0x1dd   : > { %v985_v43 = vpop.f32.mrb[4].mxu1  ;;  %v1058_v45 = vpop.f32.mrb[12].mxu0 }
 0x1de   : > { %v986_v26 = vadd.f32 %v985_v43, %v3124_v19  ;;  %v1059_v46 = vadd.f32 %v1058_v45, %v3129_v20  ;;  %v987_v47 = vpop.f32.mrb[5].mxu1  ;;  %v1060_v48 = vpop.f32.mrb[13].mxu0  ;;  %v607_v45 = vsub.s32 6, %v3110_v13 }
 0x1df   : > { %v988_v49 = vadd.f32 %v987_v47, %v3134_v23  ;;  %v1061_v50 = vadd.f32 %v1060_v48, %v3139_v24  ;;  %v989_v51 = vpop.f32.mrb[6].mxu1  ;;  %v1062_v52 = vpop.f32.mrb[14].mxu0 }
 0x1e0   : > { %v1235_v53 = vmax.f32 %v1234_v40, %v986_v26  ;;  %v1261_v54 = vmax.f32 %v1260_v41, %v1059_v46  ;;  %v990_v55 = vadd.f32 %v989_v51, %v3124_v19  ;;  %v1063_v56 = vadd.f32 %v1062_v52, %v3129_v20  ;;  %v991_v57 = vpop.f32.mrb[7].mxu1  ;;  %v1064_v58 = vpop.f32.mrb[15].mxu0 }
 0x1e1   : > { %v1248_v59 = vmax.f32 %v1247_v44, %v988_v49  ;;  %v1274_v60 = vmax.f32 %v1273_v42, %v1061_v50  ;;  %v992_v61 = vadd.f32 %v991_v57, %v3134_v23  ;;  %v1065_v62 = vadd.f32 %v1064_v58, %v3139_v24 }
 0x1e2   : > { %v1236_v63 = vmax.f32 %v1235_v53, %v990_v55  ;;  %v1262_v0 = vmax.f32 %v1261_v54, %v1063_v56  ;;  %v599_v40 = vsub.s32 4, %v3110_v13  ;;  %v603_v26 = vsub.s32 5, %v3110_v13 }
 0x1e3   : > { %v1249_v1 = vmax.f32 %v1248_v59, %v992_v61  ;;  %v1275_v2 = vmax.f32 %v1274_v60, %v1065_v62  ;;  %v2662_v50 = vmov 1966171168   ;;  %v611_v52 = vsub.s32 7, %v3110_v13 }
 0x1e4   : > { %v1351_v51 = vunpack.c.l.s4 %v2662_v50 }
 0x1e5   : > { %v995_v3 = vpop.f32.mrb[8].mxu1  ;;  %v1068_v4 = vpop.f32.mrb[16].mxu0 }
 0x1e6   : > { %v996_v5 = vadd.f32 %v995_v3, %v3124_v19  ;;  %v1069_v6 = vadd.f32 %v1068_v4, %v3129_v20  ;;  %v997_v7 = vpop.f32.mrb[9].mxu1  ;;  %v1070_v8 = vpop.f32.mrb[17].mxu0 }
 0x1e7   : > { %v998_v9 = vadd.f32 %v997_v7, %v3134_v23  ;;  %v1071_v10 = vadd.f32 %v1070_v8, %v3139_v24  ;;  %v999_v11 = vpop.f32.mrb[10].mxu1  ;;  %v1072_v12 = vpop.f32.mrb[18].mxu0 }
 0x1e8   : > { %v1237_v21 = vmax.f32 %v1236_v63, %v996_v5  ;;  %v1263_v22 = vmax.f32 %v1262_v0, %v1069_v6  ;;  %v1000_v25 = vadd.f32 %v999_v11, %v3124_v19  ;;  %v1073_v27 = vadd.f32 %v1072_v12, %v3129_v20  ;;  %v1001_v28 = vpop.f32.mrb[11].mxu1  ;;  %v1074_v29 = vpop.f32.mrb[19].mxu0 }
 0x1e9   : > { %v1250_v30 = vmax.f32 %v1249_v1, %v998_v9  ;;  %v1276_v31 = vmax.f32 %v1275_v2, %v1071_v10  ;;  %v1002_v32 = vadd.f32 %v1001_v28, %v3134_v23  ;;  %v1075_v33 = vadd.f32 %v1074_v29, %v3139_v24 }
 0x1ea   : > { %v1238_v34 = vmax.f32 %v1237_v21, %v1000_v25  ;;  %v1264_v35 = vmax.f32 %v1263_v22, %v1073_v27  ;;  %v3180_v1 = vrot.slane %v3117_v16, %v599_v40  ;;  %v1352_v6 = vunpack.c.0.s8 %v1351_v51 }
 0x1eb   : > { %v1251_v36 = vmax.f32 %v1250_v30, %v1002_v32  ;;  %v1277_v37 = vmax.f32 %v1276_v31, %v1075_v33 }
 0x1ed   : > { %v1005_v38 = vpop.f32.mrb[12].mxu1  ;;  %v1078_v39 = vpop.f32.mrb[20].mxu0 }
 0x1ee   : > { %v1006_v41 = vadd.f32 %v1005_v38, %v3124_v19  ;;  %v1079_v44 = vadd.f32 %v1078_v39, %v3129_v20  ;;  %v1007_v42 = vpop.f32.mrb[13].mxu1  ;;  %v1080_v43 = vpop.f32.mrb[21].mxu0 }
 0x1ef   : > { %v1008_v46 = vadd.f32 %v1007_v42, %v3134_v23  ;;  %v1081_v47 = vadd.f32 %v1080_v43, %v3139_v24  ;;  %v1009_v48 = vpop.f32.mrb[14].mxu1  ;;  %v1082_v49 = vpop.f32.mrb[22].mxu0 }
 0x1f0   : > { %v1239_v53 = vmax.f32 %v1238_v34, %v1006_v41  ;;  %v1265_v54 = vmax.f32 %v1264_v35, %v1079_v44  ;;  %v1010_v55 = vadd.f32 %v1009_v48, %v3124_v19  ;;  %v1083_v56 = vadd.f32 %v1082_v49, %v3129_v20  ;;  %v1011_v57 = vpop.f32.mrb[15].mxu1  ;;  %v1084_v58 = vpop.f32.mrb[23].mxu0 }
 0x1f1   : > { %v1252_v59 = vmax.f32 %v1251_v36, %v1008_v46  ;;  %v1278_v60 = vmax.f32 %v1277_v37, %v1081_v47  ;;  %v1012_v61 = vadd.f32 %v1011_v57, %v3134_v23  ;;  %v1085_v62 = vadd.f32 %v1084_v58, %v3139_v24 }
 0x1f2   : > { %v1240_v63 = vmax.f32 %v1239_v53, %v1010_v55  ;;  %v1266_v0 = vmax.f32 %v1265_v54, %v1083_v56  ;;  %v3185_v19 = vrot.slane %v3117_v16, %v607_v45  ;;  %v3190_v23 = vrot.slane %v3117_v16, %v603_v26 }
 0x1f3   : > { %v1253_v20 = vmax.f32 %v1252_v59, %v1012_v61  ;;  %v1279_v2 = vmax.f32 %v1278_v60, %v1085_v62  ;;  %v3195_v24 = vrot.slane %v3117_v16, %v611_v52  ;;  %v3206_v56 = vsub.s32 %v1352_v6, %v3110_v13  ;;  %v2636_v13 = vld [vmem:[%s3395_s7 + $0x8] sm:$0xff]  }
 0x1f4   : > { %v1241_v3 = vrot.slane %v1240_v63, 4  ;;  %v1267_v4 = vrot.slane %v1266_v0, 4 }
 0x1f5   : > { %v1254_v5 = vrot.slane %v1253_v20, 4  ;;  %v1280_v7 = vrot.slane %v1279_v2, 4  ;;  %v1121_v8 = vpop.f32.mrb[16].mxu1  ;;  %v1194_v9 = vpop.f32.mrb[24].mxu0 }
 0x1f6   : > { %v1242_v10 = vmax.f32 %v1240_v63, %v1241_v3  ;;  %v1268_v11 = vmax.f32 %v1266_v0, %v1267_v4  ;;  %v1122_v12 = vadd.f32 %v1121_v8, %v3180_v1  ;;  %v1195_v21 = vadd.f32 %v1194_v9, %v3185_v19  ;;  %v1123_v22 = vpop.f32.mrb[17].mxu1  ;;  %v1196_v25 = vpop.f32.mrb[25].mxu0 }
 0x1f7   : > { %v1255_v27 = vmax.f32 %v1253_v20, %v1254_v5  ;;  %v1281_v28 = vmax.f32 %v1279_v2, %v1280_v7  ;;  %v1124_v16 = vadd.f32 %v1123_v22, %v3190_v23  ;;  %v1197_v29 = vadd.f32 %v1196_v25, %v3195_v24  ;;  %v1125_v30 = vpop.f32.mrb[18].mxu1  ;;  %v1198_v31 = vpop.f32.mrb[26].mxu0 }
 0x1f8   : > { %v1243_v32 = vrot.slane %v1242_v10, 2  ;;  %v1269_v33 = vrot.slane %v1268_v11, 2  ;;  %v1126_v34 = vadd.f32 %v1125_v30, %v3180_v1  ;;  %v1199_v35 = vadd.f32 %v1198_v31, %v3185_v19  ;;  %v1127_v36 = vpop.f32.mrb[19].mxu1  ;;  %v1200_v37 = vpop.f32.mrb[27].mxu0 }
 0x1f9   : > { %v1256_v38 = vrot.slane %v1255_v27, 2  ;;  %v1282_v39 = vrot.slane %v1281_v28, 2  ;;  %v1128_v41 = vadd.f32 %v1127_v36, %v3190_v23  ;;  %v1201_v44 = vadd.f32 %v1200_v37, %v3195_v24 }
 0x1fa   : > { %v1244_v42 = vmax.f32 %v1242_v10, %v1243_v32  ;;  %v1270_v43 = vmax.f32 %v1268_v11, %v1269_v33  ;;  %v1286_v46 = vmax.f32 %v1122_v12, %v1126_v34  ;;  %v1312_v47 = vmax.f32 %v1195_v21, %v1199_v35 }
 0x1fb   : > { %v1257_v48 = vmax.f32 %v1255_v27, %v1256_v38  ;;  %v1283_v49 = vmax.f32 %v1281_v28, %v1282_v39  ;;  %v1299_v50 = vmax.f32 %v1124_v16, %v1128_v41  ;;  %v1325_v51 = vmax.f32 %v1197_v29, %v1201_v44 }
 0x1fc   : > { %v1245_v53 = vrot.slane %v1244_v42, 1  ;;  %v1271_v54 = vrot.slane %v1270_v43, 1 }
 0x1fd   : > { %v1258_v55 = vrot.slane %v1257_v48, 1  ;;  %v1284_v57 = vrot.slane %v1283_v49, 1  ;;  %v1131_v58 = vpop.f32.mrb[20].mxu1  ;;  %v1204_v59 = vpop.f32.mrb[28].mxu0 }
 0x1fe   : > { %v1246_v60 = vmax.f32 %v1244_v42, %v1245_v53  ;;  %v1272_v61 = vmax.f32 %v1270_v43, %v1271_v54  ;;  %v1132_v62 = vadd.f32 %v1131_v58, %v3180_v1  ;;  %v1205_v63 = vadd.f32 %v1204_v59, %v3185_v19  ;;  %v1133_v0 = vpop.f32.mrb[21].mxu1  ;;  %v1206_v20 = vpop.f32.mrb[29].mxu0 }
 0x1ff   : > { %v1259_v2 = vmax.f32 %v1257_v48, %v1258_v55  ;;  %v1285_v3 = vmax.f32 %v1283_v49, %v1284_v57  ;;  %v1134_v4 = vadd.f32 %v1133_v0, %v3190_v23  ;;  %v1207_v5 = vadd.f32 %v1206_v20, %v3195_v24  ;;  %v1135_v7 = vpop.f32.mrb[22].mxu1  ;;  %v1208_v6 = vpop.f32.mrb[30].mxu0 }
 0x200   : > { %v1287_v8 = vmax.f32 %v1286_v46, %v1132_v62  ;;  %v1313_v9 = vmax.f32 %v1312_v47, %v1205_v63  ;;  %v1136_v10 = vadd.f32 %v1135_v7, %v3180_v1  ;;  %v1209_v11 = vadd.f32 %v1208_v6, %v3185_v19  ;;  %v1137_v12 = vpop.f32.mrb[23].mxu1  ;;  %v1210_v21 = vpop.f32.mrb[31].mxu0 }
 0x201   : > { %v1346_v22 = vcombine.low %v1246_v60, %v1259_v2  ;;  %v1347_v25 = vcombine.low %v1272_v61, %v1285_v3  ;;  %v1300_v27 = vmax.f32 %v1299_v50, %v1134_v4  ;;  %v1326_v28 = vmax.f32 %v1325_v51, %v1207_v5 }
 0x202   : > { %v1288_v16 = vmax.f32 %v1287_v8, %v1136_v10  ;;  %v1314_v29 = vmax.f32 %v1313_v9, %v1209_v11  ;;  %v1138_v30 = vadd.f32 %v1137_v12, %v3190_v23  ;;  %v1211_v31 = vadd.f32 %v1210_v21, %v3195_v24 }
 0x203   : > { %v3217_v32 = vrot.slane %v1346_v22, %v3206_v56  ;;  %v3220_v33 = vrot.slane %v1347_v25, %v3206_v56 }
 0x204   : > { %v1301_v34 = vmax.f32 %v1300_v27, %v1138_v30  ;;  %v1327_v35 = vmax.f32 %v1326_v28, %v1211_v31 }
 0x205   : > { %v1378_v36 = vcombine.low %v3217_v32, %v3220_v33  ;;  %v1141_v37 = vpop.f32.mrb[24].mxu1  ;;  %v1214_v38 = vpop.f32.mrb[32].mxu0 }
 0x206   : > { %v1142_v39 = vadd.f32 %v1141_v37, %v3180_v1  ;;  %v1215_v41 = vadd.f32 %v1214_v38, %v3185_v19  ;;  %v1143_v44 = vpop.f32.mrb[25].mxu1  ;;  %v1216_v42 = vpop.f32.mrb[33].mxu0 }
 0x207   : > { %v1144_v43 = vadd.f32 %v1143_v44, %v3190_v23  ;;  %v1217_v46 = vadd.f32 %v1216_v42, %v3195_v24  ;;  %v1145_v47 = vpop.f32.mrb[26].mxu1  ;;  %v1218_v48 = vpop.f32.mrb[34].mxu0 }
 0x208   : > { %v1289_v49 = vmax.f32 %v1288_v16, %v1142_v39  ;;  %v1315_v50 = vmax.f32 %v1314_v29, %v1215_v41  ;;  %v1146_v51 = vadd.f32 %v1145_v47, %v3180_v1  ;;  %v1219_v53 = vadd.f32 %v1218_v48, %v3185_v19  ;;  %v1147_v54 = vpop.f32.mrb[27].mxu1  ;;  %v1220_v55 = vpop.f32.mrb[35].mxu0 }
 0x209   : > { %v1302_v57 = vmax.f32 %v1301_v34, %v1144_v43  ;;  %v1328_v58 = vmax.f32 %v1327_v35, %v1217_v46  ;;  %v1148_v59 = vadd.f32 %v1147_v54, %v3190_v23  ;;  %v1221_v60 = vadd.f32 %v1220_v55, %v3195_v24 }
 0x20a   : > { %v1290_v61 = vmax.f32 %v1289_v49, %v1146_v51  ;;  %v1316_v62 = vmax.f32 %v1315_v50, %v1219_v53 }
 0x20b   : > { %v1303_v63 = vmax.f32 %v1302_v57, %v1148_v59  ;;  %v1329_v0 = vmax.f32 %v1328_v58, %v1221_v60 }
 0x20d   : > { %v1151_v20 = vpop.f32.mrb[28].mxu1  ;;  %v1224_v2 = vpop.f32.mrb[36].mxu0 }
 0x20e   : > { %v1152_v3 = vadd.f32 %v1151_v20, %v3180_v1  ;;  %v1225_v4 = vadd.f32 %v1224_v2, %v3185_v19  ;;  %v1153_v5 = vpop.f32.mrb[29].mxu1  ;;  %v1226_v7 = vpop.f32.mrb[37].mxu0 }
 0x20f   : > { %v1154_v6 = vadd.f32 %v1153_v5, %v3190_v23  ;;  %v1227_v8 = vadd.f32 %v1226_v7, %v3195_v24  ;;  %v1155_v9 = vpop.f32.mrb[30].mxu1  ;;  %v1228_v10 = vpop.f32.mrb[38].mxu0 }
 0x210   : > { %v1291_v11 = vmax.f32 %v1290_v61, %v1152_v3  ;;  %v1317_v12 = vmax.f32 %v1316_v62, %v1225_v4  ;;  %v1156_v21 = vadd.f32 %v1155_v9, %v3180_v1  ;;  %v1229_v22 = vadd.f32 %v1228_v10, %v3185_v19  ;;  %v1157_v25 = vpop.f32.mrb[31].mxu1  ;;  %v1230_v27 = vpop.f32.mrb[39].mxu0 }
 0x211   : > { %v1304_v28 = vmax.f32 %v1303_v63, %v1154_v6  ;;  %v1330_v16 = vmax.f32 %v1329_v0, %v1227_v8  ;;  %v1158_v29 = vadd.f32 %v1157_v25, %v3190_v23  ;;  %v1231_v30 = vadd.f32 %v1230_v27, %v3195_v24  ;;  %v2612_v25 = vld [vmem:[%s3393_s5 + $0x1d0] sm:$0xff]  }
 0x212   : > { %v1292_v31 = vmax.f32 %v1291_v11, %v1156_v21  ;;  %v1318_v34 = vmax.f32 %v1317_v12, %v1229_v22  ;;  %v1386_v3 = vrot.slane %v1378_v36, %v3206_v56  ;;  %v2609_v12 = vld [vmem:[%s3393_s5 + $0x108] sm:$0xff]   ;;  %v2611_v22 = vld [vmem:[%s3393_s5 + $0x150] sm:$0xff]  }
 0x213   : > { %v1305_v35 = vmax.f32 %v1304_v28, %v1158_v29  ;;  %v1331_v37 = vmax.f32 %v1330_v16, %v1231_v30  ;;  %v2610_v21 = vld [vmem:[%s3393_s5 + $0x188] sm:$0xff]   ;;  %v2613_v27 = vld [vmem:[%s3393_s5 + $0x110] sm:$0xff]   ;;  %v2615_v16 = vld [vmem:[%s3393_s5 + $0x158] sm:$0xff]  }
 0x214   : > { %v1293_v38 = vrot.slane %v1292_v31, 4  ;;  %v1319_v39 = vrot.slane %v1318_v34, 4  ;;  %v2614_v28 = vld [vmem:[%s3393_s5 + $0x190] sm:$0xff]   ;;  %v2616_v29 = vld [vmem:[%s3393_s5 + $0x1d8] sm:$0xff]  }
 0x215   : > { %v1306_v41 = vrot.slane %v1305_v35, 4  ;;  %v1332_v44 = vrot.slane %v1331_v37, 4  ;;  %v2617_v30 = vld [vmem:[%s3393_s5 + $0x118] sm:$0xff]  }
 0x216   : > { %v1294_v42 = vmax.f32 %v1292_v31, %v1293_v38  ;;  %v1320_v1 = vmax.f32 %v1318_v34, %v1319_v39  ;;  %v2618_v31 = vld [vmem:[%s3393_s5 + $0x198] sm:$0xff]   ;;  %v2619_v34 = vld [vmem:[%s3393_s5 + $0x160] sm:$0xff]   ;;  %v2623_v39 = vld [vmem:[%s3393_s5 + $0x168] sm:$0xff]  }
 0x217   : > { %v1307_v43 = vmax.f32 %v1305_v35, %v1306_v41  ;;  %v1333_v19 = vmax.f32 %v1331_v37, %v1332_v44  ;;  %v2620_v35 = vld [vmem:[%s3393_s5 + $0x1e0] sm:$0xff]   ;;  %v2624_v41 = vld [vmem:[%s3393_s5 + $0x1e8] sm:$0xff]  }
 0x218   : > { %v1295_v46 = vrot.slane %v1294_v42, 2  ;;  %v1321_v47 = vrot.slane %v1320_v1, 2  ;;  %v2621_v37 = vld [vmem:[%s3393_s5 + $0x120] sm:$0xff]   ;;  %v2625_v44 = vld [vmem:[%s3393_s5 + $0x128] sm:$0xff]  }
 0x219   : > { %v1308_v48 = vrot.slane %v1307_v43, 2  ;;  %v1334_v49 = vrot.slane %v1333_v19, 2  ;;  %v2622_v38 = vld [vmem:[%s3393_s5 + $0x1a0] sm:$0xff]  }
 0x21a   : > { %v1296_v50 = vmax.f32 %v1294_v42, %v1295_v46  ;;  %v1322_v23 = vmax.f32 %v1320_v1, %v1321_v47  ;;  %v2626_v42 = vld [vmem:[%s3393_s5 + $0x1a8] sm:$0xff]   ;;  %v2627_v1 = vld [vmem:[%s3393_s5 + $0x170] sm:$0xff]   ;;  %v2631_v47 = vld [vmem:[%s3393_s5 + $0x178] sm:$0xff]  }
 0x21b   : > { %v1309_v51 = vmax.f32 %v1307_v43, %v1308_v48  ;;  %v1335_v24 = vmax.f32 %v1333_v19, %v1334_v49  ;;  %v2628_v43 = vld [vmem:[%s3393_s5 + $0x1f0] sm:$0xff]   ;;  %v2632_v48 = vld [vmem:[%s3393_s5 + $0x1f8] sm:$0xff]  }
 0x21c   : > { %v1297_v53 = vrot.slane %v1296_v50, 1  ;;  %v1323_v54 = vrot.slane %v1322_v23, 1  ;;  %v2629_v19 = vld [vmem:[%s3393_s5 + $0x130] sm:$0xff]   ;;  %v2633_v49 = vld [vmem:[%s3393_s5 + $0x138] sm:$0xff]  }
 0x21d   : > { %v1310_v55 = vrot.slane %v1309_v51, 1  ;;  %v1336_v57 = vrot.slane %v1335_v24, 1  ;;  %v2630_v46 = vld [vmem:[%s3393_s5 + $0x1b0] sm:$0xff]  }
 0x21e   : > { %v1298_v58 = vmax.f32 %v1296_v50, %v1297_v53  ;;  %v1324_v59 = vmax.f32 %v1322_v23, %v1323_v54  ;;  %v2634_v50 = vld [vmem:[%s3393_s5 + $0x1b8] sm:$0xff]   ;;  %v2635_v54 = vld [vmem:[%s3395_s7] sm:$0xff]  }
 0x21f   : > { %v1311_v60 = vmax.f32 %v1309_v51, %v1310_v55  ;;  %v1337_v61 = vmax.f32 %v1335_v24, %v1336_v57  ;;  %v2663_v55 = vmov 0.0   ;;  %v1579_v57 = vld [vmem:[%s3394_s6] sm:$0x1] }
 0x221   : > { %v1348_v62 = vcombine.low %v1298_v58, %v1311_v60  ;;  %v1349_v63 = vcombine.low %v1324_v59, %v1337_v61 }
 0x223   : > { %v1370_v0 = vrot.slane %v1348_v62, %v3206_v56  ;;  %v1377_v20 = vrot.slane %v1349_v63, %v3206_v56 }
 0x225   : > { %v1379_v2 = vcombine.low %v1370_v0, %v1377_v20 }
 0x227   : > { %v1393_v4 = vrot.slane %v1379_v2, %v3206_v56 }
 0x229   : > { %v3247_v5 = vcombine.low %v1386_v3, %v1393_v4 }
 0x22b   : > { %v1538_v7 = vrot.slane %v3247_v5, %v587_v17  ;;  %v1546_v6 = vrot.slane %v3247_v5, %v595_v18  ;;  %v1534_v8 = vrot.slane %v3247_v5, %v583_v14  ;;  %v1542_v32 = vrot.slane %v3247_v5, %v591_v15  ;;  %v2605_v14 = vld [vmem:[%s3393_s5 + $0x100] sm:$0xff]  }
 0x22c   : > { %v1554_v56 = vrot.slane %v3247_v5, %v603_v26  ;;  %v1562_v17 = vrot.slane %v3247_v5, %v611_v52  ;;  %v2606_v15 = vld [vmem:[%s3393_s5 + $0x180] sm:$0xff]   ;;  %v2607_v26 = vld [vmem:[%s3393_s5 + $0x148] sm:$0xff]   ;;  %v1550_v23 = vrot.slane %v3247_v5, %v599_v40  ;;  %v1558_v51 = vrot.slane %v3247_v5, %v607_v45 }
 0x22d   : > { %v1572_v33 = vpack.c.bf16 %v1538_v7, %v1538_v7  ;;  %v1574_v36 = vpack.c.bf16 %v1546_v6, %v1546_v6  ;;  %v1571_v9 = vpack.c.bf16 %v1534_v8, %v1534_v8  ;;  %v1573_v18 = vpack.c.bf16 %v1542_v32, %v1542_v32  ;;  %v2608_v52 = vld [vmem:[%s3393_s5 + $0x1c8] sm:$0xff]  }
 0x22e   : > { %v1576_v10 = vpack.c.bf16 %v1554_v56, %v1554_v56  ;;  %v1578_v11 = vpack.c.bf16 %v1562_v17, %v1562_v17  ;;  %v1575_v24 = vpack.c.bf16 %v1550_v23, %v1550_v23  ;;  %v1577_v53 = vpack.c.bf16 %v1558_v51, %v1558_v51 }
 0x22f   : > { %1996 = vmatprep.mubr.bf16.mxu1 %v1572_v33  ;;  %2036 = vmatprep.mubr.bf16.mxu0 %v1574_v36 }
 0x230   : > { %1997 = vmatmul.mubr.bf16.vlgmr.msra.gmra.mrb[32].mxu1 %v1571_v9  ;;  %2037 = vmatmul.mubr.bf16.vlgmr.msra.gmra.mrb[40].mxu0 %v1573_v18 }
 0x231   : > { %2457 = vmatpush3.bf16.msra.mxu1 %v2605_v14  ;;  %2479 = vmatpush3.bf16.msra.mxu0 %v2606_v15 }
 0x232   : > { %2076 = vmatprep.mubr.bf16.mxu1 %v1576_v10  ;;  %2116 = vmatprep.mubr.bf16.mxu0 %v1578_v11 }
 0x233   : > { %2458 = vmatprep.subr.bf16.mxu1 %v2607_v26  ;;  %2480 = vmatprep.subr.bf16.mxu0 %v2608_v52  ;;  %v2130_v26 = vld [vmem:[%s3396_s8] sm:$0x1] }
 0x235   : > { %2459 = vmatpush3.bf16.msra.mxu1 %v2609_v12  ;;  %2481 = vmatpush3.bf16.msra.mxu0 %v2610_v21 }
 0x236   : > { %2460 = vmatprep.subr.bf16.mxu1 %v2611_v22  ;;  %2482 = vmatprep.subr.bf16.mxu0 %v2612_v25 }
 0x239   : > { %2461 = vmatpush3.bf16.msra.mxu1 %v2613_v27  ;;  %2483 = vmatpush3.bf16.msra.mxu0 %v2614_v28 }
 0x23a   : > { %2462 = vmatprep.subr.bf16.mxu1 %v2615_v16  ;;  %2484 = vmatprep.subr.bf16.mxu0 %v2616_v29 }
 0x23d   : > { %2463 = vmatpush3.bf16.msra.mxu1 %v2617_v30  ;;  %2485 = vmatpush3.bf16.msra.mxu0 %v2618_v31 }
 0x23e   : > { %2464 = vmatprep.subr.bf16.mxu1 %v2619_v34  ;;  %2486 = vmatprep.subr.bf16.mxu0 %v2620_v35 }
 0x241   : > { %2465 = vmatpush3.bf16.msra.mxu1 %v2621_v37  ;;  %2487 = vmatpush3.bf16.msra.mxu0 %v2622_v38 }
 0x242   : > { %2466 = vmatprep.subr.bf16.mxu1 %v2623_v39  ;;  %2488 = vmatprep.subr.bf16.mxu0 %v2624_v41 }
 0x245   : > { %2467 = vmatpush3.bf16.msra.mxu1 %v2625_v44  ;;  %2489 = vmatpush3.bf16.msra.mxu0 %v2626_v42 }
 0x246   : > { %2468 = vmatprep.subr.bf16.mxu1 %v2627_v1  ;;  %2490 = vmatprep.subr.bf16.mxu0 %v2628_v43 }
 0x249   : > { %2469 = vmatpush3.bf16.msra.mxu1 %v2629_v19  ;;  %2491 = vmatpush3.bf16.msra.mxu0 %v2630_v46 }
 0x24a   : > { %2470 = vmatprep.subr.bf16.mxu1 %v2631_v47  ;;  %2492 = vmatprep.subr.bf16.mxu0 %v2632_v48 }
 0x24d   : > { %2471 = vmatpush3.bf16.msra.mxu1 %v2633_v49  ;;  %2493 = vmatpush3.bf16.msra.mxu0 %v2634_v50 }
 0x24e   : > { %2527 = vmatprep.subr.bf16.mxu1 %v2663_v55 }
 0x250   : > { %2077 = vmatmul.mubr.bf16.vlgmr.msra.gmra.mrb[36].mxu1 %v1575_v24  ;;  %2117 = vmatmul.mubr.bf16.vlgmr.msra.gmra.mrb[44].mxu0 %v1577_v53 }
 0x251   : > { %2528 = vmatpush3.bf16.msra.mxu1 %v2635_v54  ;;  %2531 = vmatprep.mubr.msk.bf16.mxu1 %vm2664_vm0, %v2663_v55 }
 0x252   : > { %2529 = vmatprep.subr.bf16.mxu1 %v2663_v55 }
 0x255   : > { %2530 = vmatpush3.bf16.msra.mxu1 %v2636_v13 }
 0x303   : > { %v2428_v40 = vpop.f32.mrb[32].mxu1  ;;  %v2450_v45 = vpop.f32.mrb[40].mxu0 }
 0x304   : > { %v2429_v58 = vpop.f32.mrb[33].mxu1  ;;  %v2451_v59 = vpop.f32.mrb[41].mxu0 }
 0x305   : > { %v2430_v60 = vadd.f32 %v2429_v58, %v2428_v40  ;;  %v2452_v61 = vadd.f32 %v2451_v59, %v2450_v45  ;;  %v2431_v62 = vpop.f32.mrb[34].mxu1  ;;  %v2453_v63 = vpop.f32.mrb[42].mxu0 }
 0x306   : > { %v2432_v0 = vpop.f32.mrb[35].mxu1  ;;  %v2454_v20 = vpop.f32.mrb[43].mxu0 }
 0x307   : > { %v1999_v2 = vadd.f32 %v2430_v60, %v1579_v57 }
 0x309   : > { %v2039_v3 = vadd.f32 %v2452_v61, %v1999_v2 }
 0x323   : > { %v2472_v4 = vpop.f32.mrb[36].mxu1  ;;  %v2494_v5 = vpop.f32.mrb[44].mxu0 }
 0x324   : > { %v2473_v7 = vpop.f32.mrb[37].mxu1  ;;  %v2495_v6 = vpop.f32.mrb[45].mxu0 }
 0x325   : > { %v2474_v8 = vadd.f32 %v2473_v7, %v2472_v4  ;;  %v2496_v32 = vadd.f32 %v2495_v6, %v2494_v5  ;;  %v2475_v56 = vpop.f32.mrb[38].mxu1  ;;  %v2497_v17 = vpop.f32.mrb[46].mxu0 }
 0x326   : > { %v2476_v33 = vpop.f32.mrb[39].mxu1  ;;  %v2498_v36 = vpop.f32.mrb[47].mxu0 }
 0x327   : > { %v2079_v9 = vadd.f32 %v2474_v8, %v2039_v3 }
 0x329   : > { %v2119_v18 = vadd.f32 %v2496_v32, %v2079_v9 }
 0x32b   : > { %v2124_v14 = vmax.f32 %v2119_v18, 0.0 }
 0x32d   : > { %v2129_v15 = vpack.c.bf16 %v2124_v14, %v2124_v14 }
 0x32f   : > { %2532 = vmatmul.mubr.msk.bf16.vlgmr.msra.gmra.mrb[40].mxu1 %vm2143_vm1, %v2129_v15 }
 0x402   : > { %v2181_v52 = vpop.f32.mrb[40].mxu1 }
 0x403   : > { %v2182_v10 = vadd.f32 %v2181_v52, %v2130_v26  ;;  %v2533_v11 = vpop.f32.mrb[41].mxu1 }
 0x404   : > { %v2184_v12 = vpop.f32.mrb[42].mxu1 }
 0x405   : > { %2188 = vst.msk [vmem:[%s356_s16] sm:$0x1] %vm2187_vm2, %v2182_v10  ;;  %v2534_v21 = vpop.f32.mrb[43].mxu1 }
 0x406 PF: > { %s19_s11 = sadd.s32 1, %s2659_s11   ;;  %s3398_s30 = smov %s2655_s10 }
 0x407   : > { %p16_p5 = scmp.ge.s32.totalorder %s19_s11, 4   ;;  %s3399_s10 = smov %s3401_s12 }
 0x409   :  { %18 = sbr.rel (!%p16_p5) target bundleno = 2 (0x2), region = 94 }

// kernel: _lambda_.9
= control target key start
LH: loop header
LB: loop body
LE: loop exit
PB: predicated region body
PF: predicated region fallthrough
CT: control target
= control target key end

     0   :  { %s4951_s21 = smov 0   ;;  %s4953_s22 = smov 0   ;;  %s6014_s0 = inlined_call_operand.vmem [shape: f32[2,1,32], index: 0, kind: input, shape index: {}]   ;;  %s6015_s1 = inlined_call_operand.vmem [shape: f32[2048,2], index: 1, kind: input, shape index: {}]   ;;  %s6016_s2 = inlined_call_operand.vmem [shape: bf16[32,32], index: 2, kind: input, shape index: {}]   ;;  %s6017_s3 = inlined_call_operand.vmem [shape: bf16[2,32], index: 3, kind: input, shape index: {}]   ;;  %s6018_s4 = inlined_call_operand.vmem [shape: f32[1,32], index: 4, kind: input, shape index: {}]   ;;  %s6019_s5 = inlined_call_operand.vmem [shape: bf16[32,32], index: 5, kind: input, shape index: {}]   ;;  %s6020_s6 = inlined_call_operand.vmem [shape: f32[1,32], index: 6, kind: input, shape index: {}]   ;;  %s6021_s7 = inlined_call_operand.vmem [shape: bf16[32,3], index: 7, kind: input, shape index: {}]   ;;  %s6022_s8 = inlined_call_operand.vmem [shape: f32[1,3], index: 8, kind: input, shape index: {}]   ;;  %s6023_s9 = inlined_call_operand.vmem [shape: bf16[32,32], index: 9, kind: input, shape index: {}]   ;;  %s6024_s10 = inlined_call_operand.vmem [shape: bf16[3,32], index: 10, kind: input, shape index: {}]   ;;  %s6025_s11 = inlined_call_operand.vmem [shape: f32[1,32], index: 11, kind: input, shape index: {}]   ;;  %s6026_s12 = inlined_call_operand.vmem [shape: bf16[32,32], index: 12, kind: input, shape index: {}]   ;;  %s6027_s13 = inlined_call_operand.vmem [shape: f32[1,32], index: 13, kind: input, shape index: {}]   ;;  %s6028_s14 = inlined_call_operand.vmem [shape: bf16[32,3], index: 14, kind: input, shape index: {}]   ;;  %s6029_s15 = inlined_call_operand.vmem [shape: f32[1,3], index: 15, kind: input, shape index: {}]   ;;  %s6030_s16 = inlined_call_operand.vmem [shape: f32[2,2048,3], index: 16, kind: output, shape index: {}]  }
   0x1   :  { %6031 = sst [smem:[#allocation4_spill]] %s6014_s0  ;;  %s4955_s23 = smov 0  }
   0x2   :  { %6032 = sst [smem:[#allocation5_spill]] %s6016_s2  ;;  %s4957_s24 = smov 0  }
   0x3   :  { %s4959_s25 = smov 0  }
   0x4 LB: > { %s35_s26 = sadd.s32 1, %s4853_s23  ;;  %s38_s27 = sadd.s32 1, %s4857_s24  ;;  %s4861_s25 = sphi %s4959_s25, %s26_s25   ;;  %s4857_s24 = sphi %s4957_s24, %s6042_s24   ;;  %s4853_s23 = sphi %s4955_s23, %s6041_s23   ;;  %s4849_s22 = sphi %s4953_s22, %s6040_s22   ;;  %s4845_s21 = sphi %s4951_s21, %s6039_s21  }
   0x5   : > { %p36_p0 = scmp.ge.s32.totalorder %s35_s26, 4  ;;  %p3919_p1 = scmp.ge.s32.totalorder %s4861_s25, 1 }
   0x6   : > { %p485_p2 = scmp.lt.s32.totalorder %s4861_s25, 9 }
   0x7   : > { %s6044_s26 = smov (%p36_p0, %s35_s26), 0  ;;  %s6046_s27 = smov (!%p36_p0, %s38_s27), %s4857_s24 }
   0x8   : > { %6033 = sst [smem:[#allocation2_spill]] %s6044_s26  ;;  %p486_p3 = pnand %p3919_p1, %p485_p2 }
   0x9   : > { %p40_p4 = scmp.ge.s32.totalorder %s6046_s27, 2  ;;  %s6035_s2 = sld [smem:[#allocation5_spill]] (!%p486_p3)  ;;  %v4863_v1 = vmov (!%p486_p3), 0.0   ;;  %vm4864_vm0 = vmmov (!%p486_p3), 0   ;;  %v627_v3 = vld [vmem:[%s6017_s3] sm:$0x1] (!%p486_p3) }
   0xa   : > { %489 = sbr.rel (%p486_p3) target bundleno = 1481 (0x5c9), region = 84  ;;  %4347 = vmatprep.subr.bf16.mxu1 (!%p486_p3), %v4863_v1  ;;  %4351 = vmatprep.mubr.msk.bf16.mxu1 (!%p486_p3), %vm4864_vm0, %v4863_v1  ;;  %p542_p5 = scmp.lt.s32.totalorder (!%p486_p3), %s4849_s22, 1  ;;  %vm822_vm1 = vcmask (!%p486_p3), 1040384   ;;  %vm677_vm2 = vcmask (!%p486_p3), 261120   ;;  %vm725_vm3 = vcmask (!%p486_p3), 15360   ;;  %vm2384_vm4 = vcmask (!%p486_p3), 1041408  }
   0xb   : > { %s6048_s27 = smov (%p40_p4, %s6046_s27), 0  ;;  %s3920_s17 = sshll.u32 (!%p486_p3), %s4845_s21, 6  ;;  %v824_v6 = vsel (!%p486_p3), %vm822_vm1, %v627_v3, 0  ;;  %vm2287_vm5 = vcmask (!%p486_p3), 23552  }
   0xc   : > { %6034 = sst [smem:[#allocation3_spill]] %s6048_s27  ;;  %p546_p6 = scmp.lt.s32.totalorder (!%p486_p3), %s3920_s17, 255 }
   0xd   : > { %s6036_s29 = sld [smem:[#allocation4_spill]] (!%p486_p3) }
   0xf   : > { %v4811_v0 = vld [vmem:[%s6035_s2] sm:$0xff] (!%p486_p3)   ;;  %v4812_v2 = vld [vmem:[%s6035_s2 + $0x8] sm:$0xff] (!%p486_p3)  }
  0x10   : > { %4348 = vmatpush3.bf16.msra.mxu1 (!%p486_p3), %v4811_v0 }
  0x11   : > { %4349 = vmatprep.subr.bf16.mxu1 %v4863_v1  ;;  %s6050_s22 = smov (!%p542_p5, %s4849_s22), 1  ;;  %s6052_s17 = smov (!%p546_p6, %s3920_s17), 255 }
  0x12   : > { %s3923_s0 = sshll.u32 %s6050_s22, 8  ;;  %s3921_s2 = sshll.u32 %s6052_s17, 3 }
  0x13   : > { %s544_s30 = scalar_lea.vmem %s6036_s29, %s6050_s22  ;;  %s5000_s27 = sadd.s32 %s3923_s0, %s6052_s17 }
  0x14   : > { %4350 = vmatpush3.bf16.msra.mxu1 %v4812_v2  ;;  %v562_v4 = vld [vmem:[%s544_s30] sm:$0x1]  ;;  %s5006_s18 = scalar_lea.vmem %s6015_s1, %s3921_s2  ;;  %s3924_s30 = sshll.u32 %s5000_s27, 3 }
  0x15   : > { %4767 = vmatprep.subr.msk.bf16.mxu1 %vm822_vm1, %v627_v3  ;;  %v5008_v5 = vpack.c.bf16 %v562_v4, %v562_v4  ;;  %v563_v7 = vld [vmem:[%s5006_s18] sm:$0xff]  ;;  %v564_v8 = vld [vmem:[%s5006_s18 + $0x8] sm:$0xff]  ;;  %v565_v10 = vld [vmem:[%s5006_s18 + $0x10] sm:$0xff]  ;;  %s5805_s22 = scalar_lea.vmem %s6030_s16, %s3924_s30 }
  0x16   : > { %v628_v9 = vpack.c.bf16 %v564_v8, %v563_v7  ;;  %v566_v11 = vld [vmem:[%s5006_s18 + $0x18] sm:$0xff]  ;;  %v567_v12 = vld [vmem:[%s5006_s18 + $0x20] sm:$0xff]  ;;  %v568_v13 = vld [vmem:[%s5006_s18 + $0x28] sm:$0xff] }
  0x17   : > { %4352 = vmatmul.mubr.msk.bf16.vlgmr.msra.gmra.mrb[0].mxu1 %vm677_vm2, %v5008_v5  ;;  %v629_v14 = vpack.c.bf16 %v566_v11, %v565_v10  ;;  %v630_v15 = vpack.c.bf16 %v568_v13, %v567_v12  ;;  %v569_v16 = vld [vmem:[%s5006_s18 + $0x30] sm:$0xff]  ;;  %v570_v17 = vld [vmem:[%s5006_s18 + $0x38] sm:$0xff]  ;;  %v571_v18 = vld [vmem:[%s5006_s18 + $0x40] sm:$0xff] }
  0x18   : > { %4356 = vmatpush3.bf16.msra.mxu1 %v824_v6  ;;  %4357 = vmatprep.mubr.msk.bf16.mxu1 %vm725_vm3, %v628_v9  ;;  %v572_v19 = vld [vmem:[%s5006_s18 + $0x48] sm:$0xff]  ;;  %v631_v20 = vpack.c.bf16 %v570_v17, %v569_v16  ;;  %v573_v22 = vld [vmem:[%s5006_s18 + $0x50] sm:$0xff]  ;;  %v574_v23 = vld [vmem:[%s5006_s18 + $0x58] sm:$0xff] }
  0x19   : > { %v632_v21 = vpack.c.bf16 %v572_v19, %v571_v18  ;;  %v575_v24 = vld [vmem:[%s5006_s18 + $0x60] sm:$0xff]  ;;  %v576_v25 = vld [vmem:[%s5006_s18 + $0x68] sm:$0xff]  ;;  %v633_v26 = vpack.c.bf16 %v574_v23, %v573_v22  ;;  %v577_v28 = vld [vmem:[%s5006_s18 + $0x70] sm:$0xff] }
  0x1a   : > { %v634_v27 = vpack.c.bf16 %v576_v25, %v575_v24  ;;  %v578_v29 = vld [vmem:[%s5006_s18 + $0x78] sm:$0xff]  ;;  %v579_v30 = vld [vmem:[%s5006_s18 + $0x80] sm:$0xff]  ;;  %v580_v31 = vld [vmem:[%s5006_s18 + $0x88] sm:$0xff] }
  0x1b   : > { %v635_v32 = vpack.c.bf16 %v578_v29, %v577_v28  ;;  %v636_v33 = vpack.c.bf16 %v580_v31, %v579_v30  ;;  %v581_v34 = vld [vmem:[%s5006_s18 + $0x90] sm:$0xff]  ;;  %v582_v35 = vld [vmem:[%s5006_s18 + $0x98] sm:$0xff]  ;;  %v583_v36 = vld [vmem:[%s5006_s18 + $0xa0] sm:$0xff] }
  0x1c   : > { %v584_v37 = vld [vmem:[%s5006_s18 + $0xa8] sm:$0xff]  ;;  %v637_v38 = vpack.c.bf16 %v582_v35, %v581_v34  ;;  %v585_v40 = vld [vmem:[%s5006_s18 + $0xb0] sm:$0xff]  ;;  %v586_v41 = vld [vmem:[%s5006_s18 + $0xb8] sm:$0xff] }
  0x1d   : > { %v638_v39 = vpack.c.bf16 %v584_v37, %v583_v36  ;;  %v587_v42 = vld [vmem:[%s5006_s18 + $0xc0] sm:$0xff]  ;;  %v588_v43 = vld [vmem:[%s5006_s18 + $0xc8] sm:$0xff]  ;;  %v639_v44 = vpack.c.bf16 %v586_v41, %v585_v40  ;;  %v589_v46 = vld [vmem:[%s5006_s18 + $0xd0] sm:$0xff] }
  0x1e   : > { %v640_v45 = vpack.c.bf16 %v588_v43, %v587_v42  ;;  %v590_v47 = vld [vmem:[%s5006_s18 + $0xd8] sm:$0xff]  ;;  %v591_v48 = vld [vmem:[%s5006_s18 + $0xe0] sm:$0xff]  ;;  %v592_v49 = vld [vmem:[%s5006_s18 + $0xe8] sm:$0xff] }
  0x1f   : > { %4358 = vmatmul.mubr.msk.bf16.vlgmr.msra.gmra.mrb[4].mxu1 %vm725_vm3, %v629_v14  ;;  %v641_v50 = vpack.c.bf16 %v590_v47, %v589_v46  ;;  %v642_v51 = vpack.c.bf16 %v592_v49, %v591_v48  ;;  %v593_v52 = vld [vmem:[%s5006_s18 + $0xf0] sm:$0xff]  ;;  %v594_v53 = vld [vmem:[%s5006_s18 + $0xf8] sm:$0xff]  ;;  %v595_v54 = vld [vmem:[%s5006_s18 + $0x100] sm:$0xff] }
  0x20   : > { %4361 = vmatprep.mubr.msk.bf16.mxu1 %vm725_vm3, %v630_v15  ;;  %v596_v55 = vld [vmem:[%s5006_s18 + $0x108] sm:$0xff]  ;;  %v643_v56 = vpack.c.bf16 %v594_v53, %v593_v52  ;;  %v597_v58 = vld [vmem:[%s5006_s18 + $0x110] sm:$0xff]  ;;  %v598_v59 = vld [vmem:[%s5006_s18 + $0x118] sm:$0xff] }
  0x21   : > { %v644_v57 = vpack.c.bf16 %v596_v55, %v595_v54  ;;  %v599_v60 = vld [vmem:[%s5006_s18 + $0x120] sm:$0xff]  ;;  %v600_v61 = vld [vmem:[%s5006_s18 + $0x128] sm:$0xff]  ;;  %v645_v62 = vpack.c.bf16 %v598_v59, %v597_v58  ;;  %v601_v0 = vld [vmem:[%s5006_s18 + $0x130] sm:$0xff] }
  0x22   : > { %v646_v63 = vpack.c.bf16 %v600_v61, %v599_v60  ;;  %v602_v2 = vld [vmem:[%s5006_s18 + $0x138] sm:$0xff]  ;;  %v603_v3 = vld [vmem:[%s5006_s18 + $0x140] sm:$0xff]  ;;  %v604_v4 = vld [vmem:[%s5006_s18 + $0x148] sm:$0xff] }
  0x23   : > { %v647_v6 = vpack.c.bf16 %v602_v2, %v601_v0  ;;  %v648_v7 = vpack.c.bf16 %v604_v4, %v603_v3  ;;  %v605_v8 = vld [vmem:[%s5006_s18 + $0x150] sm:$0xff]  ;;  %v606_v9 = vld [vmem:[%s5006_s18 + $0x158] sm:$0xff]  ;;  %v607_v10 = vld [vmem:[%s5006_s18 + $0x160] sm:$0xff] }
  0x24   : > { %v608_v11 = vld [vmem:[%s5006_s18 + $0x168] sm:$0xff]  ;;  %v649_v12 = vpack.c.bf16 %v606_v9, %v605_v8  ;;  %v609_v14 = vld [vmem:[%s5006_s18 + $0x170] sm:$0xff]  ;;  %v610_v15 = vld [vmem:[%s5006_s18 + $0x178] sm:$0xff] }
  0x25   : > { %v650_v13 = vpack.c.bf16 %v608_v11, %v607_v10  ;;  %v611_v16 = vld [vmem:[%s5006_s18 + $0x180] sm:$0xff]  ;;  %v612_v17 = vld [vmem:[%s5006_s18 + $0x188] sm:$0xff]  ;;  %v651_v18 = vpack.c.bf16 %v610_v15, %v609_v14  ;;  %v614_v22 = vld [vmem:[%s5006_s18 + $0x198] sm:$0xff] }
  0x26   : > { %v652_v19 = vpack.c.bf16 %v612_v17, %v611_v16  ;;  %v615_v23 = vld [vmem:[%s5006_s18 + $0x1a0] sm:$0xff]  ;;  %v616_v24 = vld [vmem:[%s5006_s18 + $0x1a8] sm:$0xff]  ;;  %v617_v28 = vld [vmem:[%s5006_s18 + $0x1b0] sm:$0xff] }
  0x27   : > { %4362 = vmatmul.mubr.msk.bf16.gmra.mrb[8].mxu1 %vm725_vm3, %v631_v20  ;;  %v4813_v20 = vld [vmem:[%s6019_s5] sm:$0xff]   ;;  %v4814_v25 = vld [vmem:[%s6019_s5 + $0x8] sm:$0xff]   ;;  %v618_v29 = vld [vmem:[%s5006_s18 + $0x1b8] sm:$0xff] }
  0x28   : > { %4365 = vmatprep.mubr.msk.bf16.mxu1 %vm725_vm3, %v632_v21  ;;  %4421 = vmatprep.subr.bf16.mxu0 %v4813_v20  ;;  %v613_v21 = vld [vmem:[%s5006_s18 + $0x190] sm:$0xff]  ;;  %v619_v30 = vld [vmem:[%s5006_s18 + $0x1c0] sm:$0xff]  ;;  %v620_v31 = vld [vmem:[%s5006_s18 + $0x1c8] sm:$0xff] }
  0x29   : > { %4422 = vmatpush3.bf16.msra.mxu0 %v4813_v20  ;;  %v621_v34 = vld [vmem:[%s5006_s18 + $0x1d0] sm:$0xff]  ;;  %v622_v35 = vld [vmem:[%s5006_s18 + $0x1d8] sm:$0xff]  ;;  %v623_v36 = vld [vmem:[%s5006_s18 + $0x1e0] sm:$0xff] }
  0x2a   : > { %4423 = vmatprep.subr.bf16.mxu0 %v4814_v25  ;;  %v624_v37 = vld [vmem:[%s5006_s18 + $0x1e8] sm:$0xff]  ;;  %v625_v40 = vld [vmem:[%s5006_s18 + $0x1f0] sm:$0xff]  ;;  %v626_v41 = vld [vmem:[%s5006_s18 + $0x1f8] sm:$0xff] }
  0x2b   : > { %v659_v42 = vpack.c.bf16 %v626_v41, %v625_v40  ;;  %v4815_v43 = vld [vmem:[%s6021_s7] sm:$0xff]   ;;  %v4816_v0 = vld [vmem:[%s6021_s7 + $0x8] sm:$0xff]  }
  0x2c   : > { %4489 = vmatprep.subr.bf16.mxu1 %v4815_v43  ;;  %v5129_v53 = vld [vmem:[%s6018_s4] ss:$0 sm:$0xff] }
  0x2d   : > { %4424 = vmatpush3.bf16.msra.mxu0 %v4814_v25  ;;  %4490 = vmatpush3.bf16.msra.mxu1 %v4815_v43 }
  0x2e   : > { %4557 = vmatprep.subr.bf16.mxu0 %v4863_v1  ;;  %4491 = vmatprep.subr.bf16.mxu1 %v4816_v0 }
  0x2f   : > { %4366 = vmatmul.mubr.msk.bf16.gmra.mrb[12].mxu1 %vm725_vm3, %v633_v26  ;;  %v653_v26 = vpack.c.bf16 %v614_v22, %v613_v21 }
  0x30   : > { %4369 = vmatprep.mubr.msk.bf16.mxu1 %vm725_vm3, %v634_v27  ;;  %v654_v27 = vpack.c.bf16 %v616_v24, %v615_v23 }
  0x31   : > { %4492 = vmatpush3.bf16.msra.mxu1 %v4816_v0 }
  0x37   : > { %4370 = vmatmul.mubr.msk.bf16.gmra.mrb[16].mxu1 %vm725_vm3, %v635_v32  ;;  %v655_v32 = vpack.c.bf16 %v618_v29, %v617_v28 }
  0x38   : > { %4373 = vmatprep.mubr.msk.bf16.mxu1 %vm725_vm3, %v636_v33  ;;  %v656_v33 = vpack.c.bf16 %v620_v31, %v619_v30 }
  0x3f   : > { %4374 = vmatmul.mubr.msk.bf16.gmra.mrb[20].mxu1 %vm725_vm3, %v637_v38  ;;  %v657_v38 = vpack.c.bf16 %v622_v35, %v621_v34 }
  0x40   : > { %4377 = vmatprep.mubr.msk.bf16.mxu1 %vm725_vm3, %v638_v39  ;;  %v658_v39 = vpack.c.bf16 %v624_v37, %v623_v36 }
  0x47   : > { %4378 = vmatmul.mubr.msk.bf16.gmra.mrb[24].mxu1 %vm725_vm3, %v639_v44  ;;  %v721_v44 = vlaneseq }
  0x48   : > { %4381 = vmatprep.mubr.msk.bf16.mxu1 %vm725_vm3, %v640_v45 }
  0x49   : > { %v5119_v45 = vshrl.u32 %v721_v44, 7 }
  0x4b   : > { %v723_v49 = vsub.s32 0, %v5119_v45 }
  0x4f   : > { %4382 = vmatmul.mubr.msk.bf16.gmra.mrb[28].mxu1 %vm725_vm3, %v641_v50 }
  0x50   : > { %4385 = vmatprep.mubr.msk.bf16.mxu1 %vm725_vm3, %v642_v51 }
  0x57   : > { %4386 = vmatmul.mubr.msk.bf16.gmra.mrb[32].mxu1 %vm725_vm3, %v643_v56 }
  0x58   : > { %4389 = vmatprep.mubr.msk.bf16.mxu1 %vm725_vm3, %v644_v57 }
  0x5f   : > { %4390 = vmatmul.mubr.msk.bf16.gmra.mrb[36].mxu1 %vm725_vm3, %v645_v62 }
  0x60   : > { %4393 = vmatprep.mubr.msk.bf16.mxu1 %vm725_vm3, %v646_v63 }
  0x67   : > { %4394 = vmatmul.mubr.msk.bf16.gmra.mrb[40].mxu1 %vm725_vm3, %v647_v6 }
  0x68   : > { %4397 = vmatprep.mubr.msk.bf16.mxu1 %vm725_vm3, %v648_v7 }
  0x6f   : > { %4398 = vmatmul.mubr.msk.bf16.gmra.mrb[44].mxu1 %vm725_vm3, %v649_v12 }
  0x70   : > { %4401 = vmatprep.mubr.msk.bf16.mxu1 %vm725_vm3, %v650_v13 }
  0x77   : > { %4402 = vmatmul.mubr.msk.bf16.gmra.mrb[48].mxu1 %vm725_vm3, %v651_v18 }
  0x78   : > { %4405 = vmatprep.mubr.msk.bf16.mxu1 %vm725_vm3, %v652_v19 }
  0x7f   : > { %4406 = vmatmul.mubr.msk.bf16.gmra.mrb[52].mxu1 %vm725_vm3, %v653_v26 }
  0x80   : > { %4409 = vmatprep.mubr.msk.bf16.mxu1 %vm725_vm3, %v654_v27 }
  0x87   : > { %4410 = vmatmul.mubr.msk.bf16.gmra.mrb[56].mxu1 %vm725_vm3, %v655_v32 }
  0x88   : > { %4413 = vmatprep.mubr.msk.bf16.mxu1 %vm725_vm3, %v656_v33 }
  0x8f   : > { %4414 = vmatmul.mubr.msk.bf16.gmra.mrb[60].mxu1 %vm725_vm3, %v657_v38 }
  0x90   : > { %4417 = vmatprep.mubr.msk.bf16.mxu1 %vm725_vm3, %v658_v39 }
  0x97   : > { %4418 = vmatmul.mubr.msk.bf16.gmra.mrb[64].mxu1 %vm725_vm3, %v659_v42 }
  0xea   : > { %v715_v46 = vpop.f32.mrb[0].mxu1 }
  0xeb   : > { %v4353_v47 = vpop.f32.mrb[1].mxu1  ;;  %v5124_v51 = vrot.slane %v715_v46, %v723_v49 }
  0xec   : > { %v718_v48 = vpop.f32.mrb[2].mxu1 }
  0xed   : > { %v4354_v50 = vpop.f32.mrb[3].mxu1 }
  0xf2   : > { %v4359_v52 = vpop.f32.mrb[4].mxu1 }
  0xf3   : > { %v869_v54 = vadd.f32 %v4359_v52, %v5124_v51  ;;  %v860_v55 = vpop.f32.mrb[5].mxu1 }
  0xf4   : > { %v861_v56 = vadd.f32 %v860_v55, %v5124_v51  ;;  %v4360_v57 = vpop.f32.mrb[6].mxu1 }
  0xf5   : > { %v1124_v58 = vadd.f32 %v5129_v53, %v869_v54  ;;  %v872_v59 = vadd.f32 %v4360_v57, %v5124_v51  ;;  %v863_v60 = vpop.f32.mrb[7].mxu1 }
  0xf6   : > { %v1122_v61 = vadd.f32 %v5129_v53, %v861_v56  ;;  %v864_v62 = vadd.f32 %v863_v60, %v5124_v51 }
  0xf7   : > { %v1125_v63 = vadd.f32 %v5129_v53, %v872_v59  ;;  %v1188_v3 = vmax.f32 %v1124_v58, 0.0 }
  0xf8   : > { %v1123_v2 = vadd.f32 %v5129_v53, %v864_v62  ;;  %v1186_v6 = vmax.f32 %v1122_v61, 0.0 }
  0xf9   : > { %v1189_v4 = vmax.f32 %v1125_v63, 0.0 }
  0xfa   : > { %v1187_v7 = vmax.f32 %v1123_v2, 0.0  ;;  %v4363_v8 = vpop.f32.mrb[8].mxu1 }
  0xfb   : > { %v1255_v9 = vpack.c.bf16 %v1189_v4, %v1188_v3  ;;  %v885_v10 = vadd.f32 %v4363_v8, %v5124_v51  ;;  %v876_v11 = vpop.f32.mrb[9].mxu1 }
  0xfc   : > { %v877_v12 = vadd.f32 %v876_v11, %v5124_v51  ;;  %v4364_v13 = vpop.f32.mrb[10].mxu1  ;;  %v1254_v14 = vpack.c.bf16 %v1187_v7, %v1186_v6 }
  0xfd   : > { %v1128_v15 = vadd.f32 %v5129_v53, %v885_v10  ;;  %v888_v16 = vadd.f32 %v4364_v13, %v5124_v51  ;;  %v879_v17 = vpop.f32.mrb[11].mxu1 }
  0xfe   : > { %v1126_v18 = vadd.f32 %v5129_v53, %v877_v12  ;;  %v880_v19 = vadd.f32 %v879_v17, %v5124_v51  ;;  %4425 = vmatprep.mubr.msk.bf16.mxu0 %vm677_vm2, %v1254_v14 }
  0xff   : > { %v1129_v20 = vadd.f32 %v5129_v53, %v888_v16  ;;  %4426 = vmatmul.mubr.msk.bf16.vlgmr.msra.gmra.mrb[0].mxu0 %vm677_vm2, %v1255_v9  ;;  %v1192_v22 = vmax.f32 %v1128_v15, 0.0 }
 0x100   : > { %v1127_v21 = vadd.f32 %v5129_v53, %v880_v19  ;;  %v1190_v24 = vmax.f32 %v1126_v18, 0.0 }
 0x101   : > { %v1193_v23 = vmax.f32 %v1129_v20, 0.0 }
 0x102   : > { %v1191_v25 = vmax.f32 %v1127_v21, 0.0  ;;  %v4367_v26 = vpop.f32.mrb[12].mxu1 }
 0x103   : > { %v1257_v27 = vpack.c.bf16 %v1193_v23, %v1192_v22  ;;  %v901_v28 = vadd.f32 %v4367_v26, %v5124_v51  ;;  %v892_v29 = vpop.f32.mrb[13].mxu1 }
 0x104   : > { %v1256_v30 = vpack.c.bf16 %v1191_v25, %v1190_v24  ;;  %v893_v31 = vadd.f32 %v892_v29, %v5124_v51  ;;  %v4368_v32 = vpop.f32.mrb[14].mxu1 }
 0x105   : > { %v1132_v33 = vadd.f32 %v5129_v53, %v901_v28  ;;  %v904_v34 = vadd.f32 %v4368_v32, %v5124_v51  ;;  %v895_v35 = vpop.f32.mrb[15].mxu1 }
 0x106   : > { %v1130_v36 = vadd.f32 %v5129_v53, %v893_v31  ;;  %v896_v37 = vadd.f32 %v895_v35, %v5124_v51  ;;  %4429 = vmatprep.mubr.msk.bf16.mxu0 %vm677_vm2, %v1256_v30 }
 0x107   : > { %v1133_v38 = vadd.f32 %v5129_v53, %v904_v34  ;;  %4430 = vmatmul.mubr.msk.bf16.gmra.mrb[4].mxu0 %vm677_vm2, %v1257_v27  ;;  %v1196_v40 = vmax.f32 %v1132_v33, 0.0 }
 0x108   : > { %v1131_v39 = vadd.f32 %v5129_v53, %v896_v37  ;;  %v1194_v42 = vmax.f32 %v1130_v36, 0.0 }
 0x109   : > { %v1197_v41 = vmax.f32 %v1133_v38, 0.0 }
 0x10a   : > { %v1195_v43 = vmax.f32 %v1131_v39, 0.0  ;;  %v4371_v44 = vpop.f32.mrb[16].mxu1 }
 0x10b   : > { %v1259_v46 = vpack.c.bf16 %v1197_v41, %v1196_v40  ;;  %v917_v47 = vadd.f32 %v4371_v44, %v5124_v51  ;;  %v908_v48 = vpop.f32.mrb[17].mxu1 }
 0x10c   : > { %v1258_v50 = vpack.c.bf16 %v1195_v43, %v1194_v42  ;;  %v909_v52 = vadd.f32 %v908_v48, %v5124_v51  ;;  %v4372_v54 = vpop.f32.mrb[18].mxu1 }
 0x10d   : > { %v1136_v55 = vadd.f32 %v5129_v53, %v917_v47  ;;  %v920_v56 = vadd.f32 %v4372_v54, %v5124_v51  ;;  %v911_v57 = vpop.f32.mrb[19].mxu1 }
 0x10e   : > { %v1134_v58 = vadd.f32 %v5129_v53, %v909_v52  ;;  %v912_v59 = vadd.f32 %v911_v57, %v5124_v51  ;;  %4433 = vmatprep.mubr.msk.bf16.mxu0 %vm677_vm2, %v1258_v50 }
 0x10f   : > { %v1137_v60 = vadd.f32 %v5129_v53, %v920_v56  ;;  %4434 = vmatmul.mubr.msk.bf16.gmra.mrb[8].mxu0 %vm677_vm2, %v1259_v46  ;;  %v1200_v62 = vmax.f32 %v1136_v55, 0.0 }
 0x110   : > { %v1135_v61 = vadd.f32 %v5129_v53, %v912_v59  ;;  %v1198_v0 = vmax.f32 %v1134_v58, 0.0 }
 0x111   : > { %v1201_v63 = vmax.f32 %v1137_v60, 0.0 }
 0x112   : > { %v1199_v2 = vmax.f32 %v1135_v61, 0.0  ;;  %v4375_v3 = vpop.f32.mrb[20].mxu1 }
 0x113   : > { %v1261_v4 = vpack.c.bf16 %v1201_v63, %v1200_v62  ;;  %v933_v6 = vadd.f32 %v4375_v3, %v5124_v51  ;;  %v924_v7 = vpop.f32.mrb[21].mxu1 }
 0x114   : > { %v1260_v8 = vpack.c.bf16 %v1199_v2, %v1198_v0  ;;  %v925_v9 = vadd.f32 %v924_v7, %v5124_v51  ;;  %v4376_v10 = vpop.f32.mrb[22].mxu1 }
 0x115   : > { %v1140_v11 = vadd.f32 %v5129_v53, %v933_v6  ;;  %v936_v12 = vadd.f32 %v4376_v10, %v5124_v51  ;;  %v927_v13 = vpop.f32.mrb[23].mxu1 }
 0x116   : > { %v1138_v14 = vadd.f32 %v5129_v53, %v925_v9  ;;  %v928_v15 = vadd.f32 %v927_v13, %v5124_v51  ;;  %4437 = vmatprep.mubr.msk.bf16.mxu0 %vm677_vm2, %v1260_v8 }
 0x117   : > { %v1141_v16 = vadd.f32 %v5129_v53, %v936_v12  ;;  %4438 = vmatmul.mubr.msk.bf16.gmra.mrb[12].mxu0 %vm677_vm2, %v1261_v4  ;;  %v1204_v18 = vmax.f32 %v1140_v11, 0.0 }
 0x118   : > { %v1139_v17 = vadd.f32 %v5129_v53, %v928_v15  ;;  %v1202_v20 = vmax.f32 %v1138_v14, 0.0 }
 0x119   : > { %v1205_v19 = vmax.f32 %v1141_v16, 0.0 }
 0x11a   : > { %v1203_v21 = vmax.f32 %v1139_v17, 0.0  ;;  %v4379_v22 = vpop.f32.mrb[24].mxu1 }
 0x11b   : > { %v1263_v23 = vpack.c.bf16 %v1205_v19, %v1204_v18  ;;  %v949_v24 = vadd.f32 %v4379_v22, %v5124_v51  ;;  %v940_v25 = vpop.f32.mrb[25].mxu1 }
 0x11c   : > { %v1262_v26 = vpack.c.bf16 %v1203_v21, %v1202_v20  ;;  %v941_v27 = vadd.f32 %v940_v25, %v5124_v51  ;;  %v4380_v28 = vpop.f32.mrb[26].mxu1 }
 0x11d   : > { %v1144_v29 = vadd.f32 %v5129_v53, %v949_v24  ;;  %v952_v30 = vadd.f32 %v4380_v28, %v5124_v51  ;;  %v943_v31 = vpop.f32.mrb[27].mxu1 }
 0x11e   : > { %v1142_v32 = vadd.f32 %v5129_v53, %v941_v27  ;;  %v944_v33 = vadd.f32 %v943_v31, %v5124_v51  ;;  %4441 = vmatprep.mubr.msk.bf16.mxu0 %vm677_vm2, %v1262_v26 }
 0x11f   : > { %v1145_v34 = vadd.f32 %v5129_v53, %v952_v30  ;;  %4442 = vmatmul.mubr.msk.bf16.gmra.mrb[16].mxu0 %vm677_vm2, %v1263_v23  ;;  %v1208_v36 = vmax.f32 %v1144_v29, 0.0 }
 0x120   : > { %v1143_v35 = vadd.f32 %v5129_v53, %v944_v33  ;;  %v1206_v38 = vmax.f32 %v1142_v32, 0.0 }
 0x121   : > { %v1209_v37 = vmax.f32 %v1145_v34, 0.0 }
 0x122   : > { %v1207_v39 = vmax.f32 %v1143_v35, 0.0  ;;  %v4383_v40 = vpop.f32.mrb[28].mxu1 }
 0x123   : > { %v1265_v41 = vpack.c.bf16 %v1209_v37, %v1208_v36  ;;  %v965_v42 = vadd.f32 %v4383_v40, %v5124_v51  ;;  %v956_v43 = vpop.f32.mrb[29].mxu1 }
 0x124   : > { %v1264_v44 = vpack.c.bf16 %v1207_v39, %v1206_v38  ;;  %v957_v46 = vadd.f32 %v956_v43, %v5124_v51  ;;  %v4384_v47 = vpop.f32.mrb[30].mxu1 }
 0x125   : > { %v1148_v48 = vadd.f32 %v5129_v53, %v965_v42  ;;  %v968_v50 = vadd.f32 %v4384_v47, %v5124_v51  ;;  %v959_v52 = vpop.f32.mrb[31].mxu1 }
 0x126   : > { %v1146_v54 = vadd.f32 %v5129_v53, %v957_v46  ;;  %v960_v55 = vadd.f32 %v959_v52, %v5124_v51  ;;  %4445 = vmatprep.mubr.msk.bf16.mxu0 %vm677_vm2, %v1264_v44 }
 0x127   : > { %v1149_v56 = vadd.f32 %v5129_v53, %v968_v50  ;;  %4446 = vmatmul.mubr.msk.bf16.gmra.mrb[20].mxu0 %vm677_vm2, %v1265_v41  ;;  %v1212_v58 = vmax.f32 %v1148_v48, 0.0 }
 0x128   : > { %v1147_v57 = vadd.f32 %v5129_v53, %v960_v55  ;;  %v1210_v60 = vmax.f32 %v1146_v54, 0.0 }
 0x129   : > { %v1213_v59 = vmax.f32 %v1149_v56, 0.0 }
 0x12a   : > { %v1211_v61 = vmax.f32 %v1147_v57, 0.0  ;;  %v4387_v62 = vpop.f32.mrb[32].mxu1 }
 0x12b   : > { %v1267_v63 = vpack.c.bf16 %v1213_v59, %v1212_v58  ;;  %v981_v0 = vadd.f32 %v4387_v62, %v5124_v51  ;;  %v972_v2 = vpop.f32.mrb[33].mxu1 }
 0x12c   : > { %v1266_v3 = vpack.c.bf16 %v1211_v61, %v1210_v60  ;;  %v973_v4 = vadd.f32 %v972_v2, %v5124_v51  ;;  %v4388_v6 = vpop.f32.mrb[34].mxu1 }
 0x12d   : > { %v1152_v7 = vadd.f32 %v5129_v53, %v981_v0  ;;  %v984_v8 = vadd.f32 %v4388_v6, %v5124_v51  ;;  %v975_v9 = vpop.f32.mrb[35].mxu1 }
 0x12e   : > { %v1150_v10 = vadd.f32 %v5129_v53, %v973_v4  ;;  %v976_v11 = vadd.f32 %v975_v9, %v5124_v51  ;;  %4449 = vmatprep.mubr.msk.bf16.mxu0 %vm677_vm2, %v1266_v3 }
 0x12f   : > { %v1153_v12 = vadd.f32 %v5129_v53, %v984_v8  ;;  %4450 = vmatmul.mubr.msk.bf16.gmra.mrb[24].mxu0 %vm677_vm2, %v1267_v63  ;;  %v1216_v14 = vmax.f32 %v1152_v7, 0.0 }
 0x130   : > { %v1151_v13 = vadd.f32 %v5129_v53, %v976_v11  ;;  %v1214_v16 = vmax.f32 %v1150_v10, 0.0 }
 0x131   : > { %v1217_v15 = vmax.f32 %v1153_v12, 0.0 }
 0x132   : > { %v1215_v17 = vmax.f32 %v1151_v13, 0.0  ;;  %v4391_v18 = vpop.f32.mrb[36].mxu1 }
 0x133   : > { %v1269_v19 = vpack.c.bf16 %v1217_v15, %v1216_v14  ;;  %v997_v20 = vadd.f32 %v4391_v18, %v5124_v51  ;;  %v988_v21 = vpop.f32.mrb[37].mxu1 }
 0x134   : > { %v1268_v22 = vpack.c.bf16 %v1215_v17, %v1214_v16  ;;  %v989_v23 = vadd.f32 %v988_v21, %v5124_v51  ;;  %v4392_v24 = vpop.f32.mrb[38].mxu1 }
 0x135   : > { %v1156_v25 = vadd.f32 %v5129_v53, %v997_v20  ;;  %v1000_v26 = vadd.f32 %v4392_v24, %v5124_v51  ;;  %v991_v27 = vpop.f32.mrb[39].mxu1 }
 0x136   : > { %v1154_v28 = vadd.f32 %v5129_v53, %v989_v23  ;;  %v992_v29 = vadd.f32 %v991_v27, %v5124_v51  ;;  %4453 = vmatprep.mubr.msk.bf16.mxu0 %vm677_vm2, %v1268_v22 }
 0x137   : > { %v1157_v30 = vadd.f32 %v5129_v53, %v1000_v26  ;;  %4454 = vmatmul.mubr.msk.bf16.gmra.mrb[28].mxu0 %vm677_vm2, %v1269_v19  ;;  %v1220_v32 = vmax.f32 %v1156_v25, 0.0 }
 0x138   : > { %v1155_v31 = vadd.f32 %v5129_v53, %v992_v29  ;;  %v1218_v34 = vmax.f32 %v1154_v28, 0.0 }
 0x139   : > { %v1221_v33 = vmax.f32 %v1157_v30, 0.0 }
 0x13a   : > { %v1219_v35 = vmax.f32 %v1155_v31, 0.0  ;;  %v4395_v36 = vpop.f32.mrb[40].mxu1 }
 0x13b   : > { %v1271_v37 = vpack.c.bf16 %v1221_v33, %v1220_v32  ;;  %v1013_v38 = vadd.f32 %v4395_v36, %v5124_v51  ;;  %v1004_v39 = vpop.f32.mrb[41].mxu1 }
 0x13c   : > { %v1270_v40 = vpack.c.bf16 %v1219_v35, %v1218_v34  ;;  %v1005_v41 = vadd.f32 %v1004_v39, %v5124_v51  ;;  %v4396_v42 = vpop.f32.mrb[42].mxu1 }
 0x13d   : > { %v1160_v43 = vadd.f32 %v5129_v53, %v1013_v38  ;;  %v1016_v44 = vadd.f32 %v4396_v42, %v5124_v51  ;;  %v1007_v46 = vpop.f32.mrb[43].mxu1 }
 0x13e   : > { %v1158_v47 = vadd.f32 %v5129_v53, %v1005_v41  ;;  %v1008_v48 = vadd.f32 %v1007_v46, %v5124_v51  ;;  %4457 = vmatprep.mubr.msk.bf16.mxu0 %vm677_vm2, %v1270_v40 }
 0x13f   : > { %v1161_v50 = vadd.f32 %v5129_v53, %v1016_v44  ;;  %4458 = vmatmul.mubr.msk.bf16.gmra.mrb[32].mxu0 %vm677_vm2, %v1271_v37  ;;  %v1224_v54 = vmax.f32 %v1160_v43, 0.0 }
 0x140   : > { %v1159_v52 = vadd.f32 %v5129_v53, %v1008_v48  ;;  %v1222_v56 = vmax.f32 %v1158_v47, 0.0 }
 0x141   : > { %v1225_v55 = vmax.f32 %v1161_v50, 0.0 }
 0x142   : > { %v1223_v57 = vmax.f32 %v1159_v52, 0.0  ;;  %v4399_v58 = vpop.f32.mrb[44].mxu1 }
 0x143   : > { %v1273_v59 = vpack.c.bf16 %v1225_v55, %v1224_v54  ;;  %v1029_v60 = vadd.f32 %v4399_v58, %v5124_v51  ;;  %v1020_v61 = vpop.f32.mrb[45].mxu1 }
 0x144   : > { %v1272_v62 = vpack.c.bf16 %v1223_v57, %v1222_v56  ;;  %v1021_v63 = vadd.f32 %v1020_v61, %v5124_v51  ;;  %v4400_v0 = vpop.f32.mrb[46].mxu1 }
 0x145   : > { %v1164_v2 = vadd.f32 %v5129_v53, %v1029_v60  ;;  %v1032_v3 = vadd.f32 %v4400_v0, %v5124_v51  ;;  %v1023_v4 = vpop.f32.mrb[47].mxu1 }
 0x146   : > { %v1162_v6 = vadd.f32 %v5129_v53, %v1021_v63  ;;  %v1024_v7 = vadd.f32 %v1023_v4, %v5124_v51  ;;  %4461 = vmatprep.mubr.msk.bf16.mxu0 %vm677_vm2, %v1272_v62 }
 0x147   : > { %v1165_v8 = vadd.f32 %v5129_v53, %v1032_v3  ;;  %4462 = vmatmul.mubr.msk.bf16.gmra.mrb[36].mxu0 %vm677_vm2, %v1273_v59  ;;  %v1228_v10 = vmax.f32 %v1164_v2, 0.0 }
 0x148   : > { %v1163_v9 = vadd.f32 %v5129_v53, %v1024_v7  ;;  %v1226_v12 = vmax.f32 %v1162_v6, 0.0 }
 0x149   : > { %v1229_v11 = vmax.f32 %v1165_v8, 0.0 }
 0x14a   : > { %v1227_v13 = vmax.f32 %v1163_v9, 0.0  ;;  %v4403_v14 = vpop.f32.mrb[48].mxu1 }
 0x14b   : > { %v1275_v15 = vpack.c.bf16 %v1229_v11, %v1228_v10  ;;  %v1045_v16 = vadd.f32 %v4403_v14, %v5124_v51  ;;  %v1036_v17 = vpop.f32.mrb[49].mxu1 }
 0x14c   : > { %v1274_v18 = vpack.c.bf16 %v1227_v13, %v1226_v12  ;;  %v1037_v19 = vadd.f32 %v1036_v17, %v5124_v51  ;;  %v4404_v20 = vpop.f32.mrb[50].mxu1 }
 0x14d   : > { %v1168_v21 = vadd.f32 %v5129_v53, %v1045_v16  ;;  %v1048_v22 = vadd.f32 %v4404_v20, %v5124_v51  ;;  %v1039_v23 = vpop.f32.mrb[51].mxu1 }
 0x14e   : > { %v1166_v24 = vadd.f32 %v5129_v53, %v1037_v19  ;;  %v1040_v25 = vadd.f32 %v1039_v23, %v5124_v51  ;;  %4465 = vmatprep.mubr.msk.bf16.mxu0 %vm677_vm2, %v1274_v18 }
 0x14f   : > { %v1169_v26 = vadd.f32 %v5129_v53, %v1048_v22  ;;  %4466 = vmatmul.mubr.msk.bf16.gmra.mrb[40].mxu0 %vm677_vm2, %v1275_v15  ;;  %v1232_v28 = vmax.f32 %v1168_v21, 0.0 }
 0x150   : > { %v1167_v27 = vadd.f32 %v5129_v53, %v1040_v25  ;;  %v1230_v30 = vmax.f32 %v1166_v24, 0.0 }
 0x151   : > { %v1233_v29 = vmax.f32 %v1169_v26, 0.0 }
 0x152   : > { %v1231_v31 = vmax.f32 %v1167_v27, 0.0  ;;  %v4407_v32 = vpop.f32.mrb[52].mxu1 }
 0x153   : > { %v1277_v33 = vpack.c.bf16 %v1233_v29, %v1232_v28  ;;  %v1061_v34 = vadd.f32 %v4407_v32, %v5124_v51  ;;  %v1052_v35 = vpop.f32.mrb[53].mxu1 }
 0x154   : > { %v1276_v36 = vpack.c.bf16 %v1231_v31, %v1230_v30  ;;  %v1053_v37 = vadd.f32 %v1052_v35, %v5124_v51  ;;  %v4408_v38 = vpop.f32.mrb[54].mxu1 }
 0x155   : > { %v1172_v39 = vadd.f32 %v5129_v53, %v1061_v34  ;;  %v1064_v40 = vadd.f32 %v4408_v38, %v5124_v51  ;;  %v1055_v41 = vpop.f32.mrb[55].mxu1 }
 0x156   : > { %v1170_v42 = vadd.f32 %v5129_v53, %v1053_v37  ;;  %v1056_v43 = vadd.f32 %v1055_v41, %v5124_v51  ;;  %4469 = vmatprep.mubr.msk.bf16.mxu0 %vm677_vm2, %v1276_v36 }
 0x157   : > { %v1173_v44 = vadd.f32 %v5129_v53, %v1064_v40  ;;  %4470 = vmatmul.mubr.msk.bf16.gmra.mrb[44].mxu0 %vm677_vm2, %v1277_v33  ;;  %v1236_v47 = vmax.f32 %v1172_v39, 0.0 }
 0x158   : > { %v1171_v46 = vadd.f32 %v5129_v53, %v1056_v43  ;;  %v1234_v50 = vmax.f32 %v1170_v42, 0.0 }
 0x159   : > { %v1237_v48 = vmax.f32 %v1173_v44, 0.0 }
 0x15a   : > { %v1235_v52 = vmax.f32 %v1171_v46, 0.0  ;;  %v4411_v54 = vpop.f32.mrb[56].mxu1 }
 0x15b   : > { %v1279_v55 = vpack.c.bf16 %v1237_v48, %v1236_v47  ;;  %v1077_v56 = vadd.f32 %v4411_v54, %v5124_v51  ;;  %v1068_v57 = vpop.f32.mrb[57].mxu1 }
 0x15c   : > { %v1278_v58 = vpack.c.bf16 %v1235_v52, %v1234_v50  ;;  %v1069_v59 = vadd.f32 %v1068_v57, %v5124_v51  ;;  %v4412_v60 = vpop.f32.mrb[58].mxu1 }
 0x15d   : > { %v1176_v61 = vadd.f32 %v5129_v53, %v1077_v56  ;;  %v1080_v62 = vadd.f32 %v4412_v60, %v5124_v51  ;;  %v1071_v63 = vpop.f32.mrb[59].mxu1 }
 0x15e   : > { %v1174_v0 = vadd.f32 %v5129_v53, %v1069_v59  ;;  %v1072_v2 = vadd.f32 %v1071_v63, %v5124_v51  ;;  %4473 = vmatprep.mubr.msk.bf16.mxu0 %vm677_vm2, %v1278_v58  ;;  %v4818_v59 = vld [vmem:[%s6023_s9 + $0x8] sm:$0xff]  }
 0x15f   : > { %v1177_v3 = vadd.f32 %v5129_v53, %v1080_v62  ;;  %4474 = vmatmul.mubr.msk.bf16.gmra.mrb[48].mxu0 %vm677_vm2, %v1279_v55  ;;  %v1240_v6 = vmax.f32 %v1176_v61, 0.0 }
 0x160   : > { %v1175_v4 = vadd.f32 %v5129_v53, %v1072_v2  ;;  %v1238_v8 = vmax.f32 %v1174_v0, 0.0 }
 0x161   : > { %v1241_v7 = vmax.f32 %v1177_v3, 0.0 }
 0x162   : > { %v1239_v9 = vmax.f32 %v1175_v4, 0.0  ;;  %v4415_v10 = vpop.f32.mrb[60].mxu1 }
 0x163   : > { %v1281_v11 = vpack.c.bf16 %v1241_v7, %v1240_v6  ;;  %v1093_v12 = vadd.f32 %v4415_v10, %v5124_v51  ;;  %v1084_v13 = vpop.f32.mrb[61].mxu1 }
 0x164   : > { %v1280_v14 = vpack.c.bf16 %v1239_v9, %v1238_v8  ;;  %v1085_v15 = vadd.f32 %v1084_v13, %v5124_v51  ;;  %v4416_v16 = vpop.f32.mrb[62].mxu1 }
 0x165   : > { %v1180_v17 = vadd.f32 %v5129_v53, %v1093_v12  ;;  %v1096_v18 = vadd.f32 %v4416_v16, %v5124_v51  ;;  %v1087_v19 = vpop.f32.mrb[63].mxu1 }
 0x166   : > { %v1178_v20 = vadd.f32 %v5129_v53, %v1085_v15  ;;  %v1088_v21 = vadd.f32 %v1087_v19, %v5124_v51  ;;  %4477 = vmatprep.mubr.msk.bf16.mxu0 %vm677_vm2, %v1280_v14 }
 0x167   : > { %v1181_v22 = vadd.f32 %v5129_v53, %v1096_v18  ;;  %4478 = vmatmul.mubr.msk.bf16.gmra.mrb[52].mxu0 %vm677_vm2, %v1281_v11  ;;  %v1244_v24 = vmax.f32 %v1180_v17, 0.0 }
 0x168   : > { %v1179_v23 = vadd.f32 %v5129_v53, %v1088_v21  ;;  %v1242_v26 = vmax.f32 %v1178_v20, 0.0 }
 0x169   : > { %v1245_v25 = vmax.f32 %v1181_v22, 0.0 }
 0x16a   : > { %v1243_v27 = vmax.f32 %v1179_v23, 0.0  ;;  %v4419_v28 = vpop.f32.mrb[64].mxu1 }
 0x16b   : > { %v1283_v29 = vpack.c.bf16 %v1245_v25, %v1244_v24  ;;  %v1109_v30 = vadd.f32 %v4419_v28, %v5124_v51  ;;  %v1100_v31 = vpop.f32.mrb[65].mxu1 }
 0x16c   : > { %v1282_v32 = vpack.c.bf16 %v1243_v27, %v1242_v26  ;;  %v1101_v33 = vadd.f32 %v1100_v31, %v5124_v51  ;;  %v4420_v34 = vpop.f32.mrb[66].mxu1 }
 0x16d   : > { %v1184_v35 = vadd.f32 %v5129_v53, %v1109_v30  ;;  %v1112_v36 = vadd.f32 %v4420_v34, %v5124_v51  ;;  %v1103_v37 = vpop.f32.mrb[67].mxu1 }
 0x16e   : > { %v1182_v38 = vadd.f32 %v5129_v53, %v1101_v33  ;;  %v1104_v39 = vadd.f32 %v1103_v37, %v5124_v51  ;;  %4481 = vmatprep.mubr.msk.bf16.mxu0 %vm677_vm2, %v1282_v32  ;;  %v4817_v51 = vld [vmem:[%s6023_s9] sm:$0xff]  }
 0x16f   : > { %v1185_v40 = vadd.f32 %v5129_v53, %v1112_v36  ;;  %4482 = vmatmul.mubr.msk.bf16.gmra.mrb[56].mxu0 %vm677_vm2, %v1283_v29  ;;  %v1248_v42 = vmax.f32 %v1184_v35, 0.0 }
 0x170   : > { %v1183_v41 = vadd.f32 %v5129_v53, %v1104_v39  ;;  %v1246_v44 = vmax.f32 %v1182_v38, 0.0  ;;  %4558 = vmatpush3.bf16.msra.mxu0 %v4817_v51  ;;  %v5303_v53 = vld [vmem:[%s6020_s6] ss:$0 sm:$0xff] }
 0x171   : > { %v1249_v43 = vmax.f32 %v1185_v40, 0.0  ;;  %4559 = vmatprep.subr.bf16.mxu0 %v4863_v1 }
 0x172   : > { %v1247_v46 = vmax.f32 %v1183_v41, 0.0 }
 0x173   : > { %v1285_v47 = vpack.c.bf16 %v1249_v43, %v1248_v42 }
 0x174   : > { %v1284_v48 = vpack.c.bf16 %v1247_v46, %v1246_v44  ;;  %4560 = vmatpush3.bf16.msra.mxu0 %v4818_v59 }
 0x176   : > { %4485 = vmatprep.mubr.msk.bf16.mxu0 %vm677_vm2, %v1284_v48 }
 0x177   : > { %4486 = vmatmul.mubr.msk.bf16.gmra.mrb[60].mxu0 %vm677_vm2, %v1285_v47 }
 0x178   : > { %4561 = vmatprep.mubr.msk.bf16.mxu0 %vm4864_vm0, %v4863_v1 }
 0x17f   : > { %4562 = vmatmul.mubr.msk.bf16.vlgmr.msra.gmra.mrb[64].mxu0 %vm677_vm2, %v5008_v5 }
 0x1d2   : > { %v4427_v50 = vpop.f32.mrb[0].mxu0 }
 0x1d3   : > { %v1444_v52 = vadd.f32 %v4427_v50, %v5303_v53  ;;  %v1435_v54 = vpop.f32.mrb[1].mxu0 }
 0x1d4   : > { %v1436_v55 = vadd.f32 %v5303_v53, %v1435_v54  ;;  %v4428_v56 = vpop.f32.mrb[2].mxu0 }
 0x1d5   : > { %v1447_v57 = vadd.f32 %v4428_v56, %v5303_v53  ;;  %v1438_v58 = vpop.f32.mrb[3].mxu0  ;;  %v1692_v60 = vmax.f32 %v1444_v52, 0.0 }
 0x1d6   : > { %v1439_v1 = vadd.f32 %v5303_v53, %v1438_v58  ;;  %v1690_v62 = vmax.f32 %v1436_v55, 0.0 }
 0x1d7   : > { %v1693_v61 = vmax.f32 %v1447_v57, 0.0 }
 0x1d8   : > { %v1691_v63 = vmax.f32 %v1439_v1, 0.0 }
 0x1d9   : > { %v1759_v0 = vpack.c.bf16 %v1693_v61, %v1692_v60 }
 0x1da   : > { %v1758_v2 = vpack.c.bf16 %v1691_v63, %v1690_v62  ;;  %v4431_v3 = vpop.f32.mrb[4].mxu0 }
 0x1db   : > { %v1460_v4 = vadd.f32 %v4431_v3, %v5303_v53  ;;  %v1451_v6 = vpop.f32.mrb[5].mxu0 }
 0x1dc   : > { %v1452_v7 = vadd.f32 %v5303_v53, %v1451_v6  ;;  %v4432_v8 = vpop.f32.mrb[6].mxu0  ;;  %4493 = vmatprep.mubr.msk.bf16.mxu1 %vm677_vm2, %v1758_v2 }
 0x1dd   : > { %v1463_v9 = vadd.f32 %v4432_v8, %v5303_v53  ;;  %v1454_v10 = vpop.f32.mrb[7].mxu0  ;;  %4494 = vmatmul.mubr.msk.bf16.vlgmr.msra.gmra.mrb[68].mxu1 %vm677_vm2, %v1759_v0  ;;  %v1696_v12 = vmax.f32 %v1460_v4, 0.0 }
 0x1de   : > { %v1455_v11 = vadd.f32 %v5303_v53, %v1454_v10  ;;  %v1694_v14 = vmax.f32 %v1452_v7, 0.0 }
 0x1df   : > { %v1697_v13 = vmax.f32 %v1463_v9, 0.0 }
 0x1e0   : > { %v1695_v15 = vmax.f32 %v1455_v11, 0.0 }
 0x1e1   : > { %v1761_v5 = vpack.c.bf16 %v1697_v13, %v1696_v12 }
 0x1e2   : > { %v1760_v16 = vpack.c.bf16 %v1695_v15, %v1694_v14  ;;  %v4435_v17 = vpop.f32.mrb[8].mxu0 }
 0x1e3   : > { %v1476_v18 = vadd.f32 %v4435_v17, %v5303_v53  ;;  %v1467_v19 = vpop.f32.mrb[9].mxu0 }
 0x1e4   : > { %v1468_v20 = vadd.f32 %v5303_v53, %v1467_v19  ;;  %v4436_v21 = vpop.f32.mrb[10].mxu0  ;;  %4497 = vmatprep.mubr.msk.bf16.mxu1 %vm677_vm2, %v1760_v16 }
 0x1e5   : > { %v1479_v22 = vadd.f32 %v4436_v21, %v5303_v53  ;;  %v1470_v23 = vpop.f32.mrb[11].mxu0  ;;  %4498 = vmatmul.mubr.msk.bf16.gmra.mrb[72].mxu1 %vm677_vm2, %v1761_v5  ;;  %v1700_v25 = vmax.f32 %v1476_v18, 0.0 }
 0x1e6   : > { %v1471_v24 = vadd.f32 %v5303_v53, %v1470_v23  ;;  %v1698_v27 = vmax.f32 %v1468_v20, 0.0 }
 0x1e7   : > { %v1701_v26 = vmax.f32 %v1479_v22, 0.0 }
 0x1e8   : > { %v1699_v28 = vmax.f32 %v1471_v24, 0.0 }
 0x1e9   : > { %v1763_v29 = vpack.c.bf16 %v1701_v26, %v1700_v25 }
 0x1ea   : > { %v1762_v30 = vpack.c.bf16 %v1699_v28, %v1698_v27  ;;  %v4439_v31 = vpop.f32.mrb[12].mxu0 }
 0x1eb   : > { %v1492_v32 = vadd.f32 %v4439_v31, %v5303_v53  ;;  %v1483_v33 = vpop.f32.mrb[13].mxu0 }
 0x1ec   : > { %v1484_v34 = vadd.f32 %v5303_v53, %v1483_v33  ;;  %v4440_v35 = vpop.f32.mrb[14].mxu0  ;;  %4501 = vmatprep.mubr.msk.bf16.mxu1 %vm677_vm2, %v1762_v30 }
 0x1ed   : > { %v1495_v36 = vadd.f32 %v4440_v35, %v5303_v53  ;;  %v1486_v37 = vpop.f32.mrb[15].mxu0  ;;  %4502 = vmatmul.mubr.msk.bf16.gmra.mrb[76].mxu1 %vm677_vm2, %v1763_v29  ;;  %v1704_v39 = vmax.f32 %v1492_v32, 0.0 }
 0x1ee   : > { %v1487_v38 = vadd.f32 %v5303_v53, %v1486_v37  ;;  %v1702_v41 = vmax.f32 %v1484_v34, 0.0 }
 0x1ef   : > { %v1705_v40 = vmax.f32 %v1495_v36, 0.0 }
 0x1f0   : > { %v1703_v42 = vmax.f32 %v1487_v38, 0.0 }
 0x1f1   : > { %v1765_v43 = vpack.c.bf16 %v1705_v40, %v1704_v39 }
 0x1f2   : > { %v1764_v44 = vpack.c.bf16 %v1703_v42, %v1702_v41  ;;  %v4443_v46 = vpop.f32.mrb[16].mxu0 }
 0x1f3   : > { %v1508_v47 = vadd.f32 %v4443_v46, %v5303_v53  ;;  %v1499_v48 = vpop.f32.mrb[17].mxu0 }
 0x1f4   : > { %v1500_v51 = vadd.f32 %v5303_v53, %v1499_v48  ;;  %v4444_v50 = vpop.f32.mrb[18].mxu0  ;;  %4505 = vmatprep.mubr.msk.bf16.mxu1 %vm677_vm2, %v1764_v44 }
 0x1f5   : > { %v1511_v52 = vadd.f32 %v4444_v50, %v5303_v53  ;;  %v1502_v54 = vpop.f32.mrb[19].mxu0  ;;  %4506 = vmatmul.mubr.msk.bf16.gmra.mrb[80].mxu1 %vm677_vm2, %v1765_v43  ;;  %v1708_v56 = vmax.f32 %v1508_v47, 0.0 }
 0x1f6   : > { %v1503_v55 = vadd.f32 %v5303_v53, %v1502_v54  ;;  %v1706_v58 = vmax.f32 %v1500_v51, 0.0 }
 0x1f7   : > { %v1709_v57 = vmax.f32 %v1511_v52, 0.0 }
 0x1f8   : > { %v1707_v59 = vmax.f32 %v1503_v55, 0.0 }
 0x1f9   : > { %v1767_v1 = vpack.c.bf16 %v1709_v57, %v1708_v56 }
 0x1fa   : > { %v1766_v60 = vpack.c.bf16 %v1707_v59, %v1706_v58  ;;  %v4447_v61 = vpop.f32.mrb[20].mxu0 }
 0x1fb   : > { %v1524_v62 = vadd.f32 %v4447_v61, %v5303_v53  ;;  %v1515_v63 = vpop.f32.mrb[21].mxu0 }
 0x1fc   : > { %v1516_v0 = vadd.f32 %v5303_v53, %v1515_v63  ;;  %v4448_v2 = vpop.f32.mrb[22].mxu0  ;;  %4509 = vmatprep.mubr.msk.bf16.mxu1 %vm677_vm2, %v1766_v60 }
 0x1fd   : > { %v1527_v3 = vadd.f32 %v4448_v2, %v5303_v53  ;;  %v1518_v4 = vpop.f32.mrb[23].mxu0  ;;  %4510 = vmatmul.mubr.msk.bf16.gmra.mrb[84].mxu1 %vm677_vm2, %v1767_v1  ;;  %v1712_v7 = vmax.f32 %v1524_v62, 0.0 }
 0x1fe   : > { %v1519_v6 = vadd.f32 %v5303_v53, %v1518_v4  ;;  %v1710_v9 = vmax.f32 %v1516_v0, 0.0 }
 0x1ff   : > { %v1713_v8 = vmax.f32 %v1527_v3, 0.0 }
 0x200   : > { %v1711_v10 = vmax.f32 %v1519_v6, 0.0 }
 0x201   : > { %v1769_v11 = vpack.c.bf16 %v1713_v8, %v1712_v7 }
 0x202   : > { %v1768_v12 = vpack.c.bf16 %v1711_v10, %v1710_v9  ;;  %v4451_v13 = vpop.f32.mrb[24].mxu0 }
 0x203   : > { %v1540_v14 = vadd.f32 %v4451_v13, %v5303_v53  ;;  %v1531_v15 = vpop.f32.mrb[25].mxu0 }
 0x204   : > { %v1532_v5 = vadd.f32 %v5303_v53, %v1531_v15  ;;  %v4452_v16 = vpop.f32.mrb[26].mxu0  ;;  %4513 = vmatprep.mubr.msk.bf16.mxu1 %vm677_vm2, %v1768_v12 }
 0x205   : > { %v1543_v17 = vadd.f32 %v4452_v16, %v5303_v53  ;;  %v1534_v18 = vpop.f32.mrb[27].mxu0  ;;  %4514 = vmatmul.mubr.msk.bf16.gmra.mrb[88].mxu1 %vm677_vm2, %v1769_v11  ;;  %v1716_v20 = vmax.f32 %v1540_v14, 0.0 }
 0x206   : > { %v1535_v19 = vadd.f32 %v5303_v53, %v1534_v18  ;;  %v1714_v22 = vmax.f32 %v1532_v5, 0.0 }
 0x207   : > { %v1717_v21 = vmax.f32 %v1543_v17, 0.0 }
 0x208   : > { %v1715_v23 = vmax.f32 %v1535_v19, 0.0 }
 0x209   : > { %v1771_v24 = vpack.c.bf16 %v1717_v21, %v1716_v20 }
 0x20a   : > { %v1770_v25 = vpack.c.bf16 %v1715_v23, %v1714_v22  ;;  %v4455_v26 = vpop.f32.mrb[28].mxu0 }
 0x20b   : > { %v1556_v27 = vadd.f32 %v4455_v26, %v5303_v53  ;;  %v1547_v28 = vpop.f32.mrb[29].mxu0 }
 0x20c   : > { %v1548_v29 = vadd.f32 %v5303_v53, %v1547_v28  ;;  %v4456_v30 = vpop.f32.mrb[30].mxu0  ;;  %4517 = vmatprep.mubr.msk.bf16.mxu1 %vm677_vm2, %v1770_v25 }
 0x20d   : > { %v1559_v31 = vadd.f32 %v4456_v30, %v5303_v53  ;;  %v1550_v32 = vpop.f32.mrb[31].mxu0  ;;  %4518 = vmatmul.mubr.msk.bf16.gmra.mrb[92].mxu1 %vm677_vm2, %v1771_v24  ;;  %v1720_v34 = vmax.f32 %v1556_v27, 0.0 }
 0x20e   : > { %v1551_v33 = vadd.f32 %v5303_v53, %v1550_v32  ;;  %v1718_v36 = vmax.f32 %v1548_v29, 0.0  ;;  %v4865_v29 = vmov 65535  }
 0x20f   : > { %v1721_v35 = vmax.f32 %v1559_v31, 0.0  ;;  %v2385_v30 = vsel %vm822_vm1, 4294967295, %v4865_v29 }
 0x210   : > { %v1719_v37 = vmax.f32 %v1551_v33, 0.0 }
 0x211   : > { %v1773_v38 = vpack.c.bf16 %v1721_v35, %v1720_v34 }
 0x212   : > { %v1772_v39 = vpack.c.bf16 %v1719_v37, %v1718_v36  ;;  %v4459_v40 = vpop.f32.mrb[32].mxu0 }
 0x213   : > { %v1572_v41 = vadd.f32 %v4459_v40, %v5303_v53  ;;  %v1563_v42 = vpop.f32.mrb[33].mxu0 }
 0x214   : > { %v1564_v43 = vadd.f32 %v5303_v53, %v1563_v42  ;;  %v4460_v44 = vpop.f32.mrb[34].mxu0  ;;  %4521 = vmatprep.mubr.msk.bf16.mxu1 %vm677_vm2, %v1772_v39  ;;  %v2386_v39 = vsel %vm2384_vm4, %v2385_v30, 0 }
 0x215   : > { %v1575_v46 = vadd.f32 %v4460_v44, %v5303_v53  ;;  %v1566_v47 = vpop.f32.mrb[35].mxu0  ;;  %4522 = vmatmul.mubr.msk.bf16.gmra.mrb[96].mxu1 %vm677_vm2, %v1773_v38  ;;  %v1724_v51 = vmax.f32 %v1572_v41, 0.0  ;;  %v2194_v38 = vld [vmem:[%s6024_s10] sm:$0x3] }
 0x216   : > { %v1567_v48 = vadd.f32 %v5303_v53, %v1566_v47  ;;  %v1722_v52 = vmax.f32 %v1564_v43, 0.0  ;;  %v2388_v42 = vand.u32 %v2386_v39, %v2194_v38  ;;  %v4820_v38 = vld [vmem:[%s6026_s12 + $0x8] sm:$0xff]  }
 0x217   : > { %v1725_v50 = vmax.f32 %v1575_v46, 0.0 }
 0x218   : > { %v1723_v54 = vmax.f32 %v1567_v48, 0.0  ;;  %4565 = vmatprep.subr.bf16.mxu0 %v2388_v42 }
 0x219   : > { %v1775_v55 = vpack.c.bf16 %v1725_v50, %v1724_v51  ;;  %4566 = vmatpush3.bf16.msra.mxu0 %v2388_v42 }
 0x21a   : > { %v1774_v56 = vpack.c.bf16 %v1723_v54, %v1722_v52  ;;  %v4463_v57 = vpop.f32.mrb[36].mxu0 }
 0x21b   : > { %v1588_v58 = vadd.f32 %v4463_v57, %v5303_v53  ;;  %v1579_v59 = vpop.f32.mrb[37].mxu0 }
 0x21c   : > { %v1580_v1 = vadd.f32 %v5303_v53, %v1579_v59  ;;  %v4464_v60 = vpop.f32.mrb[38].mxu0  ;;  %4525 = vmatprep.mubr.msk.bf16.mxu1 %vm677_vm2, %v1774_v56 }
 0x21d   : > { %v1591_v61 = vadd.f32 %v4464_v60, %v5303_v53  ;;  %v1582_v62 = vpop.f32.mrb[39].mxu0  ;;  %4526 = vmatmul.mubr.msk.bf16.gmra.mrb[100].mxu1 %vm677_vm2, %v1775_v55  ;;  %v1728_v0 = vmax.f32 %v1588_v58, 0.0 }
 0x21e   : > { %v1583_v63 = vadd.f32 %v5303_v53, %v1582_v62  ;;  %v1726_v3 = vmax.f32 %v1580_v1, 0.0 }
 0x21f   : > { %v1729_v2 = vmax.f32 %v1591_v61, 0.0 }
 0x220   : > { %v1727_v4 = vmax.f32 %v1583_v63, 0.0 }
 0x221   : > { %v1777_v6 = vpack.c.bf16 %v1729_v2, %v1728_v0 }
 0x222   : > { %v1776_v7 = vpack.c.bf16 %v1727_v4, %v1726_v3  ;;  %v4467_v8 = vpop.f32.mrb[40].mxu0 }
 0x223   : > { %v1604_v9 = vadd.f32 %v4467_v8, %v5303_v53  ;;  %v1595_v10 = vpop.f32.mrb[41].mxu0 }
 0x224   : > { %v1596_v11 = vadd.f32 %v5303_v53, %v1595_v10  ;;  %v4468_v12 = vpop.f32.mrb[42].mxu0  ;;  %4529 = vmatprep.mubr.msk.bf16.mxu1 %vm677_vm2, %v1776_v7 }
 0x225   : > { %v1607_v13 = vadd.f32 %v4468_v12, %v5303_v53  ;;  %v1598_v14 = vpop.f32.mrb[43].mxu0  ;;  %4530 = vmatmul.mubr.msk.bf16.gmra.mrb[104].mxu1 %vm677_vm2, %v1777_v6  ;;  %v1732_v5 = vmax.f32 %v1604_v9, 0.0 }
 0x226   : > { %v1599_v15 = vadd.f32 %v5303_v53, %v1598_v14  ;;  %v1730_v17 = vmax.f32 %v1596_v11, 0.0 }
 0x227   : > { %v1733_v16 = vmax.f32 %v1607_v13, 0.0 }
 0x228   : > { %v1731_v18 = vmax.f32 %v1599_v15, 0.0 }
 0x229   : > { %v1779_v19 = vpack.c.bf16 %v1733_v16, %v1732_v5 }
 0x22a   : > { %v1778_v20 = vpack.c.bf16 %v1731_v18, %v1730_v17  ;;  %v4471_v21 = vpop.f32.mrb[44].mxu0 }
 0x22b   : > { %v1620_v22 = vadd.f32 %v4471_v21, %v5303_v53  ;;  %v1611_v23 = vpop.f32.mrb[45].mxu0 }
 0x22c   : > { %v1612_v24 = vadd.f32 %v5303_v53, %v1611_v23  ;;  %v4472_v25 = vpop.f32.mrb[46].mxu0  ;;  %4533 = vmatprep.mubr.msk.bf16.mxu1 %vm677_vm2, %v1778_v20 }
 0x22d   : > { %v1623_v26 = vadd.f32 %v4472_v25, %v5303_v53  ;;  %v1614_v27 = vpop.f32.mrb[47].mxu0  ;;  %4534 = vmatmul.mubr.msk.bf16.gmra.mrb[108].mxu1 %vm677_vm2, %v1779_v19  ;;  %v1736_v31 = vmax.f32 %v1620_v22, 0.0 }
 0x22e   : > { %v1615_v28 = vadd.f32 %v5303_v53, %v1614_v27  ;;  %v1734_v33 = vmax.f32 %v1612_v24, 0.0 }
 0x22f   : > { %v1737_v32 = vmax.f32 %v1623_v26, 0.0 }
 0x230   : > { %v1735_v34 = vmax.f32 %v1615_v28, 0.0 }
 0x231   : > { %v1781_v35 = vpack.c.bf16 %v1737_v32, %v1736_v31 }
 0x232   : > { %v1780_v36 = vpack.c.bf16 %v1735_v34, %v1734_v33  ;;  %v4475_v37 = vpop.f32.mrb[48].mxu0 }
 0x233   : > { %v1636_v40 = vadd.f32 %v4475_v37, %v5303_v53  ;;  %v1627_v41 = vpop.f32.mrb[49].mxu0 }
 0x234   : > { %v1628_v43 = vadd.f32 %v5303_v53, %v1627_v41  ;;  %v4476_v44 = vpop.f32.mrb[50].mxu0  ;;  %4537 = vmatprep.mubr.msk.bf16.mxu1 %vm677_vm2, %v1780_v36 }
 0x235   : > { %v1639_v46 = vadd.f32 %v4476_v44, %v5303_v53  ;;  %v1630_v47 = vpop.f32.mrb[51].mxu0  ;;  %4538 = vmatmul.mubr.msk.bf16.gmra.mrb[112].mxu1 %vm677_vm2, %v1781_v35  ;;  %v1740_v51 = vmax.f32 %v1636_v40, 0.0  ;;  %v4819_v35 = vld [vmem:[%s6026_s12] sm:$0xff]  }
 0x236   : > { %v1631_v48 = vadd.f32 %v5303_v53, %v1630_v47  ;;  %v1738_v52 = vmax.f32 %v1628_v43, 0.0  ;;  %4631 = vmatprep.subr.bf16.mxu1 %v4819_v35 }
 0x237   : > { %v1741_v50 = vmax.f32 %v1639_v46, 0.0  ;;  %4632 = vmatpush3.bf16.msra.mxu1 %v4819_v35 }
 0x238   : > { %v1739_v54 = vmax.f32 %v1631_v48, 0.0  ;;  %4633 = vmatprep.subr.bf16.mxu1 %v4820_v38 }
 0x239   : > { %v1783_v55 = vpack.c.bf16 %v1741_v50, %v1740_v51 }
 0x23a   : > { %v1782_v56 = vpack.c.bf16 %v1739_v54, %v1738_v52  ;;  %v4479_v57 = vpop.f32.mrb[52].mxu0 }
 0x23b   : > { %v1652_v58 = vadd.f32 %v4479_v57, %v5303_v53  ;;  %v1643_v59 = vpop.f32.mrb[53].mxu0  ;;  %4634 = vmatpush3.bf16.msra.mxu1 %v4820_v38 }
 0x23c   : > { %v1644_v1 = vadd.f32 %v5303_v53, %v1643_v59  ;;  %v4480_v60 = vpop.f32.mrb[54].mxu0  ;;  %4541 = vmatprep.mubr.msk.bf16.mxu1 %vm677_vm2, %v1782_v56 }
 0x23d   : > { %v1655_v61 = vadd.f32 %v4480_v60, %v5303_v53  ;;  %v1646_v62 = vpop.f32.mrb[55].mxu0  ;;  %4542 = vmatmul.mubr.msk.bf16.gmra.mrb[116].mxu1 %vm677_vm2, %v1783_v55  ;;  %v1744_v0 = vmax.f32 %v1652_v58, 0.0 }
 0x23e   : > { %v1647_v63 = vadd.f32 %v5303_v53, %v1646_v62  ;;  %v1742_v3 = vmax.f32 %v1644_v1, 0.0 }
 0x23f   : > { %v1745_v2 = vmax.f32 %v1655_v61, 0.0 }
 0x240   : > { %v1743_v4 = vmax.f32 %v1647_v63, 0.0 }
 0x241   : > { %v1785_v6 = vpack.c.bf16 %v1745_v2, %v1744_v0 }
 0x242   : > { %v1784_v7 = vpack.c.bf16 %v1743_v4, %v1742_v3  ;;  %v4483_v8 = vpop.f32.mrb[56].mxu0 }
 0x243   : > { %v1668_v9 = vadd.f32 %v4483_v8, %v5303_v53  ;;  %v1659_v10 = vpop.f32.mrb[57].mxu0 }
 0x244   : > { %v1660_v11 = vadd.f32 %v5303_v53, %v1659_v10  ;;  %v4484_v12 = vpop.f32.mrb[58].mxu0  ;;  %4545 = vmatprep.mubr.msk.bf16.mxu1 %vm677_vm2, %v1784_v7 }
 0x245   : > { %v1671_v13 = vadd.f32 %v4484_v12, %v5303_v53  ;;  %v1662_v14 = vpop.f32.mrb[59].mxu0  ;;  %4546 = vmatmul.mubr.msk.bf16.gmra.mrb[120].mxu1 %vm677_vm2, %v1785_v6  ;;  %v1748_v5 = vmax.f32 %v1668_v9, 0.0 }
 0x246   : > { %v1663_v15 = vadd.f32 %v5303_v53, %v1662_v14  ;;  %v1746_v17 = vmax.f32 %v1660_v11, 0.0 }
 0x247   : > { %v1749_v16 = vmax.f32 %v1671_v13, 0.0 }
 0x248   : > { %v1747_v18 = vmax.f32 %v1663_v15, 0.0 }
 0x249   : > { %v1787_v19 = vpack.c.bf16 %v1749_v16, %v1748_v5 }
 0x24a   : > { %v1786_v20 = vpack.c.bf16 %v1747_v18, %v1746_v17  ;;  %v4487_v21 = vpop.f32.mrb[60].mxu0 }
 0x24b   : > { %v1684_v22 = vadd.f32 %v4487_v21, %v5303_v53  ;;  %v1675_v23 = vpop.f32.mrb[61].mxu0 }
 0x24c   : > { %v1676_v24 = vadd.f32 %v5303_v53, %v1675_v23  ;;  %v4488_v25 = vpop.f32.mrb[62].mxu0  ;;  %4549 = vmatprep.mubr.msk.bf16.mxu1 %vm677_vm2, %v1786_v20 }
 0x24d   : > { %v1687_v26 = vadd.f32 %v4488_v25, %v5303_v53  ;;  %v1678_v27 = vpop.f32.mrb[63].mxu0  ;;  %4550 = vmatmul.mubr.msk.bf16.gmra.mrb[124].mxu1 %vm677_vm2, %v1787_v19  ;;  %v1752_v29 = vmax.f32 %v1684_v22, 0.0 }
 0x24e   : > { %v1679_v28 = vadd.f32 %v5303_v53, %v1678_v27  ;;  %v1750_v31 = vmax.f32 %v1676_v24, 0.0  ;;  %v5416_v53 = vld [vmem:[%s6022_s8] ss:$0 sm:$0xff] }
 0x24f   : > { %v1753_v30 = vmax.f32 %v1687_v26, 0.0 }
 0x250   : > { %v1751_v32 = vmax.f32 %v1679_v28, 0.0 }
 0x251   : > { %v1789_v33 = vpack.c.bf16 %v1753_v30, %v1752_v29 }
 0x252   : > { %v1788_v34 = vpack.c.bf16 %v1751_v32, %v1750_v31  ;;  %v5421_v39 = vpop.f32.mrb[64].mxu0 }
 0x253   : > { %v4563_v41 = vpop.f32.mrb[65].mxu0 }
 0x254   : > { %4553 = vmatprep.mubr.msk.bf16.mxu1 %vm677_vm2, %v1788_v34  ;;  %v2280_v46 = vpop.f32.mrb[66].mxu0 }
 0x255   : > { %4554 = vmatmul.mubr.msk.bf16.gmra.mrb[128].mxu1 %vm677_vm2, %v1789_v33  ;;  %v4564_v51 = vpop.f32.mrb[67].mxu0 }
 0x2b0   : > { %v4495_v36 = vpop.f32.mrb[68].mxu1 }
 0x2b1   : > { %v1939_v37 = vpop.f32.mrb[69].mxu1  ;;  %v1948_v42 = vadd.f32 %v4495_v36, %v5416_v53 }
 0x2b2   : > { %v4496_v40 = vpop.f32.mrb[70].mxu1  ;;  %v1940_v47 = vadd.f32 %v5416_v53, %v1939_v37 }
 0x2b3   : > { %v1951_v43 = vadd.f32 %v4496_v40, %v5416_v53  ;;  %v1942_v44 = vpop.f32.mrb[71].mxu1 }
 0x2b4   : > { %v1943_v48 = vadd.f32 %v5416_v53, %v1942_v44 }
 0x2b5   : > { %v2196_v50 = vpack.c.bf16 %v1951_v43, %v1948_v42 }
 0x2b6   : > { %v2195_v52 = vpack.c.bf16 %v1943_v48, %v1940_v47 }
 0x2b8   : > { %v4499_v54 = vpop.f32.mrb[72].mxu1  ;;  %4567 = vmatprep.mubr.msk.bf16.mxu0 %vm2287_vm5, %v2195_v52 }
 0x2b9   : > { %v1955_v55 = vpop.f32.mrb[73].mxu1  ;;  %4568 = vmatmul.mubr.msk.bf16.vlgmr.msra.gmra.mrb[68].mxu0 %vm2287_vm5, %v2196_v50  ;;  %v1964_v57 = vadd.f32 %v4499_v54, %v5416_v53 }
 0x2ba   : > { %v4500_v56 = vpop.f32.mrb[74].mxu1  ;;  %v1956_v1 = vadd.f32 %v5416_v53, %v1955_v55 }
 0x2bb   : > { %v1967_v58 = vadd.f32 %v4500_v56, %v5416_v53  ;;  %v1958_v59 = vpop.f32.mrb[75].mxu1 }
 0x2bc   : > { %v1959_v60 = vadd.f32 %v5416_v53, %v1958_v59 }
 0x2bd   : > { %v2198_v61 = vpack.c.bf16 %v1967_v58, %v1964_v57 }
 0x2be   : > { %v2197_v62 = vpack.c.bf16 %v1959_v60, %v1956_v1 }
 0x2c0   : > { %v4503_v63 = vpop.f32.mrb[76].mxu1  ;;  %4571 = vmatprep.mubr.msk.bf16.mxu0 %vm2287_vm5, %v2197_v62 }
 0x2c1   : > { %v1971_v0 = vpop.f32.mrb[77].mxu1  ;;  %4572 = vmatmul.mubr.msk.bf16.gmra.mrb[72].mxu0 %vm2287_vm5, %v2198_v61  ;;  %v1980_v3 = vadd.f32 %v4503_v63, %v5416_v53 }
 0x2c2   : > { %v4504_v2 = vpop.f32.mrb[78].mxu1  ;;  %v1972_v7 = vadd.f32 %v5416_v53, %v1971_v0 }
 0x2c3   : > { %v1983_v4 = vadd.f32 %v4504_v2, %v5416_v53  ;;  %v1974_v6 = vpop.f32.mrb[79].mxu1 }
 0x2c4   : > { %v1975_v8 = vadd.f32 %v5416_v53, %v1974_v6 }
 0x2c5   : > { %v2200_v9 = vpack.c.bf16 %v1983_v4, %v1980_v3 }
 0x2c6   : > { %v2199_v10 = vpack.c.bf16 %v1975_v8, %v1972_v7 }
 0x2c8   : > { %v4507_v11 = vpop.f32.mrb[80].mxu1  ;;  %4575 = vmatprep.mubr.msk.bf16.mxu0 %vm2287_vm5, %v2199_v10 }
 0x2c9   : > { %v1987_v12 = vpop.f32.mrb[81].mxu1  ;;  %4576 = vmatmul.mubr.msk.bf16.gmra.mrb[76].mxu0 %vm2287_vm5, %v2200_v9  ;;  %v1996_v14 = vadd.f32 %v4507_v11, %v5416_v53 }
 0x2ca   : > { %v4508_v13 = vpop.f32.mrb[82].mxu1  ;;  %v1988_v16 = vadd.f32 %v5416_v53, %v1987_v12 }
 0x2cb   : > { %v1999_v15 = vadd.f32 %v4508_v13, %v5416_v53  ;;  %v1990_v5 = vpop.f32.mrb[83].mxu1 }
 0x2cc   : > { %v1991_v17 = vadd.f32 %v5416_v53, %v1990_v5 }
 0x2cd   : > { %v2202_v18 = vpack.c.bf16 %v1999_v15, %v1996_v14 }
 0x2ce   : > { %v2201_v19 = vpack.c.bf16 %v1991_v17, %v1988_v16 }
 0x2d0   : > { %v4511_v20 = vpop.f32.mrb[84].mxu1  ;;  %4579 = vmatprep.mubr.msk.bf16.mxu0 %vm2287_vm5, %v2201_v19 }
 0x2d1   : > { %v2003_v21 = vpop.f32.mrb[85].mxu1  ;;  %4580 = vmatmul.mubr.msk.bf16.gmra.mrb[80].mxu0 %vm2287_vm5, %v2202_v18  ;;  %v2012_v23 = vadd.f32 %v4511_v20, %v5416_v53 }
 0x2d2   : > { %v4512_v22 = vpop.f32.mrb[86].mxu1  ;;  %v2004_v26 = vadd.f32 %v5416_v53, %v2003_v21 }
 0x2d3   : > { %v2015_v24 = vadd.f32 %v4512_v22, %v5416_v53  ;;  %v2006_v25 = vpop.f32.mrb[87].mxu1 }
 0x2d4   : > { %v2007_v27 = vadd.f32 %v5416_v53, %v2006_v25 }
 0x2d5   : > { %v2204_v28 = vpack.c.bf16 %v2015_v24, %v2012_v23 }
 0x2d6   : > { %v2203_v29 = vpack.c.bf16 %v2007_v27, %v2004_v26 }
 0x2d8   : > { %v4515_v30 = vpop.f32.mrb[88].mxu1  ;;  %4583 = vmatprep.mubr.msk.bf16.mxu0 %vm2287_vm5, %v2203_v29 }
 0x2d9   : > { %v2019_v31 = vpop.f32.mrb[89].mxu1  ;;  %4584 = vmatmul.mubr.msk.bf16.gmra.mrb[84].mxu0 %vm2287_vm5, %v2204_v28  ;;  %v2028_v33 = vadd.f32 %v4515_v30, %v5416_v53 }
 0x2da   : > { %v4516_v32 = vpop.f32.mrb[90].mxu1  ;;  %v2020_v36 = vadd.f32 %v5416_v53, %v2019_v31 }
 0x2db   : > { %v2031_v34 = vadd.f32 %v4516_v32, %v5416_v53  ;;  %v2022_v35 = vpop.f32.mrb[91].mxu1 }
 0x2dc   : > { %v2023_v37 = vadd.f32 %v5416_v53, %v2022_v35 }
 0x2dd   : > { %v2206_v38 = vpack.c.bf16 %v2031_v34, %v2028_v33 }
 0x2de   : > { %v2205_v40 = vpack.c.bf16 %v2023_v37, %v2020_v36 }
 0x2e0   : > { %v4519_v41 = vpop.f32.mrb[92].mxu1  ;;  %4587 = vmatprep.mubr.msk.bf16.mxu0 %vm2287_vm5, %v2205_v40 }
 0x2e1   : > { %v2035_v42 = vpop.f32.mrb[93].mxu1  ;;  %4588 = vmatmul.mubr.msk.bf16.gmra.mrb[88].mxu0 %vm2287_vm5, %v2206_v38  ;;  %v2044_v44 = vadd.f32 %v4519_v41, %v5416_v53 }
 0x2e2   : > { %v4520_v43 = vpop.f32.mrb[94].mxu1  ;;  %v2036_v48 = vadd.f32 %v5416_v53, %v2035_v42 }
 0x2e3   : > { %v2047_v46 = vadd.f32 %v4520_v43, %v5416_v53  ;;  %v2038_v47 = vpop.f32.mrb[95].mxu1 }
 0x2e4   : > { %v2039_v51 = vadd.f32 %v5416_v53, %v2038_v47 }
 0x2e5   : > { %v2208_v50 = vpack.c.bf16 %v2047_v46, %v2044_v44 }
 0x2e6   : > { %v2207_v52 = vpack.c.bf16 %v2039_v51, %v2036_v48 }
 0x2e8   : > { %v4523_v54 = vpop.f32.mrb[96].mxu1  ;;  %4591 = vmatprep.mubr.msk.bf16.mxu0 %vm2287_vm5, %v2207_v52 }
 0x2e9   : > { %v2051_v55 = vpop.f32.mrb[97].mxu1  ;;  %4592 = vmatmul.mubr.msk.bf16.gmra.mrb[92].mxu0 %vm2287_vm5, %v2208_v50  ;;  %v2060_v57 = vadd.f32 %v4523_v54, %v5416_v53 }
 0x2ea   : > { %v4524_v56 = vpop.f32.mrb[98].mxu1  ;;  %v2052_v1 = vadd.f32 %v5416_v53, %v2051_v55 }
 0x2eb   : > { %v2063_v58 = vadd.f32 %v4524_v56, %v5416_v53  ;;  %v2054_v59 = vpop.f32.mrb[99].mxu1 }
 0x2ec   : > { %v2055_v60 = vadd.f32 %v5416_v53, %v2054_v59 }
 0x2ed   : > { %v2210_v61 = vpack.c.bf16 %v2063_v58, %v2060_v57 }
 0x2ee   : > { %v2209_v62 = vpack.c.bf16 %v2055_v60, %v2052_v1 }
 0x2f0   : > { %v4527_v63 = vpop.f32.mrb[100].mxu1  ;;  %4595 = vmatprep.mubr.msk.bf16.mxu0 %vm2287_vm5, %v2209_v62 }
 0x2f1   : > { %v2067_v0 = vpop.f32.mrb[101].mxu1  ;;  %4596 = vmatmul.mubr.msk.bf16.gmra.mrb[96].mxu0 %vm2287_vm5, %v2210_v61  ;;  %v2076_v3 = vadd.f32 %v4527_v63, %v5416_v53 }
 0x2f2   : > { %v4528_v2 = vpop.f32.mrb[102].mxu1  ;;  %v2068_v7 = vadd.f32 %v5416_v53, %v2067_v0 }
 0x2f3   : > { %v2079_v4 = vadd.f32 %v4528_v2, %v5416_v53  ;;  %v2070_v6 = vpop.f32.mrb[103].mxu1 }
 0x2f4   : > { %v2071_v8 = vadd.f32 %v5416_v53, %v2070_v6 }
 0x2f5   : > { %v2212_v9 = vpack.c.bf16 %v2079_v4, %v2076_v3 }
 0x2f6   : > { %v2211_v10 = vpack.c.bf16 %v2071_v8, %v2068_v7 }
 0x2f8   : > { %v4531_v11 = vpop.f32.mrb[104].mxu1  ;;  %4599 = vmatprep.mubr.msk.bf16.mxu0 %vm2287_vm5, %v2211_v10 }
 0x2f9   : > { %v2083_v12 = vpop.f32.mrb[105].mxu1  ;;  %4600 = vmatmul.mubr.msk.bf16.gmra.mrb[100].mxu0 %vm2287_vm5, %v2212_v9  ;;  %v2092_v14 = vadd.f32 %v4531_v11, %v5416_v53 }
 0x2fa   : > { %v4532_v13 = vpop.f32.mrb[106].mxu1  ;;  %v2084_v16 = vadd.f32 %v5416_v53, %v2083_v12 }
 0x2fb   : > { %v2095_v15 = vadd.f32 %v4532_v13, %v5416_v53  ;;  %v2086_v5 = vpop.f32.mrb[107].mxu1 }
 0x2fc   : > { %v2087_v17 = vadd.f32 %v5416_v53, %v2086_v5 }
 0x2fd   : > { %v2214_v18 = vpack.c.bf16 %v2095_v15, %v2092_v14 }
 0x2fe   : > { %v2213_v19 = vpack.c.bf16 %v2087_v17, %v2084_v16 }
 0x300   : > { %v4535_v20 = vpop.f32.mrb[108].mxu1  ;;  %4603 = vmatprep.mubr.msk.bf16.mxu0 %vm2287_vm5, %v2213_v19 }
 0x301   : > { %v2099_v21 = vpop.f32.mrb[109].mxu1  ;;  %4604 = vmatmul.mubr.msk.bf16.gmra.mrb[104].mxu0 %vm2287_vm5, %v2214_v18  ;;  %v2108_v23 = vadd.f32 %v4535_v20, %v5416_v53  ;;  %v4821_v20 = vld [vmem:[%s6028_s14] sm:$0xff]  }
 0x302   : > { %v4536_v22 = vpop.f32.mrb[110].mxu1  ;;  %v2100_v26 = vadd.f32 %v5416_v53, %v2099_v21  ;;  %4699 = vmatprep.subr.bf16.mxu0 %v4821_v20  ;;  %v5525_v21 = vrot.slane %v5421_v39, %v723_v49 }
 0x303   : > { %v2111_v24 = vadd.f32 %v4536_v22, %v5416_v53  ;;  %v2102_v25 = vpop.f32.mrb[111].mxu1  ;;  %4700 = vmatpush3.bf16.msra.mxu0 %v4821_v20 }
 0x304   : > { %v2103_v27 = vadd.f32 %v5416_v53, %v2102_v25 }
 0x305   : > { %v2216_v28 = vpack.c.bf16 %v2111_v24, %v2108_v23 }
 0x306   : > { %v2215_v29 = vpack.c.bf16 %v2103_v27, %v2100_v26 }
 0x308   : > { %v4539_v30 = vpop.f32.mrb[112].mxu1  ;;  %4607 = vmatprep.mubr.msk.bf16.mxu0 %vm2287_vm5, %v2215_v29 }
 0x309   : > { %v2115_v31 = vpop.f32.mrb[113].mxu1  ;;  %4608 = vmatmul.mubr.msk.bf16.gmra.mrb[108].mxu0 %vm2287_vm5, %v2216_v28  ;;  %v2124_v33 = vadd.f32 %v4539_v30, %v5416_v53  ;;  %v4822_v30 = vld [vmem:[%s6028_s14 + $0x8] sm:$0xff]  }
 0x30a   : > { %v4540_v32 = vpop.f32.mrb[114].mxu1  ;;  %v2116_v36 = vadd.f32 %v5416_v53, %v2115_v31  ;;  %4701 = vmatprep.subr.bf16.mxu0 %v4822_v30 }
 0x30b   : > { %v2127_v34 = vadd.f32 %v4540_v32, %v5416_v53  ;;  %v2118_v35 = vpop.f32.mrb[115].mxu1  ;;  %4702 = vmatpush3.bf16.msra.mxu0 %v4822_v30 }
 0x30c   : > { %v2119_v37 = vadd.f32 %v5416_v53, %v2118_v35 }
 0x30d   : > { %v2218_v38 = vpack.c.bf16 %v2127_v34, %v2124_v33 }
 0x30e   : > { %v2217_v40 = vpack.c.bf16 %v2119_v37, %v2116_v36 }
 0x310   : > { %v4543_v41 = vpop.f32.mrb[116].mxu1  ;;  %4611 = vmatprep.mubr.msk.bf16.mxu0 %vm2287_vm5, %v2217_v40 }
 0x311   : > { %v2131_v42 = vpop.f32.mrb[117].mxu1  ;;  %4612 = vmatmul.mubr.msk.bf16.gmra.mrb[112].mxu0 %vm2287_vm5, %v2218_v38  ;;  %v2140_v44 = vadd.f32 %v4543_v41, %v5416_v53 }
 0x312   : > { %v4544_v43 = vpop.f32.mrb[118].mxu1  ;;  %v2132_v48 = vadd.f32 %v5416_v53, %v2131_v42 }
 0x313   : > { %v2143_v46 = vadd.f32 %v4544_v43, %v5416_v53  ;;  %v2134_v47 = vpop.f32.mrb[119].mxu1 }
 0x314   : > { %v2135_v51 = vadd.f32 %v5416_v53, %v2134_v47 }
 0x315   : > { %v2220_v50 = vpack.c.bf16 %v2143_v46, %v2140_v44 }
 0x316   : > { %v2219_v52 = vpack.c.bf16 %v2135_v51, %v2132_v48 }
 0x318   : > { %v4547_v54 = vpop.f32.mrb[120].mxu1  ;;  %4615 = vmatprep.mubr.msk.bf16.mxu0 %vm2287_vm5, %v2219_v52 }
 0x319   : > { %v2147_v55 = vpop.f32.mrb[121].mxu1  ;;  %4616 = vmatmul.mubr.msk.bf16.gmra.mrb[116].mxu0 %vm2287_vm5, %v2220_v50  ;;  %v2156_v57 = vadd.f32 %v4547_v54, %v5416_v53 }
 0x31a   : > { %v4548_v56 = vpop.f32.mrb[122].mxu1  ;;  %v2148_v1 = vadd.f32 %v5416_v53, %v2147_v55 }
 0x31b   : > { %v2159_v58 = vadd.f32 %v4548_v56, %v5416_v53  ;;  %v2150_v59 = vpop.f32.mrb[123].mxu1 }
 0x31c   : > { %v2151_v60 = vadd.f32 %v5416_v53, %v2150_v59 }
 0x31d   : > { %v2222_v61 = vpack.c.bf16 %v2159_v58, %v2156_v57 }
 0x31e   : > { %v2221_v62 = vpack.c.bf16 %v2151_v60, %v2148_v1 }
 0x320   : > { %v4551_v63 = vpop.f32.mrb[124].mxu1  ;;  %4619 = vmatprep.mubr.msk.bf16.mxu0 %vm2287_vm5, %v2221_v62 }
 0x321   : > { %v2163_v0 = vpop.f32.mrb[125].mxu1  ;;  %4620 = vmatmul.mubr.msk.bf16.gmra.mrb[120].mxu0 %vm2287_vm5, %v2222_v61  ;;  %v2172_v3 = vadd.f32 %v4551_v63, %v5416_v53 }
 0x322   : > { %v4552_v2 = vpop.f32.mrb[126].mxu1  ;;  %v2164_v7 = vadd.f32 %v5416_v53, %v2163_v0 }
 0x323   : > { %v2175_v4 = vadd.f32 %v4552_v2, %v5416_v53  ;;  %v2166_v6 = vpop.f32.mrb[127].mxu1 }
 0x324   : > { %v2167_v8 = vadd.f32 %v5416_v53, %v2166_v6 }
 0x325   : > { %v2224_v9 = vpack.c.bf16 %v2175_v4, %v2172_v3 }
 0x326   : > { %v2223_v10 = vpack.c.bf16 %v2167_v8, %v2164_v7 }
 0x328   : > { %v4555_v11 = vpop.f32.mrb[128].mxu1  ;;  %4623 = vmatprep.mubr.msk.bf16.mxu0 %vm2287_vm5, %v2223_v10 }
 0x329   : > { %v2179_v12 = vpop.f32.mrb[129].mxu1  ;;  %4624 = vmatmul.mubr.msk.bf16.gmra.mrb[124].mxu0 %vm2287_vm5, %v2224_v9  ;;  %v2188_v14 = vadd.f32 %v4555_v11, %v5416_v53 }
 0x32a   : > { %v4556_v13 = vpop.f32.mrb[130].mxu1  ;;  %v2180_v16 = vadd.f32 %v5416_v53, %v2179_v12 }
 0x32b   : > { %v2191_v15 = vadd.f32 %v4556_v13, %v5416_v53  ;;  %v2182_v5 = vpop.f32.mrb[131].mxu1 }
 0x32c   : > { %v2183_v17 = vadd.f32 %v5416_v53, %v2182_v5  ;;  %v5530_v53 = vld [vmem:[%s6025_s11] ss:$0 sm:$0xff] }
 0x32d   : > { %v2226_v18 = vpack.c.bf16 %v2191_v15, %v2188_v14 }
 0x32e   : > { %v2225_v19 = vpack.c.bf16 %v2183_v17, %v2180_v16 }
 0x330   : > { %4627 = vmatprep.mubr.msk.bf16.mxu0 %vm2287_vm5, %v2225_v19 }
 0x331   : > { %4628 = vmatmul.mubr.msk.bf16.gmra.mrb[128].mxu0 %vm2287_vm5, %v2226_v18 }
 0x38c   : > { %v4569_v22 = vpop.f32.mrb[68].mxu0 }
 0x38d   : > { %v2433_v23 = vadd.f32 %v4569_v22, %v5525_v21  ;;  %v2424_v24 = vpop.f32.mrb[69].mxu0 }
 0x38e   : > { %v2425_v25 = vadd.f32 %v2424_v24, %v5525_v21  ;;  %v4570_v26 = vpop.f32.mrb[70].mxu0 }
 0x38f   : > { %v2688_v27 = vadd.f32 %v5530_v53, %v2433_v23  ;;  %v2436_v28 = vadd.f32 %v4570_v26, %v5525_v21  ;;  %v2427_v45 = vpop.f32.mrb[71].mxu0 }
 0x390   : > { %v2686_v49 = vadd.f32 %v5530_v53, %v2425_v25  ;;  %v2428_v39 = vadd.f32 %v2427_v45, %v5525_v21 }
 0x391   : > { %v2689_v29 = vadd.f32 %v5530_v53, %v2436_v28  ;;  %v2752_v32 = vmax.f32 %v2688_v27, 0.0 }
 0x392   : > { %v2687_v31 = vadd.f32 %v5530_v53, %v2428_v39  ;;  %v2750_v34 = vmax.f32 %v2686_v49, 0.0 }
 0x393   : > { %v2753_v33 = vmax.f32 %v2689_v29, 0.0 }
 0x394   : > { %v2751_v35 = vmax.f32 %v2687_v31, 0.0  ;;  %v4573_v36 = vpop.f32.mrb[72].mxu0 }
 0x395   : > { %v2819_v37 = vpack.c.bf16 %v2753_v33, %v2752_v32  ;;  %v2449_v38 = vadd.f32 %v4573_v36, %v5525_v21  ;;  %v2440_v40 = vpop.f32.mrb[73].mxu0 }
 0x396   : > { %v2818_v41 = vpack.c.bf16 %v2751_v35, %v2750_v34  ;;  %v2441_v42 = vadd.f32 %v2440_v40, %v5525_v21  ;;  %v4574_v43 = vpop.f32.mrb[74].mxu0 }
 0x397   : > { %v2692_v44 = vadd.f32 %v5530_v53, %v2449_v38  ;;  %v2452_v46 = vadd.f32 %v4574_v43, %v5525_v21  ;;  %v2443_v47 = vpop.f32.mrb[75].mxu0 }
 0x398   : > { %v2690_v48 = vadd.f32 %v5530_v53, %v2441_v42  ;;  %v2444_v51 = vadd.f32 %v2443_v47, %v5525_v21  ;;  %4635 = vmatprep.mubr.msk.bf16.mxu1 %vm677_vm2, %v2818_v41 }
 0x399   : > { %v2693_v50 = vadd.f32 %v5530_v53, %v2452_v46  ;;  %4636 = vmatmul.mubr.msk.bf16.vlgmr.msra.gmra.mrb[132].mxu1 %vm677_vm2, %v2819_v37  ;;  %v2756_v54 = vmax.f32 %v2692_v44, 0.0 }
 0x39a   : > { %v2691_v52 = vadd.f32 %v5530_v53, %v2444_v51  ;;  %v2754_v56 = vmax.f32 %v2690_v48, 0.0 }
 0x39b   : > { %v2757_v55 = vmax.f32 %v2693_v50, 0.0 }
 0x39c   : > { %v2755_v57 = vmax.f32 %v2691_v52, 0.0  ;;  %v4577_v58 = vpop.f32.mrb[76].mxu0 }
 0x39d   : > { %v2821_v59 = vpack.c.bf16 %v2757_v55, %v2756_v54  ;;  %v2465_v1 = vadd.f32 %v4577_v58, %v5525_v21  ;;  %v2456_v60 = vpop.f32.mrb[77].mxu0 }
 0x39e   : > { %v2820_v61 = vpack.c.bf16 %v2755_v57, %v2754_v56  ;;  %v2457_v62 = vadd.f32 %v2456_v60, %v5525_v21  ;;  %v4578_v63 = vpop.f32.mrb[78].mxu0 }
 0x39f   : > { %v2696_v0 = vadd.f32 %v5530_v53, %v2465_v1  ;;  %v2468_v2 = vadd.f32 %v4578_v63, %v5525_v21  ;;  %v2459_v3 = vpop.f32.mrb[79].mxu0 }
 0x3a0   : > { %v2694_v4 = vadd.f32 %v5530_v53, %v2457_v62  ;;  %v2460_v6 = vadd.f32 %v2459_v3, %v5525_v21  ;;  %4639 = vmatprep.mubr.msk.bf16.mxu1 %vm677_vm2, %v2820_v61 }
 0x3a1   : > { %v2697_v7 = vadd.f32 %v5530_v53, %v2468_v2  ;;  %4640 = vmatmul.mubr.msk.bf16.gmra.mrb[136].mxu1 %vm677_vm2, %v2821_v59  ;;  %v2760_v9 = vmax.f32 %v2696_v0, 0.0 }
 0x3a2   : > { %v2695_v8 = vadd.f32 %v5530_v53, %v2460_v6  ;;  %v2758_v11 = vmax.f32 %v2694_v4, 0.0 }
 0x3a3   : > { %v2761_v10 = vmax.f32 %v2697_v7, 0.0 }
 0x3a4   : > { %v2759_v12 = vmax.f32 %v2695_v8, 0.0  ;;  %v4581_v13 = vpop.f32.mrb[80].mxu0 }
 0x3a5   : > { %v2823_v14 = vpack.c.bf16 %v2761_v10, %v2760_v9  ;;  %v2481_v15 = vadd.f32 %v4581_v13, %v5525_v21  ;;  %v2472_v5 = vpop.f32.mrb[81].mxu0 }
 0x3a6   : > { %v2822_v16 = vpack.c.bf16 %v2759_v12, %v2758_v11  ;;  %v2473_v17 = vadd.f32 %v2472_v5, %v5525_v21  ;;  %v4582_v18 = vpop.f32.mrb[82].mxu0 }
 0x3a7   : > { %v2700_v19 = vadd.f32 %v5530_v53, %v2481_v15  ;;  %v2484_v20 = vadd.f32 %v4582_v18, %v5525_v21  ;;  %v2475_v22 = vpop.f32.mrb[83].mxu0 }
 0x3a8   : > { %v2698_v23 = vadd.f32 %v5530_v53, %v2473_v17  ;;  %v2476_v24 = vadd.f32 %v2475_v22, %v5525_v21  ;;  %4643 = vmatprep.mubr.msk.bf16.mxu1 %vm677_vm2, %v2822_v16 }
 0x3a9   : > { %v2701_v25 = vadd.f32 %v5530_v53, %v2484_v20  ;;  %4644 = vmatmul.mubr.msk.bf16.gmra.mrb[140].mxu1 %vm677_vm2, %v2823_v14  ;;  %v2764_v27 = vmax.f32 %v2700_v19, 0.0 }
 0x3aa   : > { %v2699_v26 = vadd.f32 %v5530_v53, %v2476_v24  ;;  %v2762_v45 = vmax.f32 %v2698_v23, 0.0 }
 0x3ab   : > { %v2765_v28 = vmax.f32 %v2701_v25, 0.0 }
 0x3ac   : > { %v2763_v49 = vmax.f32 %v2699_v26, 0.0  ;;  %v4585_v39 = vpop.f32.mrb[84].mxu0 }
 0x3ad   : > { %v2825_v29 = vpack.c.bf16 %v2765_v28, %v2764_v27  ;;  %v2497_v30 = vadd.f32 %v4585_v39, %v5525_v21  ;;  %v2488_v31 = vpop.f32.mrb[85].mxu0 }
 0x3ae   : > { %v2824_v32 = vpack.c.bf16 %v2763_v49, %v2762_v45  ;;  %v2489_v33 = vadd.f32 %v2488_v31, %v5525_v21  ;;  %v4586_v34 = vpop.f32.mrb[86].mxu0 }
 0x3af   : > { %v2704_v35 = vadd.f32 %v5530_v53, %v2497_v30  ;;  %v2500_v36 = vadd.f32 %v4586_v34, %v5525_v21  ;;  %v2491_v37 = vpop.f32.mrb[87].mxu0 }
 0x3b0   : > { %v2702_v38 = vadd.f32 %v5530_v53, %v2489_v33  ;;  %v2492_v40 = vadd.f32 %v2491_v37, %v5525_v21  ;;  %4647 = vmatprep.mubr.msk.bf16.mxu1 %vm677_vm2, %v2824_v32 }
 0x3b1   : > { %v2705_v41 = vadd.f32 %v5530_v53, %v2500_v36  ;;  %4648 = vmatmul.mubr.msk.bf16.gmra.mrb[144].mxu1 %vm677_vm2, %v2825_v29  ;;  %v2768_v43 = vmax.f32 %v2704_v35, 0.0 }
 0x3b2   : > { %v2703_v42 = vadd.f32 %v5530_v53, %v2492_v40  ;;  %v2766_v46 = vmax.f32 %v2702_v38, 0.0 }
 0x3b3   : > { %v2769_v44 = vmax.f32 %v2705_v41, 0.0 }
 0x3b4   : > { %v2767_v47 = vmax.f32 %v2703_v42, 0.0  ;;  %v4589_v48 = vpop.f32.mrb[88].mxu0 }
 0x3b5   : > { %v2827_v51 = vpack.c.bf16 %v2769_v44, %v2768_v43  ;;  %v2513_v50 = vadd.f32 %v4589_v48, %v5525_v21  ;;  %v2504_v52 = vpop.f32.mrb[89].mxu0 }
 0x3b6   : > { %v2826_v54 = vpack.c.bf16 %v2767_v47, %v2766_v46  ;;  %v2505_v55 = vadd.f32 %v2504_v52, %v5525_v21  ;;  %v4590_v56 = vpop.f32.mrb[90].mxu0 }
 0x3b7   : > { %v2708_v57 = vadd.f32 %v5530_v53, %v2513_v50  ;;  %v2516_v58 = vadd.f32 %v4590_v56, %v5525_v21  ;;  %v2507_v59 = vpop.f32.mrb[91].mxu0 }
 0x3b8   : > { %v2706_v1 = vadd.f32 %v5530_v53, %v2505_v55  ;;  %v2508_v60 = vadd.f32 %v2507_v59, %v5525_v21  ;;  %4651 = vmatprep.mubr.msk.bf16.mxu1 %vm677_vm2, %v2826_v54 }
 0x3b9   : > { %v2709_v61 = vadd.f32 %v5530_v53, %v2516_v58  ;;  %4652 = vmatmul.mubr.msk.bf16.gmra.mrb[148].mxu1 %vm677_vm2, %v2827_v51  ;;  %v2772_v63 = vmax.f32 %v2708_v57, 0.0 }
 0x3ba   : > { %v2707_v62 = vadd.f32 %v5530_v53, %v2508_v60  ;;  %v2770_v2 = vmax.f32 %v2706_v1, 0.0 }
 0x3bb   : > { %v2773_v0 = vmax.f32 %v2709_v61, 0.0 }
 0x3bc   : > { %v2771_v3 = vmax.f32 %v2707_v62, 0.0  ;;  %v4593_v4 = vpop.f32.mrb[92].mxu0 }
 0x3bd   : > { %v2829_v6 = vpack.c.bf16 %v2773_v0, %v2772_v63  ;;  %v2529_v7 = vadd.f32 %v4593_v4, %v5525_v21  ;;  %v2520_v8 = vpop.f32.mrb[93].mxu0 }
 0x3be   : > { %v2828_v9 = vpack.c.bf16 %v2771_v3, %v2770_v2  ;;  %v2521_v10 = vadd.f32 %v2520_v8, %v5525_v21  ;;  %v4594_v11 = vpop.f32.mrb[94].mxu0 }
 0x3bf   : > { %v2712_v12 = vadd.f32 %v5530_v53, %v2529_v7  ;;  %v2532_v13 = vadd.f32 %v4594_v11, %v5525_v21  ;;  %v2523_v14 = vpop.f32.mrb[95].mxu0 }
 0x3c0   : > { %v2710_v15 = vadd.f32 %v5530_v53, %v2521_v10  ;;  %v2524_v5 = vadd.f32 %v2523_v14, %v5525_v21  ;;  %4655 = vmatprep.mubr.msk.bf16.mxu1 %vm677_vm2, %v2828_v9 }
 0x3c1   : > { %v2713_v16 = vadd.f32 %v5530_v53, %v2532_v13  ;;  %4656 = vmatmul.mubr.msk.bf16.gmra.mrb[152].mxu1 %vm677_vm2, %v2829_v6  ;;  %v2776_v18 = vmax.f32 %v2712_v12, 0.0 }
 0x3c2   : > { %v2711_v17 = vadd.f32 %v5530_v53, %v2524_v5  ;;  %v2774_v20 = vmax.f32 %v2710_v15, 0.0 }
 0x3c3   : > { %v2777_v19 = vmax.f32 %v2713_v16, 0.0 }
 0x3c4   : > { %v2775_v22 = vmax.f32 %v2711_v17, 0.0  ;;  %v4597_v23 = vpop.f32.mrb[96].mxu0 }
 0x3c5   : > { %v2831_v24 = vpack.c.bf16 %v2777_v19, %v2776_v18  ;;  %v2545_v25 = vadd.f32 %v4597_v23, %v5525_v21  ;;  %v2536_v26 = vpop.f32.mrb[97].mxu0 }
 0x3c6   : > { %v2830_v27 = vpack.c.bf16 %v2775_v22, %v2774_v20  ;;  %v2537_v28 = vadd.f32 %v2536_v26, %v5525_v21  ;;  %v4598_v45 = vpop.f32.mrb[98].mxu0 }
 0x3c7   : > { %v2716_v49 = vadd.f32 %v5530_v53, %v2545_v25  ;;  %v2548_v39 = vadd.f32 %v4598_v45, %v5525_v21  ;;  %v2539_v29 = vpop.f32.mrb[99].mxu0 }
 0x3c8   : > { %v2714_v30 = vadd.f32 %v5530_v53, %v2537_v28  ;;  %v2540_v31 = vadd.f32 %v2539_v29, %v5525_v21  ;;  %4659 = vmatprep.mubr.msk.bf16.mxu1 %vm677_vm2, %v2830_v27 }
 0x3c9   : > { %v2717_v32 = vadd.f32 %v5530_v53, %v2548_v39  ;;  %4660 = vmatmul.mubr.msk.bf16.gmra.mrb[156].mxu1 %vm677_vm2, %v2831_v24  ;;  %v2780_v34 = vmax.f32 %v2716_v49, 0.0 }
 0x3ca   : > { %v2715_v33 = vadd.f32 %v5530_v53, %v2540_v31  ;;  %v2778_v36 = vmax.f32 %v2714_v30, 0.0 }
 0x3cb   : > { %v2781_v35 = vmax.f32 %v2717_v32, 0.0 }
 0x3cc   : > { %v2779_v37 = vmax.f32 %v2715_v33, 0.0  ;;  %v4601_v38 = vpop.f32.mrb[100].mxu0 }
 0x3cd   : > { %v2833_v40 = vpack.c.bf16 %v2781_v35, %v2780_v34  ;;  %v2561_v41 = vadd.f32 %v4601_v38, %v5525_v21  ;;  %v2552_v42 = vpop.f32.mrb[101].mxu0 }
 0x3ce   : > { %v2832_v43 = vpack.c.bf16 %v2779_v37, %v2778_v36  ;;  %v2553_v44 = vadd.f32 %v2552_v42, %v5525_v21  ;;  %v4602_v46 = vpop.f32.mrb[102].mxu0 }
 0x3cf   : > { %v2720_v47 = vadd.f32 %v5530_v53, %v2561_v41  ;;  %v2564_v48 = vadd.f32 %v4602_v46, %v5525_v21  ;;  %v2555_v51 = vpop.f32.mrb[103].mxu0 }
 0x3d0   : > { %v2718_v50 = vadd.f32 %v5530_v53, %v2553_v44  ;;  %v2556_v52 = vadd.f32 %v2555_v51, %v5525_v21  ;;  %4663 = vmatprep.mubr.msk.bf16.mxu1 %vm677_vm2, %v2832_v43 }
 0x3d1   : > { %v2721_v54 = vadd.f32 %v5530_v53, %v2564_v48  ;;  %4664 = vmatmul.mubr.msk.bf16.gmra.mrb[160].mxu1 %vm677_vm2, %v2833_v40  ;;  %v2784_v56 = vmax.f32 %v2720_v47, 0.0 }
 0x3d2   : > { %v2719_v55 = vadd.f32 %v5530_v53, %v2556_v52  ;;  %v2782_v58 = vmax.f32 %v2718_v50, 0.0 }
 0x3d3   : > { %v2785_v57 = vmax.f32 %v2721_v54, 0.0 }
 0x3d4   : > { %v2783_v59 = vmax.f32 %v2719_v55, 0.0  ;;  %v4605_v1 = vpop.f32.mrb[104].mxu0 }
 0x3d5   : > { %v2835_v60 = vpack.c.bf16 %v2785_v57, %v2784_v56  ;;  %v2577_v61 = vadd.f32 %v4605_v1, %v5525_v21  ;;  %v2568_v62 = vpop.f32.mrb[105].mxu0 }
 0x3d6   : > { %v2834_v63 = vpack.c.bf16 %v2783_v59, %v2782_v58  ;;  %v2569_v0 = vadd.f32 %v2568_v62, %v5525_v21  ;;  %v4606_v2 = vpop.f32.mrb[106].mxu0 }
 0x3d7   : > { %v2724_v3 = vadd.f32 %v5530_v53, %v2577_v61  ;;  %v2580_v4 = vadd.f32 %v4606_v2, %v5525_v21  ;;  %v2571_v6 = vpop.f32.mrb[107].mxu0 }
 0x3d8   : > { %v2722_v7 = vadd.f32 %v5530_v53, %v2569_v0  ;;  %v2572_v8 = vadd.f32 %v2571_v6, %v5525_v21  ;;  %4667 = vmatprep.mubr.msk.bf16.mxu1 %vm677_vm2, %v2834_v63 }
 0x3d9   : > { %v2725_v9 = vadd.f32 %v5530_v53, %v2580_v4  ;;  %4668 = vmatmul.mubr.msk.bf16.gmra.mrb[164].mxu1 %vm677_vm2, %v2835_v60  ;;  %v2788_v11 = vmax.f32 %v2724_v3, 0.0 }
 0x3da   : > { %v2723_v10 = vadd.f32 %v5530_v53, %v2572_v8  ;;  %v2786_v13 = vmax.f32 %v2722_v7, 0.0 }
 0x3db   : > { %v2789_v12 = vmax.f32 %v2725_v9, 0.0 }
 0x3dc   : > { %v2787_v14 = vmax.f32 %v2723_v10, 0.0  ;;  %v4609_v15 = vpop.f32.mrb[108].mxu0 }
 0x3dd   : > { %v2837_v5 = vpack.c.bf16 %v2789_v12, %v2788_v11  ;;  %v2593_v16 = vadd.f32 %v4609_v15, %v5525_v21  ;;  %v2584_v17 = vpop.f32.mrb[109].mxu0 }
 0x3de   : > { %v2836_v18 = vpack.c.bf16 %v2787_v14, %v2786_v13  ;;  %v2585_v19 = vadd.f32 %v2584_v17, %v5525_v21  ;;  %v4610_v20 = vpop.f32.mrb[110].mxu0 }
 0x3df   : > { %v2728_v22 = vadd.f32 %v5530_v53, %v2593_v16  ;;  %v2596_v23 = vadd.f32 %v4610_v20, %v5525_v21  ;;  %v2587_v24 = vpop.f32.mrb[111].mxu0 }
 0x3e0   : > { %v2726_v25 = vadd.f32 %v5530_v53, %v2585_v19  ;;  %v2588_v26 = vadd.f32 %v2587_v24, %v5525_v21  ;;  %4671 = vmatprep.mubr.msk.bf16.mxu1 %vm677_vm2, %v2836_v18 }
 0x3e1   : > { %v2729_v27 = vadd.f32 %v5530_v53, %v2596_v23  ;;  %4672 = vmatmul.mubr.msk.bf16.gmra.mrb[168].mxu1 %vm677_vm2, %v2837_v5  ;;  %v2792_v45 = vmax.f32 %v2728_v22, 0.0 }
 0x3e2   : > { %v2727_v28 = vadd.f32 %v5530_v53, %v2588_v26  ;;  %v2790_v39 = vmax.f32 %v2726_v25, 0.0 }
 0x3e3   : > { %v2793_v49 = vmax.f32 %v2729_v27, 0.0 }
 0x3e4   : > { %v2791_v29 = vmax.f32 %v2727_v28, 0.0  ;;  %v4613_v30 = vpop.f32.mrb[112].mxu0 }
 0x3e5   : > { %v2839_v31 = vpack.c.bf16 %v2793_v49, %v2792_v45  ;;  %v2609_v32 = vadd.f32 %v4613_v30, %v5525_v21  ;;  %v2600_v33 = vpop.f32.mrb[113].mxu0 }
 0x3e6   : > { %v2838_v34 = vpack.c.bf16 %v2791_v29, %v2790_v39  ;;  %v2601_v35 = vadd.f32 %v2600_v33, %v5525_v21  ;;  %v4614_v36 = vpop.f32.mrb[114].mxu0 }
 0x3e7   : > { %v2732_v37 = vadd.f32 %v5530_v53, %v2609_v32  ;;  %v2612_v38 = vadd.f32 %v4614_v36, %v5525_v21  ;;  %v2603_v40 = vpop.f32.mrb[115].mxu0 }
 0x3e8   : > { %v2730_v41 = vadd.f32 %v5530_v53, %v2601_v35  ;;  %v2604_v42 = vadd.f32 %v2603_v40, %v5525_v21  ;;  %4675 = vmatprep.mubr.msk.bf16.mxu1 %vm677_vm2, %v2838_v34 }
 0x3e9   : > { %v2733_v43 = vadd.f32 %v5530_v53, %v2612_v38  ;;  %4676 = vmatmul.mubr.msk.bf16.gmra.mrb[172].mxu1 %vm677_vm2, %v2839_v31  ;;  %v2796_v46 = vmax.f32 %v2732_v37, 0.0 }
 0x3ea   : > { %v2731_v44 = vadd.f32 %v5530_v53, %v2604_v42  ;;  %v2794_v48 = vmax.f32 %v2730_v41, 0.0 }
 0x3eb   : > { %v2797_v47 = vmax.f32 %v2733_v43, 0.0 }
 0x3ec   : > { %v2795_v51 = vmax.f32 %v2731_v44, 0.0  ;;  %v4617_v50 = vpop.f32.mrb[116].mxu0 }
 0x3ed   : > { %v2841_v52 = vpack.c.bf16 %v2797_v47, %v2796_v46  ;;  %v2625_v54 = vadd.f32 %v4617_v50, %v5525_v21  ;;  %v2616_v55 = vpop.f32.mrb[117].mxu0 }
 0x3ee   : > { %v2840_v56 = vpack.c.bf16 %v2795_v51, %v2794_v48  ;;  %v2617_v57 = vadd.f32 %v2616_v55, %v5525_v21  ;;  %v4618_v58 = vpop.f32.mrb[118].mxu0 }
 0x3ef   : > { %v2736_v59 = vadd.f32 %v5530_v53, %v2625_v54  ;;  %v2628_v1 = vadd.f32 %v4618_v58, %v5525_v21  ;;  %v2619_v60 = vpop.f32.mrb[119].mxu0 }
 0x3f0   : > { %v2734_v61 = vadd.f32 %v5530_v53, %v2617_v57  ;;  %v2620_v62 = vadd.f32 %v2619_v60, %v5525_v21  ;;  %4679 = vmatprep.mubr.msk.bf16.mxu1 %vm677_vm2, %v2840_v56 }
 0x3f1   : > { %v2737_v63 = vadd.f32 %v5530_v53, %v2628_v1  ;;  %4680 = vmatmul.mubr.msk.bf16.gmra.mrb[176].mxu1 %vm677_vm2, %v2841_v52  ;;  %v2800_v2 = vmax.f32 %v2736_v59, 0.0 }
 0x3f2   : > { %v2735_v0 = vadd.f32 %v5530_v53, %v2620_v62  ;;  %v2798_v4 = vmax.f32 %v2734_v61, 0.0 }
 0x3f3   : > { %v2801_v3 = vmax.f32 %v2737_v63, 0.0 }
 0x3f4   : > { %v2799_v6 = vmax.f32 %v2735_v0, 0.0  ;;  %v4621_v7 = vpop.f32.mrb[120].mxu0 }
 0x3f5   : > { %v2843_v8 = vpack.c.bf16 %v2801_v3, %v2800_v2  ;;  %v2641_v9 = vadd.f32 %v4621_v7, %v5525_v21  ;;  %v2632_v10 = vpop.f32.mrb[121].mxu0 }
 0x3f6   : > { %v2842_v11 = vpack.c.bf16 %v2799_v6, %v2798_v4  ;;  %v2633_v12 = vadd.f32 %v2632_v10, %v5525_v21  ;;  %v4622_v13 = vpop.f32.mrb[122].mxu0 }
 0x3f7   : > { %v2740_v14 = vadd.f32 %v5530_v53, %v2641_v9  ;;  %v2644_v15 = vadd.f32 %v4622_v13, %v5525_v21  ;;  %v2635_v5 = vpop.f32.mrb[123].mxu0 }
 0x3f8   : > { %v2738_v16 = vadd.f32 %v5530_v53, %v2633_v12  ;;  %v2636_v17 = vadd.f32 %v2635_v5, %v5525_v21  ;;  %4683 = vmatprep.mubr.msk.bf16.mxu1 %vm677_vm2, %v2842_v11 }
 0x3f9   : > { %v2741_v18 = vadd.f32 %v5530_v53, %v2644_v15  ;;  %4684 = vmatmul.mubr.msk.bf16.gmra.mrb[180].mxu1 %vm677_vm2, %v2843_v8  ;;  %v2804_v20 = vmax.f32 %v2740_v14, 0.0 }
 0x3fa   : > { %v2739_v19 = vadd.f32 %v5530_v53, %v2636_v17  ;;  %v2802_v23 = vmax.f32 %v2738_v16, 0.0 }
 0x3fb   : > { %v2805_v22 = vmax.f32 %v2741_v18, 0.0 }
 0x3fc   : > { %v2803_v24 = vmax.f32 %v2739_v19, 0.0  ;;  %v4625_v25 = vpop.f32.mrb[124].mxu0 }
 0x3fd   : > { %v2845_v26 = vpack.c.bf16 %v2805_v22, %v2804_v20  ;;  %v2657_v27 = vadd.f32 %v4625_v25, %v5525_v21  ;;  %v2648_v28 = vpop.f32.mrb[125].mxu0 }
 0x3fe   : > { %v2844_v45 = vpack.c.bf16 %v2803_v24, %v2802_v23  ;;  %v2649_v49 = vadd.f32 %v2648_v28, %v5525_v21  ;;  %v4626_v39 = vpop.f32.mrb[126].mxu0 }
 0x3ff   : > { %v2744_v29 = vadd.f32 %v5530_v53, %v2657_v27  ;;  %v2660_v30 = vadd.f32 %v4626_v39, %v5525_v21  ;;  %v2651_v31 = vpop.f32.mrb[127].mxu0 }
 0x400   : > { %v2742_v32 = vadd.f32 %v5530_v53, %v2649_v49  ;;  %v2652_v33 = vadd.f32 %v2651_v31, %v5525_v21  ;;  %4687 = vmatprep.mubr.msk.bf16.mxu1 %vm677_vm2, %v2844_v45 }
 0x401   : > { %v2745_v34 = vadd.f32 %v5530_v53, %v2660_v30  ;;  %4688 = vmatmul.mubr.msk.bf16.gmra.mrb[184].mxu1 %vm677_vm2, %v2845_v26  ;;  %v2808_v36 = vmax.f32 %v2744_v29, 0.0 }
 0x402   : > { %v2743_v35 = vadd.f32 %v5530_v53, %v2652_v33  ;;  %v2806_v38 = vmax.f32 %v2742_v32, 0.0 }
 0x403   : > { %v2809_v37 = vmax.f32 %v2745_v34, 0.0 }
 0x404   : > { %v2807_v40 = vmax.f32 %v2743_v35, 0.0  ;;  %v4629_v41 = vpop.f32.mrb[128].mxu0 }
 0x405   : > { %v2847_v42 = vpack.c.bf16 %v2809_v37, %v2808_v36  ;;  %v2673_v43 = vadd.f32 %v4629_v41, %v5525_v21  ;;  %v2664_v44 = vpop.f32.mrb[129].mxu0 }
 0x406   : > { %v2846_v46 = vpack.c.bf16 %v2807_v40, %v2806_v38  ;;  %v2665_v47 = vadd.f32 %v2664_v44, %v5525_v21  ;;  %v4630_v48 = vpop.f32.mrb[130].mxu0 }
 0x407   : > { %v2748_v51 = vadd.f32 %v5530_v53, %v2673_v43  ;;  %v2676_v50 = vadd.f32 %v4630_v48, %v5525_v21  ;;  %v2667_v52 = vpop.f32.mrb[131].mxu0 }
 0x408   : > { %v2746_v54 = vadd.f32 %v5530_v53, %v2665_v47  ;;  %v2668_v55 = vadd.f32 %v2667_v52, %v5525_v21  ;;  %4691 = vmatprep.mubr.msk.bf16.mxu1 %vm677_vm2, %v2846_v46  ;;  %v5698_v21 = vld [vmem:[%s6027_s13] ss:$0 sm:$0xff] }
 0x409   : > { %v2749_v56 = vadd.f32 %v5530_v53, %v2676_v50  ;;  %4692 = vmatmul.mubr.msk.bf16.gmra.mrb[188].mxu1 %vm677_vm2, %v2847_v42  ;;  %v2812_v58 = vmax.f32 %v2748_v51, 0.0 }
 0x40a   : > { %v2747_v57 = vadd.f32 %v5530_v53, %v2668_v55  ;;  %v2810_v1 = vmax.f32 %v2746_v54, 0.0 }
 0x40b   : > { %v2813_v59 = vmax.f32 %v2749_v56, 0.0 }
 0x40c   : > { %v2811_v60 = vmax.f32 %v2747_v57, 0.0 }
 0x40d   : > { %v2849_v61 = vpack.c.bf16 %v2813_v59, %v2812_v58 }
 0x40e   : > { %v2848_v62 = vpack.c.bf16 %v2811_v60, %v2810_v1 }
 0x410   : > { %4695 = vmatprep.mubr.msk.bf16.mxu1 %vm677_vm2, %v2848_v62 }
 0x411   : > { %4696 = vmatmul.mubr.msk.bf16.gmra.mrb[192].mxu1 %vm677_vm2, %v2849_v61 }
 0x46c   : > { %v4637_v63 = vpop.f32.mrb[132].mxu1 }
 0x46d   : > { %v3008_v0 = vadd.f32 %v4637_v63, %v5698_v21  ;;  %v2999_v2 = vpop.f32.mrb[133].mxu1 }
 0x46e   : > { %v3000_v53 = vadd.f32 %v5698_v21, %v2999_v2  ;;  %v4638_v3 = vpop.f32.mrb[134].mxu1 }
 0x46f   : > { %v3011_v4 = vadd.f32 %v4638_v3, %v5698_v21  ;;  %v3002_v6 = vpop.f32.mrb[135].mxu1  ;;  %v3256_v8 = vmax.f32 %v3008_v0, 0.0 }
 0x470   : > { %v3003_v7 = vadd.f32 %v5698_v21, %v3002_v6  ;;  %v3254_v10 = vmax.f32 %v3000_v53, 0.0 }
 0x471   : > { %v3257_v9 = vmax.f32 %v3011_v4, 0.0 }
 0x472   : > { %v3255_v11 = vmax.f32 %v3003_v7, 0.0 }
 0x473   : > { %v3323_v12 = vpack.c.bf16 %v3257_v9, %v3256_v8 }
 0x474   : > { %v3322_v13 = vpack.c.bf16 %v3255_v11, %v3254_v10  ;;  %v4641_v14 = vpop.f32.mrb[136].mxu1 }
 0x475   : > { %v3024_v15 = vadd.f32 %v4641_v14, %v5698_v21  ;;  %v3015_v5 = vpop.f32.mrb[137].mxu1 }
 0x476   : > { %v3016_v16 = vadd.f32 %v5698_v21, %v3015_v5  ;;  %v4642_v17 = vpop.f32.mrb[138].mxu1  ;;  %4703 = vmatprep.mubr.msk.bf16.mxu0 %vm677_vm2, %v3322_v13 }
 0x477   : > { %v3027_v18 = vadd.f32 %v4642_v17, %v5698_v21  ;;  %v3018_v19 = vpop.f32.mrb[139].mxu1  ;;  %4704 = vmatmul.mubr.msk.bf16.vlgmr.msra.gmra.mrb[132].mxu0 %vm677_vm2, %v3323_v12  ;;  %v3260_v22 = vmax.f32 %v3024_v15, 0.0 }
 0x478   : > { %v3019_v20 = vadd.f32 %v5698_v21, %v3018_v19  ;;  %v3258_v24 = vmax.f32 %v3016_v16, 0.0 }
 0x479   : > { %v3261_v23 = vmax.f32 %v3027_v18, 0.0 }
 0x47a   : > { %v3259_v25 = vmax.f32 %v3019_v20, 0.0 }
 0x47b   : > { %v3325_v26 = vpack.c.bf16 %v3261_v23, %v3260_v22 }
 0x47c   : > { %v3324_v27 = vpack.c.bf16 %v3259_v25, %v3258_v24  ;;  %v4645_v28 = vpop.f32.mrb[140].mxu1 }
 0x47d   : > { %v3040_v45 = vadd.f32 %v4645_v28, %v5698_v21  ;;  %v3031_v49 = vpop.f32.mrb[141].mxu1 }
 0x47e   : > { %v3032_v39 = vadd.f32 %v5698_v21, %v3031_v49  ;;  %v4646_v29 = vpop.f32.mrb[142].mxu1  ;;  %4707 = vmatprep.mubr.msk.bf16.mxu0 %vm677_vm2, %v3324_v27 }
 0x47f   : > { %v3043_v30 = vadd.f32 %v4646_v29, %v5698_v21  ;;  %v3034_v31 = vpop.f32.mrb[143].mxu1  ;;  %4708 = vmatmul.mubr.msk.bf16.gmra.mrb[136].mxu0 %vm677_vm2, %v3325_v26  ;;  %v3264_v33 = vmax.f32 %v3040_v45, 0.0 }
 0x480   : > { %v3035_v32 = vadd.f32 %v5698_v21, %v3034_v31  ;;  %v3262_v35 = vmax.f32 %v3032_v39, 0.0 }
 0x481   : > { %v3265_v34 = vmax.f32 %v3043_v30, 0.0 }
 0x482   : > { %v3263_v36 = vmax.f32 %v3035_v32, 0.0 }
 0x483   : > { %v3327_v37 = vpack.c.bf16 %v3265_v34, %v3264_v33 }
 0x484   : > { %v3326_v38 = vpack.c.bf16 %v3263_v36, %v3262_v35  ;;  %v4649_v40 = vpop.f32.mrb[144].mxu1 }
 0x485   : > { %v3056_v41 = vadd.f32 %v4649_v40, %v5698_v21  ;;  %v3047_v42 = vpop.f32.mrb[145].mxu1 }
 0x486   : > { %v3048_v43 = vadd.f32 %v5698_v21, %v3047_v42  ;;  %v4650_v44 = vpop.f32.mrb[146].mxu1  ;;  %4711 = vmatprep.mubr.msk.bf16.mxu0 %vm677_vm2, %v3326_v38 }
 0x487   : > { %v3059_v46 = vadd.f32 %v4650_v44, %v5698_v21  ;;  %v3050_v47 = vpop.f32.mrb[147].mxu1  ;;  %4712 = vmatmul.mubr.msk.bf16.gmra.mrb[140].mxu0 %vm677_vm2, %v3327_v37  ;;  %v3268_v51 = vmax.f32 %v3056_v41, 0.0 }
 0x488   : > { %v3051_v48 = vadd.f32 %v5698_v21, %v3050_v47  ;;  %v3266_v52 = vmax.f32 %v3048_v43, 0.0 }
 0x489   : > { %v3269_v50 = vmax.f32 %v3059_v46, 0.0 }
 0x48a   : > { %v3267_v54 = vmax.f32 %v3051_v48, 0.0 }
 0x48b   : > { %v3329_v55 = vpack.c.bf16 %v3269_v50, %v3268_v51 }
 0x48c   : > { %v3328_v56 = vpack.c.bf16 %v3267_v54, %v3266_v52  ;;  %v4653_v57 = vpop.f32.mrb[148].mxu1 }
 0x48d   : > { %v3072_v58 = vadd.f32 %v4653_v57, %v5698_v21  ;;  %v3063_v59 = vpop.f32.mrb[149].mxu1 }
 0x48e   : > { %v3064_v1 = vadd.f32 %v5698_v21, %v3063_v59  ;;  %v4654_v60 = vpop.f32.mrb[150].mxu1  ;;  %4715 = vmatprep.mubr.msk.bf16.mxu0 %vm677_vm2, %v3328_v56 }
 0x48f   : > { %v3075_v61 = vadd.f32 %v4654_v60, %v5698_v21  ;;  %v3066_v62 = vpop.f32.mrb[151].mxu1  ;;  %4716 = vmatmul.mubr.msk.bf16.gmra.mrb[144].mxu0 %vm677_vm2, %v3329_v55  ;;  %v3272_v0 = vmax.f32 %v3072_v58, 0.0 }
 0x490   : > { %v3067_v63 = vadd.f32 %v5698_v21, %v3066_v62  ;;  %v3270_v53 = vmax.f32 %v3064_v1, 0.0 }
 0x491   : > { %v3273_v2 = vmax.f32 %v3075_v61, 0.0 }
 0x492   : > { %v3271_v3 = vmax.f32 %v3067_v63, 0.0 }
 0x493   : > { %v3331_v4 = vpack.c.bf16 %v3273_v2, %v3272_v0 }
 0x494   : > { %v3330_v6 = vpack.c.bf16 %v3271_v3, %v3270_v53  ;;  %v4657_v7 = vpop.f32.mrb[152].mxu1 }
 0x495   : > { %v3088_v8 = vadd.f32 %v4657_v7, %v5698_v21  ;;  %v3079_v9 = vpop.f32.mrb[153].mxu1 }
 0x496   : > { %v3080_v10 = vadd.f32 %v5698_v21, %v3079_v9  ;;  %v4658_v11 = vpop.f32.mrb[154].mxu1  ;;  %4719 = vmatprep.mubr.msk.bf16.mxu0 %vm677_vm2, %v3330_v6 }
 0x497   : > { %v3091_v12 = vadd.f32 %v4658_v11, %v5698_v21  ;;  %v3082_v13 = vpop.f32.mrb[155].mxu1  ;;  %4720 = vmatmul.mubr.msk.bf16.gmra.mrb[148].mxu0 %vm677_vm2, %v3331_v4  ;;  %v3276_v15 = vmax.f32 %v3088_v8, 0.0 }
 0x498   : > { %v3083_v14 = vadd.f32 %v5698_v21, %v3082_v13  ;;  %v3274_v16 = vmax.f32 %v3080_v10, 0.0 }
 0x499   : > { %v3277_v5 = vmax.f32 %v3091_v12, 0.0 }
 0x49a   : > { %v3275_v17 = vmax.f32 %v3083_v14, 0.0 }
 0x49b   : > { %v3333_v18 = vpack.c.bf16 %v3277_v5, %v3276_v15 }
 0x49c   : > { %v3332_v19 = vpack.c.bf16 %v3275_v17, %v3274_v16  ;;  %v4661_v20 = vpop.f32.mrb[156].mxu1 }
 0x49d   : > { %v3104_v22 = vadd.f32 %v4661_v20, %v5698_v21  ;;  %v3095_v23 = vpop.f32.mrb[157].mxu1 }
 0x49e   : > { %v3096_v24 = vadd.f32 %v5698_v21, %v3095_v23  ;;  %v4662_v25 = vpop.f32.mrb[158].mxu1  ;;  %4723 = vmatprep.mubr.msk.bf16.mxu0 %vm677_vm2, %v3332_v19 }
 0x49f   : > { %v3107_v26 = vadd.f32 %v4662_v25, %v5698_v21  ;;  %v3098_v27 = vpop.f32.mrb[159].mxu1  ;;  %4724 = vmatmul.mubr.msk.bf16.gmra.mrb[152].mxu0 %vm677_vm2, %v3333_v18  ;;  %v3280_v45 = vmax.f32 %v3104_v22, 0.0 }
 0x4a0   : > { %v3099_v28 = vadd.f32 %v5698_v21, %v3098_v27  ;;  %v3278_v39 = vmax.f32 %v3096_v24, 0.0 }
 0x4a1   : > { %v3281_v49 = vmax.f32 %v3107_v26, 0.0 }
 0x4a2   : > { %v3279_v29 = vmax.f32 %v3099_v28, 0.0 }
 0x4a3   : > { %v3335_v30 = vpack.c.bf16 %v3281_v49, %v3280_v45 }
 0x4a4   : > { %v3334_v31 = vpack.c.bf16 %v3279_v29, %v3278_v39  ;;  %v4665_v32 = vpop.f32.mrb[160].mxu1 }
 0x4a5   : > { %v3120_v33 = vadd.f32 %v4665_v32, %v5698_v21  ;;  %v3111_v34 = vpop.f32.mrb[161].mxu1 }
 0x4a6   : > { %v3112_v35 = vadd.f32 %v5698_v21, %v3111_v34  ;;  %v4666_v36 = vpop.f32.mrb[162].mxu1  ;;  %4727 = vmatprep.mubr.msk.bf16.mxu0 %vm677_vm2, %v3334_v31 }
 0x4a7   : > { %v3123_v37 = vadd.f32 %v4666_v36, %v5698_v21  ;;  %v3114_v38 = vpop.f32.mrb[163].mxu1  ;;  %4728 = vmatmul.mubr.msk.bf16.gmra.mrb[156].mxu0 %vm677_vm2, %v3335_v30  ;;  %v3284_v41 = vmax.f32 %v3120_v33, 0.0 }
 0x4a8   : > { %v3115_v40 = vadd.f32 %v5698_v21, %v3114_v38  ;;  %v3282_v43 = vmax.f32 %v3112_v35, 0.0 }
 0x4a9   : > { %v3285_v42 = vmax.f32 %v3123_v37, 0.0 }
 0x4aa   : > { %v3283_v44 = vmax.f32 %v3115_v40, 0.0 }
 0x4ab   : > { %v3337_v46 = vpack.c.bf16 %v3285_v42, %v3284_v41 }
 0x4ac   : > { %v3336_v47 = vpack.c.bf16 %v3283_v44, %v3282_v43  ;;  %v4669_v48 = vpop.f32.mrb[164].mxu1 }
 0x4ad   : > { %v3136_v51 = vadd.f32 %v4669_v48, %v5698_v21  ;;  %v3127_v50 = vpop.f32.mrb[165].mxu1 }
 0x4ae   : > { %v3128_v52 = vadd.f32 %v5698_v21, %v3127_v50  ;;  %v4670_v54 = vpop.f32.mrb[166].mxu1  ;;  %4731 = vmatprep.mubr.msk.bf16.mxu0 %vm677_vm2, %v3336_v47 }
 0x4af   : > { %v3139_v55 = vadd.f32 %v4670_v54, %v5698_v21  ;;  %v3130_v56 = vpop.f32.mrb[167].mxu1  ;;  %4732 = vmatmul.mubr.msk.bf16.gmra.mrb[160].mxu0 %vm677_vm2, %v3337_v46  ;;  %v3288_v58 = vmax.f32 %v3136_v51, 0.0 }
 0x4b0   : > { %v3131_v57 = vadd.f32 %v5698_v21, %v3130_v56  ;;  %v3286_v1 = vmax.f32 %v3128_v52, 0.0 }
 0x4b1   : > { %v3289_v59 = vmax.f32 %v3139_v55, 0.0 }
 0x4b2   : > { %v3287_v60 = vmax.f32 %v3131_v57, 0.0 }
 0x4b3   : > { %v3339_v61 = vpack.c.bf16 %v3289_v59, %v3288_v58 }
 0x4b4   : > { %v3338_v62 = vpack.c.bf16 %v3287_v60, %v3286_v1  ;;  %v4673_v63 = vpop.f32.mrb[168].mxu1 }
 0x4b5   : > { %v3152_v0 = vadd.f32 %v4673_v63, %v5698_v21  ;;  %v3143_v2 = vpop.f32.mrb[169].mxu1 }
 0x4b6   : > { %v3144_v53 = vadd.f32 %v5698_v21, %v3143_v2  ;;  %v4674_v3 = vpop.f32.mrb[170].mxu1  ;;  %4735 = vmatprep.mubr.msk.bf16.mxu0 %vm677_vm2, %v3338_v62 }
 0x4b7   : > { %v3155_v4 = vadd.f32 %v4674_v3, %v5698_v21  ;;  %v3146_v6 = vpop.f32.mrb[171].mxu1  ;;  %4736 = vmatmul.mubr.msk.bf16.gmra.mrb[164].mxu0 %vm677_vm2, %v3339_v61  ;;  %v3292_v8 = vmax.f32 %v3152_v0, 0.0 }
 0x4b8   : > { %v3147_v7 = vadd.f32 %v5698_v21, %v3146_v6  ;;  %v3290_v10 = vmax.f32 %v3144_v53, 0.0 }
 0x4b9   : > { %v3293_v9 = vmax.f32 %v3155_v4, 0.0 }
 0x4ba   : > { %v3291_v11 = vmax.f32 %v3147_v7, 0.0 }
 0x4bb   : > { %v3341_v12 = vpack.c.bf16 %v3293_v9, %v3292_v8 }
 0x4bc   : > { %v3340_v13 = vpack.c.bf16 %v3291_v11, %v3290_v10  ;;  %v4677_v14 = vpop.f32.mrb[172].mxu1 }
 0x4bd   : > { %v3168_v15 = vadd.f32 %v4677_v14, %v5698_v21  ;;  %v3159_v5 = vpop.f32.mrb[173].mxu1 }
 0x4be   : > { %v3160_v16 = vadd.f32 %v5698_v21, %v3159_v5  ;;  %v4678_v17 = vpop.f32.mrb[174].mxu1  ;;  %4739 = vmatprep.mubr.msk.bf16.mxu0 %vm677_vm2, %v3340_v13 }
 0x4bf   : > { %v3171_v18 = vadd.f32 %v4678_v17, %v5698_v21  ;;  %v3162_v19 = vpop.f32.mrb[175].mxu1  ;;  %4740 = vmatmul.mubr.msk.bf16.gmra.mrb[168].mxu0 %vm677_vm2, %v3341_v12  ;;  %v3296_v22 = vmax.f32 %v3168_v15, 0.0 }
 0x4c0   : > { %v3163_v20 = vadd.f32 %v5698_v21, %v3162_v19  ;;  %v3294_v24 = vmax.f32 %v3160_v16, 0.0 }
 0x4c1   : > { %v3297_v23 = vmax.f32 %v3171_v18, 0.0 }
 0x4c2   : > { %v3295_v25 = vmax.f32 %v3163_v20, 0.0 }
 0x4c3   : > { %v3343_v26 = vpack.c.bf16 %v3297_v23, %v3296_v22 }
 0x4c4   : > { %v3342_v27 = vpack.c.bf16 %v3295_v25, %v3294_v24  ;;  %v4681_v28 = vpop.f32.mrb[176].mxu1 }
 0x4c5   : > { %v3184_v45 = vadd.f32 %v4681_v28, %v5698_v21  ;;  %v3175_v49 = vpop.f32.mrb[177].mxu1 }
 0x4c6   : > { %v3176_v39 = vadd.f32 %v5698_v21, %v3175_v49  ;;  %v4682_v29 = vpop.f32.mrb[178].mxu1  ;;  %4743 = vmatprep.mubr.msk.bf16.mxu0 %vm677_vm2, %v3342_v27 }
 0x4c7   : > { %v3187_v30 = vadd.f32 %v4682_v29, %v5698_v21  ;;  %v3178_v31 = vpop.f32.mrb[179].mxu1  ;;  %4744 = vmatmul.mubr.msk.bf16.gmra.mrb[172].mxu0 %vm677_vm2, %v3343_v26  ;;  %v3300_v33 = vmax.f32 %v3184_v45, 0.0 }
 0x4c8   : > { %v3179_v32 = vadd.f32 %v5698_v21, %v3178_v31  ;;  %v3298_v35 = vmax.f32 %v3176_v39, 0.0 }
 0x4c9   : > { %v3301_v34 = vmax.f32 %v3187_v30, 0.0 }
 0x4ca   : > { %v3299_v36 = vmax.f32 %v3179_v32, 0.0  ;;  %v5800_v32 = vld [vmem:[%s6029_s15] ss:$0 sm:$0xff] }
 0x4cb   : > { %v3345_v37 = vpack.c.bf16 %v3301_v34, %v3300_v33 }
 0x4cc   : > { %v3344_v38 = vpack.c.bf16 %v3299_v36, %v3298_v35  ;;  %v4685_v40 = vpop.f32.mrb[180].mxu1 }
 0x4cd   : > { %v3200_v41 = vadd.f32 %v4685_v40, %v5698_v21  ;;  %v3191_v42 = vpop.f32.mrb[181].mxu1 }
 0x4ce   : > { %v3192_v43 = vadd.f32 %v5698_v21, %v3191_v42  ;;  %v4686_v44 = vpop.f32.mrb[182].mxu1  ;;  %4747 = vmatprep.mubr.msk.bf16.mxu0 %vm677_vm2, %v3344_v38 }
 0x4cf   : > { %v3203_v46 = vadd.f32 %v4686_v44, %v5698_v21  ;;  %v3194_v47 = vpop.f32.mrb[183].mxu1  ;;  %4748 = vmatmul.mubr.msk.bf16.gmra.mrb[176].mxu0 %vm677_vm2, %v3345_v37  ;;  %v3304_v51 = vmax.f32 %v3200_v41, 0.0 }
 0x4d0   : > { %v3195_v48 = vadd.f32 %v5698_v21, %v3194_v47  ;;  %v3302_v52 = vmax.f32 %v3192_v43, 0.0 }
 0x4d1   : > { %v3305_v50 = vmax.f32 %v3203_v46, 0.0 }
 0x4d2   : > { %v3303_v54 = vmax.f32 %v3195_v48, 0.0 }
 0x4d3   : > { %v3347_v55 = vpack.c.bf16 %v3305_v50, %v3304_v51 }
 0x4d4   : > { %v3346_v56 = vpack.c.bf16 %v3303_v54, %v3302_v52  ;;  %v4689_v57 = vpop.f32.mrb[184].mxu1 }
 0x4d5   : > { %v3216_v58 = vadd.f32 %v4689_v57, %v5698_v21  ;;  %v3207_v59 = vpop.f32.mrb[185].mxu1 }
 0x4d6   : > { %v3208_v1 = vadd.f32 %v5698_v21, %v3207_v59  ;;  %v4690_v60 = vpop.f32.mrb[186].mxu1  ;;  %4751 = vmatprep.mubr.msk.bf16.mxu0 %vm677_vm2, %v3346_v56 }
 0x4d7   : > { %v3219_v61 = vadd.f32 %v4690_v60, %v5698_v21  ;;  %v3210_v62 = vpop.f32.mrb[187].mxu1  ;;  %4752 = vmatmul.mubr.msk.bf16.gmra.mrb[180].mxu0 %vm677_vm2, %v3347_v55  ;;  %v3308_v0 = vmax.f32 %v3216_v58, 0.0 }
 0x4d8   : > { %v3211_v63 = vadd.f32 %v5698_v21, %v3210_v62  ;;  %v3306_v53 = vmax.f32 %v3208_v1, 0.0 }
 0x4d9   : > { %v3309_v2 = vmax.f32 %v3219_v61, 0.0 }
 0x4da   : > { %v3307_v3 = vmax.f32 %v3211_v63, 0.0 }
 0x4db   : > { %v3349_v4 = vpack.c.bf16 %v3309_v2, %v3308_v0 }
 0x4dc   : > { %v3348_v6 = vpack.c.bf16 %v3307_v3, %v3306_v53  ;;  %v4693_v7 = vpop.f32.mrb[188].mxu1 }
 0x4dd   : > { %v3232_v8 = vadd.f32 %v4693_v7, %v5698_v21  ;;  %v3223_v9 = vpop.f32.mrb[189].mxu1 }
 0x4de   : > { %v3224_v10 = vadd.f32 %v5698_v21, %v3223_v9  ;;  %v4694_v11 = vpop.f32.mrb[190].mxu1  ;;  %4755 = vmatprep.mubr.msk.bf16.mxu0 %vm677_vm2, %v3348_v6 }
 0x4df   : > { %v3235_v12 = vadd.f32 %v4694_v11, %v5698_v21  ;;  %v3226_v13 = vpop.f32.mrb[191].mxu1  ;;  %4756 = vmatmul.mubr.msk.bf16.gmra.mrb[184].mxu0 %vm677_vm2, %v3349_v4  ;;  %v3312_v15 = vmax.f32 %v3232_v8, 0.0 }
 0x4e0   : > { %v3227_v14 = vadd.f32 %v5698_v21, %v3226_v13  ;;  %v3310_v16 = vmax.f32 %v3224_v10, 0.0 }
 0x4e1   : > { %v3313_v5 = vmax.f32 %v3235_v12, 0.0 }
 0x4e2   : > { %v3311_v17 = vmax.f32 %v3227_v14, 0.0 }
 0x4e3   : > { %v3351_v18 = vpack.c.bf16 %v3313_v5, %v3312_v15 }
 0x4e4   : > { %v3350_v19 = vpack.c.bf16 %v3311_v17, %v3310_v16  ;;  %v4697_v20 = vpop.f32.mrb[192].mxu1 }
 0x4e5   : > { %v3248_v22 = vadd.f32 %v4697_v20, %v5698_v21  ;;  %v3239_v23 = vpop.f32.mrb[193].mxu1 }
 0x4e6   : > { %v3240_v24 = vadd.f32 %v5698_v21, %v3239_v23  ;;  %v4698_v25 = vpop.f32.mrb[194].mxu1  ;;  %4759 = vmatprep.mubr.msk.bf16.mxu0 %vm677_vm2, %v3350_v19 }
 0x4e7   : > { %v3251_v26 = vadd.f32 %v4698_v25, %v5698_v21  ;;  %v3242_v27 = vpop.f32.mrb[195].mxu1  ;;  %4760 = vmatmul.mubr.msk.bf16.gmra.mrb[188].mxu0 %vm677_vm2, %v3351_v18  ;;  %v3316_v45 = vmax.f32 %v3248_v22, 0.0 }
 0x4e8   : > { %v3243_v28 = vadd.f32 %v5698_v21, %v3242_v27  ;;  %v3314_v39 = vmax.f32 %v3240_v24, 0.0 }
 0x4e9   : > { %v3317_v49 = vmax.f32 %v3251_v26, 0.0 }
 0x4ea   : > { %v3315_v29 = vmax.f32 %v3243_v28, 0.0 }
 0x4eb   : > { %v3353_v30 = vpack.c.bf16 %v3317_v49, %v3316_v45 }
 0x4ec   : > { %v3352_v31 = vpack.c.bf16 %v3315_v29, %v3314_v39 }
 0x4ee   : > { %4763 = vmatprep.mubr.msk.bf16.mxu0 %vm677_vm2, %v3352_v31 }
 0x4ef   : > { %4764 = vmatmul.mubr.msk.bf16.gmra.mrb[192].mxu0 %vm677_vm2, %v3353_v30 }
 0x54a   : > { %v4705_v21 = vpop.f32.mrb[132].mxu0 }
 0x54b   : > { %v3512_v33 = vadd.f32 %v4705_v21, %v5800_v32  ;;  %v3503_v34 = vpop.f32.mrb[133].mxu0 }
 0x54c   : > { %v3504_v35 = vadd.f32 %v5800_v32, %v3503_v34  ;;  %v4706_v36 = vpop.f32.mrb[134].mxu0 }
 0x54d   : > { %3760 = vst.msk [vmem:[%s5805_s22 + $0x10] sm:$0xff] %vm2287_vm5, %v3512_v33  ;;  %v3515_v37 = vadd.f32 %v4706_v36, %v5800_v32  ;;  %v3506_v38 = vpop.f32.mrb[135].mxu0 }
 0x54e   : > { %3758 = vst.msk [vmem:[%s5805_s22] sm:$0xff] %vm2287_vm5, %v3504_v35  ;;  %v3507_v40 = vadd.f32 %v5800_v32, %v3506_v38 }
 0x54f   : > { %3761 = vst.msk [vmem:[%s5805_s22 + $0x18] sm:$0xff] %vm2287_vm5, %v3515_v37 }
 0x550   : > { %3759 = vst.msk [vmem:[%s5805_s22 + $0x8] sm:$0xff] %vm2287_vm5, %v3507_v40 }
 0x552   : > { %v4709_v41 = vpop.f32.mrb[136].mxu0 }
 0x553   : > { %v3528_v42 = vadd.f32 %v4709_v41, %v5800_v32  ;;  %v3519_v43 = vpop.f32.mrb[137].mxu0 }
 0x554   : > { %v3520_v44 = vadd.f32 %v5800_v32, %v3519_v43  ;;  %v4710_v46 = vpop.f32.mrb[138].mxu0 }
 0x555   : > { %3764 = vst.msk [vmem:[%s5805_s22 + $0x30] sm:$0xff] %vm2287_vm5, %v3528_v42  ;;  %v3531_v47 = vadd.f32 %v4710_v46, %v5800_v32  ;;  %v3522_v48 = vpop.f32.mrb[139].mxu0 }
 0x556   : > { %3762 = vst.msk [vmem:[%s5805_s22 + $0x20] sm:$0xff] %vm2287_vm5, %v3520_v44  ;;  %v3523_v51 = vadd.f32 %v5800_v32, %v3522_v48 }
 0x557   : > { %3765 = vst.msk [vmem:[%s5805_s22 + $0x38] sm:$0xff] %vm2287_vm5, %v3531_v47 }
 0x558   : > { %3763 = vst.msk [vmem:[%s5805_s22 + $0x28] sm:$0xff] %vm2287_vm5, %v3523_v51 }
 0x55a   : > { %v4713_v50 = vpop.f32.mrb[140].mxu0 }
 0x55b   : > { %v3544_v52 = vadd.f32 %v4713_v50, %v5800_v32  ;;  %v3535_v54 = vpop.f32.mrb[141].mxu0 }
 0x55c   : > { %v3536_v55 = vadd.f32 %v5800_v32, %v3535_v54  ;;  %v4714_v56 = vpop.f32.mrb[142].mxu0 }
 0x55d   : > { %3768 = vst.msk [vmem:[%s5805_s22 + $0x50] sm:$0xff] %vm2287_vm5, %v3544_v52  ;;  %v3547_v57 = vadd.f32 %v4714_v56, %v5800_v32  ;;  %v3538_v58 = vpop.f32.mrb[143].mxu0 }
 0x55e   : > { %3766 = vst.msk [vmem:[%s5805_s22 + $0x40] sm:$0xff] %vm2287_vm5, %v3536_v55  ;;  %v3539_v59 = vadd.f32 %v5800_v32, %v3538_v58 }
 0x55f   : > { %3769 = vst.msk [vmem:[%s5805_s22 + $0x58] sm:$0xff] %vm2287_vm5, %v3547_v57 }
 0x560   : > { %3767 = vst.msk [vmem:[%s5805_s22 + $0x48] sm:$0xff] %vm2287_vm5, %v3539_v59 }
 0x562   : > { %v4717_v1 = vpop.f32.mrb[144].mxu0 }
 0x563   : > { %v3560_v60 = vadd.f32 %v4717_v1, %v5800_v32  ;;  %v3551_v61 = vpop.f32.mrb[145].mxu0 }
 0x564   : > { %v3552_v62 = vadd.f32 %v5800_v32, %v3551_v61  ;;  %v4718_v63 = vpop.f32.mrb[146].mxu0 }
 0x565   : > { %3772 = vst.msk [vmem:[%s5805_s22 + $0x70] sm:$0xff] %vm2287_vm5, %v3560_v60  ;;  %v3563_v0 = vadd.f32 %v4718_v63, %v5800_v32  ;;  %v3554_v2 = vpop.f32.mrb[147].mxu0 }
 0x566   : > { %3770 = vst.msk [vmem:[%s5805_s22 + $0x60] sm:$0xff] %vm2287_vm5, %v3552_v62  ;;  %v3555_v53 = vadd.f32 %v5800_v32, %v3554_v2 }
 0x567   : > { %3773 = vst.msk [vmem:[%s5805_s22 + $0x78] sm:$0xff] %vm2287_vm5, %v3563_v0 }
 0x568   : > { %3771 = vst.msk [vmem:[%s5805_s22 + $0x68] sm:$0xff] %vm2287_vm5, %v3555_v53 }
 0x56a   : > { %v4721_v3 = vpop.f32.mrb[148].mxu0 }
 0x56b   : > { %v3576_v4 = vadd.f32 %v4721_v3, %v5800_v32  ;;  %v3567_v6 = vpop.f32.mrb[149].mxu0 }
 0x56c   : > { %v3568_v7 = vadd.f32 %v5800_v32, %v3567_v6  ;;  %v4722_v8 = vpop.f32.mrb[150].mxu0 }
 0x56d   : > { %3776 = vst.msk [vmem:[%s5805_s22 + $0x90] sm:$0xff] %vm2287_vm5, %v3576_v4  ;;  %v3579_v9 = vadd.f32 %v4722_v8, %v5800_v32  ;;  %v3570_v10 = vpop.f32.mrb[151].mxu0 }
 0x56e   : > { %3774 = vst.msk [vmem:[%s5805_s22 + $0x80] sm:$0xff] %vm2287_vm5, %v3568_v7  ;;  %v3571_v11 = vadd.f32 %v5800_v32, %v3570_v10 }
 0x56f   : > { %3777 = vst.msk [vmem:[%s5805_s22 + $0x98] sm:$0xff] %vm2287_vm5, %v3579_v9 }
 0x570   : > { %3775 = vst.msk [vmem:[%s5805_s22 + $0x88] sm:$0xff] %vm2287_vm5, %v3571_v11 }
 0x572   : > { %v4725_v12 = vpop.f32.mrb[152].mxu0 }
 0x573   : > { %v3592_v13 = vadd.f32 %v4725_v12, %v5800_v32  ;;  %v3583_v14 = vpop.f32.mrb[153].mxu0 }
 0x574   : > { %v3584_v15 = vadd.f32 %v5800_v32, %v3583_v14  ;;  %v4726_v5 = vpop.f32.mrb[154].mxu0 }
 0x575   : > { %3780 = vst.msk [vmem:[%s5805_s22 + $0xb0] sm:$0xff] %vm2287_vm5, %v3592_v13  ;;  %v3595_v16 = vadd.f32 %v4726_v5, %v5800_v32  ;;  %v3586_v17 = vpop.f32.mrb[155].mxu0 }
 0x576   : > { %3778 = vst.msk [vmem:[%s5805_s22 + $0xa0] sm:$0xff] %vm2287_vm5, %v3584_v15  ;;  %v3587_v18 = vadd.f32 %v5800_v32, %v3586_v17 }
 0x577   : > { %3781 = vst.msk [vmem:[%s5805_s22 + $0xb8] sm:$0xff] %vm2287_vm5, %v3595_v16 }
 0x578   : > { %3779 = vst.msk [vmem:[%s5805_s22 + $0xa8] sm:$0xff] %vm2287_vm5, %v3587_v18 }
 0x57a   : > { %v4729_v19 = vpop.f32.mrb[156].mxu0 }
 0x57b   : > { %v3608_v20 = vadd.f32 %v4729_v19, %v5800_v32  ;;  %v3599_v22 = vpop.f32.mrb[157].mxu0 }
 0x57c   : > { %v3600_v23 = vadd.f32 %v5800_v32, %v3599_v22  ;;  %v4730_v24 = vpop.f32.mrb[158].mxu0 }
 0x57d   : > { %3784 = vst.msk [vmem:[%s5805_s22 + $0xd0] sm:$0xff] %vm2287_vm5, %v3608_v20  ;;  %v3611_v25 = vadd.f32 %v4730_v24, %v5800_v32  ;;  %v3602_v26 = vpop.f32.mrb[159].mxu0 }
 0x57e   : > { %3782 = vst.msk [vmem:[%s5805_s22 + $0xc0] sm:$0xff] %vm2287_vm5, %v3600_v23  ;;  %v3603_v27 = vadd.f32 %v5800_v32, %v3602_v26 }
 0x57f   : > { %3785 = vst.msk [vmem:[%s5805_s22 + $0xd8] sm:$0xff] %vm2287_vm5, %v3611_v25 }
 0x580   : > { %3783 = vst.msk [vmem:[%s5805_s22 + $0xc8] sm:$0xff] %vm2287_vm5, %v3603_v27 }
 0x582   : > { %v4733_v28 = vpop.f32.mrb[160].mxu0 }
 0x583   : > { %v3624_v45 = vadd.f32 %v4733_v28, %v5800_v32  ;;  %v3615_v49 = vpop.f32.mrb[161].mxu0 }
 0x584   : > { %v3616_v39 = vadd.f32 %v5800_v32, %v3615_v49  ;;  %v4734_v29 = vpop.f32.mrb[162].mxu0 }
 0x585   : > { %3788 = vst.msk [vmem:[%s5805_s22 + $0xf0] sm:$0xff] %vm2287_vm5, %v3624_v45  ;;  %v3627_v30 = vadd.f32 %v4734_v29, %v5800_v32  ;;  %v3618_v31 = vpop.f32.mrb[163].mxu0 }
 0x586   : > { %3786 = vst.msk [vmem:[%s5805_s22 + $0xe0] sm:$0xff] %vm2287_vm5, %v3616_v39  ;;  %v3619_v21 = vadd.f32 %v5800_v32, %v3618_v31 }
 0x587   : > { %3789 = vst.msk [vmem:[%s5805_s22 + $0xf8] sm:$0xff] %vm2287_vm5, %v3627_v30 }
 0x588   : > { %3787 = vst.msk [vmem:[%s5805_s22 + $0xe8] sm:$0xff] %vm2287_vm5, %v3619_v21 }
 0x58a   : > { %v4737_v33 = vpop.f32.mrb[164].mxu0 }
 0x58b   : > { %v3640_v34 = vadd.f32 %v4737_v33, %v5800_v32  ;;  %v3631_v35 = vpop.f32.mrb[165].mxu0 }
 0x58c   : > { %v3632_v36 = vadd.f32 %v5800_v32, %v3631_v35  ;;  %v4738_v37 = vpop.f32.mrb[166].mxu0 }
 0x58d   : > { %3792 = vst.msk [vmem:[%s5805_s22 + $0x110] sm:$0xff] %vm2287_vm5, %v3640_v34  ;;  %v3643_v38 = vadd.f32 %v4738_v37, %v5800_v32  ;;  %v3634_v40 = vpop.f32.mrb[167].mxu0 }
 0x58e   : > { %3790 = vst.msk [vmem:[%s5805_s22 + $0x100] sm:$0xff] %vm2287_vm5, %v3632_v36  ;;  %v3635_v41 = vadd.f32 %v5800_v32, %v3634_v40 }
 0x58f   : > { %3793 = vst.msk [vmem:[%s5805_s22 + $0x118] sm:$0xff] %vm2287_vm5, %v3643_v38 }
 0x590   : > { %3791 = vst.msk [vmem:[%s5805_s22 + $0x108] sm:$0xff] %vm2287_vm5, %v3635_v41 }
 0x592   : > { %v4741_v42 = vpop.f32.mrb[168].mxu0 }
 0x593   : > { %v3656_v43 = vadd.f32 %v4741_v42, %v5800_v32  ;;  %v3647_v44 = vpop.f32.mrb[169].mxu0 }
 0x594   : > { %v3648_v46 = vadd.f32 %v5800_v32, %v3647_v44  ;;  %v4742_v47 = vpop.f32.mrb[170].mxu0 }
 0x595   : > { %3796 = vst.msk [vmem:[%s5805_s22 + $0x130] sm:$0xff] %vm2287_vm5, %v3656_v43  ;;  %v3659_v48 = vadd.f32 %v4742_v47, %v5800_v32  ;;  %v3650_v51 = vpop.f32.mrb[171].mxu0 }
 0x596   : > { %3794 = vst.msk [vmem:[%s5805_s22 + $0x120] sm:$0xff] %vm2287_vm5, %v3648_v46  ;;  %v3651_v50 = vadd.f32 %v5800_v32, %v3650_v51 }
 0x597   : > { %3797 = vst.msk [vmem:[%s5805_s22 + $0x138] sm:$0xff] %vm2287_vm5, %v3659_v48 }
 0x598   : > { %3795 = vst.msk [vmem:[%s5805_s22 + $0x128] sm:$0xff] %vm2287_vm5, %v3651_v50 }
 0x59a   : > { %v4745_v52 = vpop.f32.mrb[172].mxu0 }
 0x59b   : > { %v3672_v54 = vadd.f32 %v4745_v52, %v5800_v32  ;;  %v3663_v55 = vpop.f32.mrb[173].mxu0 }
 0x59c   : > { %v3664_v56 = vadd.f32 %v5800_v32, %v3663_v55  ;;  %v4746_v57 = vpop.f32.mrb[174].mxu0 }
 0x59d   : > { %3800 = vst.msk [vmem:[%s5805_s22 + $0x150] sm:$0xff] %vm2287_vm5, %v3672_v54  ;;  %v3675_v58 = vadd.f32 %v4746_v57, %v5800_v32  ;;  %v3666_v59 = vpop.f32.mrb[175].mxu0 }
 0x59e   : > { %3798 = vst.msk [vmem:[%s5805_s22 + $0x140] sm:$0xff] %vm2287_vm5, %v3664_v56  ;;  %v3667_v1 = vadd.f32 %v5800_v32, %v3666_v59 }
 0x59f   : > { %3801 = vst.msk [vmem:[%s5805_s22 + $0x158] sm:$0xff] %vm2287_vm5, %v3675_v58 }
 0x5a0   : > { %3799 = vst.msk [vmem:[%s5805_s22 + $0x148] sm:$0xff] %vm2287_vm5, %v3667_v1 }
 0x5a2   : > { %v4749_v60 = vpop.f32.mrb[176].mxu0 }
 0x5a3   : > { %v3688_v61 = vadd.f32 %v4749_v60, %v5800_v32  ;;  %v3679_v62 = vpop.f32.mrb[177].mxu0 }
 0x5a4   : > { %v3680_v63 = vadd.f32 %v5800_v32, %v3679_v62  ;;  %v4750_v0 = vpop.f32.mrb[178].mxu0 }
 0x5a5   : > { %3804 = vst.msk [vmem:[%s5805_s22 + $0x170] sm:$0xff] %vm2287_vm5, %v3688_v61  ;;  %v3691_v2 = vadd.f32 %v4750_v0, %v5800_v32  ;;  %v3682_v53 = vpop.f32.mrb[179].mxu0 }
 0x5a6   : > { %3802 = vst.msk [vmem:[%s5805_s22 + $0x160] sm:$0xff] %vm2287_vm5, %v3680_v63  ;;  %v3683_v3 = vadd.f32 %v5800_v32, %v3682_v53 }
 0x5a7   : > { %3805 = vst.msk [vmem:[%s5805_s22 + $0x178] sm:$0xff] %vm2287_vm5, %v3691_v2 }
 0x5a8   : > { %3803 = vst.msk [vmem:[%s5805_s22 + $0x168] sm:$0xff] %vm2287_vm5, %v3683_v3 }
 0x5aa   : > { %v4753_v4 = vpop.f32.mrb[180].mxu0 }
 0x5ab   : > { %v3704_v6 = vadd.f32 %v4753_v4, %v5800_v32  ;;  %v3695_v7 = vpop.f32.mrb[181].mxu0 }
 0x5ac   : > { %v3696_v8 = vadd.f32 %v5800_v32, %v3695_v7  ;;  %v4754_v9 = vpop.f32.mrb[182].mxu0 }
 0x5ad   : > { %3808 = vst.msk [vmem:[%s5805_s22 + $0x190] sm:$0xff] %vm2287_vm5, %v3704_v6  ;;  %v3707_v10 = vadd.f32 %v4754_v9, %v5800_v32  ;;  %v3698_v11 = vpop.f32.mrb[183].mxu0 }
 0x5ae   : > { %3806 = vst.msk [vmem:[%s5805_s22 + $0x180] sm:$0xff] %vm2287_vm5, %v3696_v8  ;;  %v3699_v12 = vadd.f32 %v5800_v32, %v3698_v11 }
 0x5af   : > { %3809 = vst.msk [vmem:[%s5805_s22 + $0x198] sm:$0xff] %vm2287_vm5, %v3707_v10 }
 0x5b0   : > { %3807 = vst.msk [vmem:[%s5805_s22 + $0x188] sm:$0xff] %vm2287_vm5, %v3699_v12 }
 0x5b2   : > { %v4757_v13 = vpop.f32.mrb[184].mxu0 }
 0x5b3   : > { %v3720_v14 = vadd.f32 %v4757_v13, %v5800_v32  ;;  %v3711_v15 = vpop.f32.mrb[185].mxu0 }
 0x5b4   : > { %v3712_v5 = vadd.f32 %v5800_v32, %v3711_v15  ;;  %v4758_v16 = vpop.f32.mrb[186].mxu0 }
 0x5b5   : > { %3812 = vst.msk [vmem:[%s5805_s22 + $0x1b0] sm:$0xff] %vm2287_vm5, %v3720_v14  ;;  %v3723_v17 = vadd.f32 %v4758_v16, %v5800_v32  ;;  %v3714_v18 = vpop.f32.mrb[187].mxu0 }
 0x5b6   : > { %3810 = vst.msk [vmem:[%s5805_s22 + $0x1a0] sm:$0xff] %vm2287_vm5, %v3712_v5  ;;  %v3715_v19 = vadd.f32 %v5800_v32, %v3714_v18 }
 0x5b7   : > { %3813 = vst.msk [vmem:[%s5805_s22 + $0x1b8] sm:$0xff] %vm2287_vm5, %v3723_v17 }
 0x5b8   : > { %3811 = vst.msk [vmem:[%s5805_s22 + $0x1a8] sm:$0xff] %vm2287_vm5, %v3715_v19 }
 0x5ba   : > { %v4761_v20 = vpop.f32.mrb[188].mxu0 }
 0x5bb   : > { %v3736_v22 = vadd.f32 %v4761_v20, %v5800_v32  ;;  %v3727_v23 = vpop.f32.mrb[189].mxu0 }
 0x5bc   : > { %v3728_v24 = vadd.f32 %v5800_v32, %v3727_v23  ;;  %v4762_v25 = vpop.f32.mrb[190].mxu0 }
 0x5bd   : > { %3816 = vst.msk [vmem:[%s5805_s22 + $0x1d0] sm:$0xff] %vm2287_vm5, %v3736_v22  ;;  %v3739_v26 = vadd.f32 %v4762_v25, %v5800_v32  ;;  %v3730_v27 = vpop.f32.mrb[191].mxu0 }
 0x5be   : > { %3814 = vst.msk [vmem:[%s5805_s22 + $0x1c0] sm:$0xff] %vm2287_vm5, %v3728_v24  ;;  %v3731_v28 = vadd.f32 %v5800_v32, %v3730_v27 }
 0x5bf   : > { %3817 = vst.msk [vmem:[%s5805_s22 + $0x1d8] sm:$0xff] %vm2287_vm5, %v3739_v26 }
 0x5c0   : > { %3815 = vst.msk [vmem:[%s5805_s22 + $0x1c8] sm:$0xff] %vm2287_vm5, %v3731_v28 }
 0x5c2   : > { %v4765_v45 = vpop.f32.mrb[192].mxu0 }
 0x5c3   : > { %v3752_v49 = vadd.f32 %v4765_v45, %v5800_v32  ;;  %v3743_v39 = vpop.f32.mrb[193].mxu0 }
 0x5c4   : > { %v3744_v29 = vadd.f32 %v5800_v32, %v3743_v39  ;;  %v4766_v30 = vpop.f32.mrb[194].mxu0 }
 0x5c5   : > { %3820 = vst.msk [vmem:[%s5805_s22 + $0x1f0] sm:$0xff] %vm2287_vm5, %v3752_v49  ;;  %v3755_v31 = vadd.f32 %v4766_v30, %v5800_v32  ;;  %v3746_v21 = vpop.f32.mrb[195].mxu0 }
 0x5c6   : > { %3818 = vst.msk [vmem:[%s5805_s22 + $0x1e0] sm:$0xff] %vm2287_vm5, %v3744_v29  ;;  %v3747_v33 = vadd.f32 %v5800_v32, %v3746_v21 }
 0x5c7   : > { %3821 = vst.msk [vmem:[%s5805_s22 + $0x1f8] sm:$0xff] %vm2287_vm5, %v3755_v31 }
 0x5c8   : > { %3819 = vst.msk [vmem:[%s5805_s22 + $0x1e8] sm:$0xff] %vm2287_vm5, %v3747_v33 }
 0x5c9 PF: > { %s26_s25 = sadd.s32 1, %s4861_s25   ;;  %s6037_s27 = sld [smem:[#allocation2_spill]] }
 0x5ca   : > { %p23_p7 = scmp.ge.s32.totalorder %s26_s25, 10   ;;  %s6038_s26 = sld [smem:[#allocation3_spill]] }
 0x5cb   : > { %s6039_s21 = smov %s4853_s23  ;;  %s6040_s22 = smov %s4857_s24 }
 0x5cc   :  { %25 = sbr.rel (!%p23_p7) target bundleno = 4 (0x4), region = 117 }
 0x5cf   : > { %s6041_s23 = smov %s6037_s27 }
 0x5d0   : > { %s6042_s24 = smov %s6038_s26 }

</bundles_post_ra>
